<compile_context>
chip_gen: v5e
topology: v5e:2x2
jax: 0.10.0
libtpu: 0.0.40
codegen_flags: <defaults>
</compile_context>

<pallas_src>
import numpy as np
import jax
import jax.numpy as jnp
from jax import lax
from jax.experimental import pallas as pl
from jax.experimental.pallas import tpu as pltpu

# ----------------------------- static config --------------------------------
# (mirrors the PyTorch `args` + LinearDRAMAttention.__init__ constants)
N_EMBD = 64
N_HEAD = 4
HEAD_DIM = N_EMBD // N_HEAD
BLOCK_SIZE = 64            # sequence length T
SLIDING_WINDOW = 16        # args.sliding_window_size
DECAY_FACTOR = 0.1         # args.decay_factor
ARRAY_LEN = 32             # LinearDRAMAttention(array_len=32) -> AV tile width
Q_LEVELS_IN = 16           # args.quantization_levels_input
Q_LEVELS_W = 16            # args.quantization_levels_weights
Q_LEVELS_OUT = 2 ** 32     # args.quantization_levels_output -> disabled
APPLY_Q_IN = Q_LEVELS_IN != 2 ** 32
APPLY_Q_W = Q_LEVELS_W != 2 ** 32
APPLY_Q_OUT = Q_LEVELS_OUT != 2 ** 32

IN_LO, IN_HI = 0.0, 1.0        # input_clamping_bounds
W_LO, W_HI = 0.0, 0.9          # weights_clamping_bounds
OUT_LO, OUT_HI = -1.0, 1.0     # output_clamping_bounds
AMP_QK = 19.3                  # offset_weights_matmul_QK amp_coefficient
AMP_AV = 19.3                  # offset_weights_matmul_AV amp_coefficient
OFF_W = 0.45                   # offset_weight (both QK and AV)
ATT_SCALE = 1.0 / 80.0         # att_score_scaler (a fixed by range clamp)
WA_SCALE = 1.0 / 40.0          # weight_average_scaler (a fixed by range clamp)

# quantization steps + reciprocals precomputed at trace time (no in-kernel div)
QSTEP_IN = (IN_HI - IN_LO) / (Q_LEVELS_IN - 1)
INV_QSTEP_IN = 1.0 / QSTEP_IN
QSTEP_W = (W_HI - W_LO) / (Q_LEVELS_W - 1)
INV_QSTEP_W = 1.0 / QSTEP_W

# dropout = 0.0 / eval mode -> dropout layers are identities (skipped).
# BinsCount(apply=False), read-noise Identity, calibration stats: no-ops.


# ------------------------------ helpers --------------------------------------
def quantize(x, apply_q, q_step, inv_q_step):
    """quantization_custom.forward: q_step * round(x / q_step), divide hoisted."""
    if not apply_q:
        return x
    return q_step * jnp.round(x * inv_q_step)


def window_mask(n_tokens, chunk):
    """WindowMaskGeneration as an exact 0.0/1.0 (T, T) float mask."""
    rows = jnp.arange(n_tokens)[:, None]
    cols = jnp.arange(n_tokens)[None, :]
    m = (cols <= rows) & (cols >= rows - chunk + 1)
    return m.astype(jnp.float32)


def make_decay_mask(mask, decay_factor):
    """decay_mask module: decay ** (cumsum(mask, dim=-2) - 1)."""
    cum = jnp.cumsum(mask, axis=0) - 1.0
    decay = np.exp(-decay_factor)
    return jnp.power(jnp.float32(decay), cum)


def clamp_scaler_params(scal):
    """range_scaler.forward: a clamped to [1e-20, inf), b unbounded (defaults)."""
    return scal.at[:, 0::2].set(jnp.maximum(scal[:, 0::2], 1e-20))


def build_scale_vectors(scal_eff, head_dim):
    """(H, 8) per-head [qa,qb,ka,kb,va,vb,oa,ob] -> (8, H*D) per-column vectors."""
    return jnp.repeat(scal_eff.T, head_dim, axis=1)


# --------------------------- fused attention kernel --------------------------
def _fused_attn_kernel(x_ref, wa_ref, ba_ref, wp_ref, bp_ref, dm_ref, sv_ref,
                       o_ref):
    T, C = x_ref.shape[1], x_ref.shape[2]
    H, D, L = N_HEAD, HEAD_DIM, ARRAY_LEN
    n_tiles = T // L

    x = x_ref[0]                       # (T, C)
    dm = dm_ref[...]                   # (T, T) = decay * window_mask (exact)

    # c_attn: three lane-aligned (C, C) matmuls -> q / k / v slabs (T, C)
    q = jnp.dot(x, wa_ref[0], preferred_element_type=jnp.float32) + ba_ref[0]
    k = jnp.dot(x, wa_ref[1], preferred_element_type=jnp.float32) + ba_ref[1]
    v = jnp.dot(x, wa_ref[2], preferred_element_type=jnp.float32) + ba_ref[2]

    # per-head range_scaler (a*x + b, a pre-clamped host-side), clamp, quantize
    qs = quantize(jnp.clip(q * sv_ref[0:1, :] + sv_ref[1:2, :], IN_LO, IN_HI),
                  APPLY_Q_IN, QSTEP_IN, INV_QSTEP_IN)
    ks = quantize(jnp.clip(k * sv_ref[2:3, :] + sv_ref[3:4, :], W_LO, W_HI),
                  APPLY_Q_W, QSTEP_W, INV_QSTEP_W)
    vs = quantize(jnp.clip(v * sv_ref[4:5, :] + sv_ref[5:6, :], W_LO, W_HI),
                  APPLY_Q_W, QSTEP_W, INV_QSTEP_W)
    ks = ks - OFF_W                    # offset_weight folded in once
    vs = vs - OFF_W

    head_outs = []
    for h in range(H):                 # H = 4, unrolled at trace time
        c0 = h * D
        q_h = qs[:, c0:c0 + D]         # (T, D)
        k_h = ks[:, c0:c0 + D]
        v_h = vs[:, c0:c0 + D]

        # offset_weights_matmul_QK + decay/window mask + att_score_scaler.
        # dm == decay*mask, so (att*decay) masked == att*dm; the second
        # masked_fill of the original is mathematically redundant.
        att = AMP_QK * lax.dot_general(q_h, k_h, (((1,), (1,)), ((), ())),
                                       preferred_element_type=jnp.float32)
        att = jnp.clip(ATT_SCALE * (att * dm), IN_LO, IN_HI)   # NL is Identity

        a_full = att * dm              # 2nd decay multiply hoisted out of tiles
        acc = jnp.zeros((T, D), jnp.float32)
        for t in range(n_tiles):       # tiled offset_weights_matmul_AV
            r0 = t * L
            y_t = AMP_AV * jnp.dot(a_full[:, r0:r0 + L], v_h[r0:r0 + L, :],
                                   preferred_element_type=jnp.float32)
            # weight_average_scaler, output clamp; output quantization disabled
            acc = acc + jnp.clip(WA_SCALE * y_t, OUT_LO, OUT_HI)
        head_outs.append(acc)

    y = jnp.concatenate(head_outs, axis=1)            # (T, C), lane-dense
    y = y * sv_ref[6:7, :] + sv_ref[7:8, :]           # per-head output_scaler
    # c_proj
    o_ref[0] = (jnp.dot(y, wp_ref[...], preferred_element_type=jnp.float32)
                + bp_ref[...])


def linear_dram_attention_forward(x, params, decay_mask, scale_vecs):
    """Fused c_attn + analog attention + c_proj, grid over batch only."""
    B, T, C = x.shape
    # TODO(synk): T % array_len != 0 (zero-padding path) not implemented.
    assert T % ARRAY_LEN == 0
    w_attn3 = jnp.stack(jnp.split(params["w_attn"], 3, axis=1))      # (3, C, C)
    b_attn3 = jnp.stack(jnp.split(params["b_attn"], 3)).reshape(3, 1, C)
    w_proj = params["w_proj"]
    b_proj = params["b_proj"].reshape(1, C)
    return pl.pallas_call(
        _fused_attn_kernel,
        out_shape=jax.ShapeDtypeStruct((B, T, C), jnp.float32),
        grid=(B,),
        in_specs=[
            pl.BlockSpec((1, T, C), lambda b: (b, 0, 0)),    # x
            pl.BlockSpec((3, C, C), lambda b: (0, 0, 0)),    # w_attn (q,k,v)
            pl.BlockSpec((3, 1, C), lambda b: (0, 0, 0)),    # b_attn
            pl.BlockSpec((C, C), lambda b: (0, 0)),          # w_proj
            pl.BlockSpec((1, C), lambda b: (0, 0)),          # b_proj
            pl.BlockSpec((T, T), lambda b: (0, 0)),          # decay * mask
            pl.BlockSpec((8, C), lambda b: (0, 0)),          # per-column a/b
        ],
        out_specs=pl.BlockSpec((1, T, C), lambda b: (b, 0, 0)),
        compiler_params=pltpu.CompilerParams(
            dimension_semantics=("parallel",)),              # 2 TCs on v7x
    )(x, w_attn3, b_attn3, w_proj, b_proj, decay_mask, scale_vecs)


# -------------------------- pure-JAX reference --------------------------------
def ref_attention(q, k, v, mask, decay, scal):
    B, H, T, D = q.shape
    qa = scal[:, 0].reshape(1, H, 1, 1); qb = scal[:, 1].reshape(1, H, 1, 1)
    ka = scal[:, 2].reshape(1, H, 1, 1); kb = scal[:, 3].reshape(1, H, 1, 1)
    va = scal[:, 4].reshape(1, H, 1, 1); vb = scal[:, 5].reshape(1, H, 1, 1)
    oa = scal[:, 6].reshape(1, H, 1, 1); ob = scal[:, 7].reshape(1, H, 1, 1)
    kT = jnp.swapaxes(k, 2, 3)
    qq = quantize(jnp.clip(qa * q + qb, IN_LO, IN_HI),
                  APPLY_Q_IN, QSTEP_IN, INV_QSTEP_IN)
    kk = quantize(jnp.clip(ka * kT + kb, W_LO, W_HI),
                  APPLY_Q_W, QSTEP_W, INV_QSTEP_W)
    vv = quantize(jnp.clip(va * v + vb, W_LO, W_HI),
                  APPLY_Q_W, QSTEP_W, INV_QSTEP_W)
    att = AMP_QK * jnp.einsum("bhtd,bhds->bhts", qq, kk - OFF_W)
    att = att * decay[None, None]
    att = jnp.where(mask[None, None] == 0.0, 0.0, att)
    att = ATT_SCALE * att
    att = jnp.where(mask[None, None] == 0.0, 0.0, att)
    att = jnp.clip(att, IN_LO, IN_HI)
    nt, L = T // ARRAY_LEN, ARRAY_LEN
    xt = att.reshape(B, H, T, nt, L).transpose(0, 1, 3, 2, 4)      # (B,H,nt,T,L)
    vt = vv.reshape(B, H, nt, L, D)
    dmt = decay.reshape(T, nt, L).transpose(1, 0, 2)[None, None]   # (1,1,nt,T,L)
    xt = xt * dmt
    y = AMP_AV * jnp.einsum("bhntl,bhnld->bhntd", xt, vt - OFF_W)
    y = WA_SCALE * y
    y = jnp.clip(y, OUT_LO, OUT_HI)
    # output quantization disabled (Q_LEVELS_OUT == 2**32)
    y = y.sum(axis=2)
    return oa * y + ob


def ref_forward(x, params, mask, decay, scal):
    B, T, C = x.shape
    H, D = N_HEAD, C // N_HEAD
    qkv = x.reshape(B * T, C) @ params["w_attn"] + params["b_attn"]
    qkv = qkv.reshape(B, T, 3 * C)
    q, k, v = jnp.split(qkv, 3, axis=-1)
    q = q.reshape(B, T, H, D).transpose(0, 2, 1, 3)
    k = k.reshape(B, T, H, D).transpose(0, 2, 1, 3)
    v = v.reshape(B, T, H, D).transpose(0, 2, 1, 3)
    y = ref_attention(q, k, v, mask, decay, scal)
    y = y.transpose(0, 2, 1, 3).reshape(B * T, C)
    y = y @ params["w_proj"] + params["b_proj"]
    return y.reshape(B, T, C)


# --------------------------------- main ---------------------------------------
if __name__ == "__main__":
    B, T, C, H = 2, BLOCK_SIZE, N_EMBD, N_HEAD

    key = jax.random.PRNGKey(0)
    kx, k1, k2, k3, k4 = jax.random.split(key, 5)
    x = jax.random.normal(kx, (B, T, C), dtype=jnp.float32)
    params = {
        "w_attn": jax.random.normal(k1, (C, 3 * C), jnp.float32) / np.sqrt(C),
        "b_attn": 0.01 * jax.random.normal(k2, (3 * C,), jnp.float32),
        "w_proj": jax.random.normal(k3, (C, C), jnp.float32) / np.sqrt(C),
        "b_proj": 0.01 * jax.random.normal(k4, (C,), jnp.float32),
    }

    # buffers (window + decay masks) and per-head range_scaler params
    # scal columns: [q_a, q_b, k_a, k_b, v_a, v_b, out_a, out_b]
    mask = window_mask(T, SLIDING_WINDOW)
    decay = make_decay_mask(mask, DECAY_FACTOR)
    scal = jnp.tile(jnp.array([1.0, 0.0, 1.0, 0.45, 1.0, 0.45, 1.0, 0.0],
                              dtype=jnp.float32), (H, 1))
    scal_eff = clamp_scaler_params(scal)           # range_scaler a/b clamping
    decay_mask = decay * mask                      # pre-combined (T, T) buffer
    scale_vecs = build_scale_vectors(scal_eff, HEAD_DIM)   # (8, C)

    y_pallas = jax.block_until_ready(
        linear_dram_attention_forward(x, params, decay_mask, scale_vecs))

    # correctness check against a pure-JAX reference of the full forward
    y_ref = ref_forward(x, params, mask, decay, scal_eff)
    np.testing.assert_allclose(np.asarray(y_pallas), np.asarray(y_ref),
                               rtol=1e-3, atol=1e-3)

    print("KERNEL_OK")
</pallas_src>

<mosaic_0001>
module attributes {stable_mosaic.version = 11 : i64} {
  func.func @_fused_attn_kernel(%arg0: i32, %arg1: memref<1x64x64xf32, #tpu.memory_space<vmem>>, %arg2: memref<3x64x64xf32, #tpu.memory_space<vmem>>, %arg3: memref<3x1x64xf32, #tpu.memory_space<vmem>>, %arg4: memref<64x64xf32, #tpu.memory_space<vmem>>, %arg5: memref<1x64xf32, #tpu.memory_space<vmem>>, %arg6: memref<64x64xf32, #tpu.memory_space<vmem>>, %arg7: memref<8x64xf32, #tpu.memory_space<vmem>>, %arg8: memref<1x64x64xf32, #tpu.memory_space<vmem>>) attributes {dimension_semantics = [#tpu.dimension_semantics<parallel>], iteration_bounds = array<i64: 2>, scalar_prefetch = 0 : i64, scratch_operands = 0 : i64, tpu.core_type = #tpu.core_type<tc>, window_params = [{transform_indices = @transform_0, window_bounds = array<i64: 1, 64, 64>}, {pipeline_mode = #tpu.pipeline_mode<synchronous>, transform_indices = @transform_1, window_bounds = array<i64: 3, 64, 64>}, {pipeline_mode = #tpu.pipeline_mode<synchronous>, transform_indices = @transform_2, window_bounds = array<i64: 3, 1, 64>}, {pipeline_mode = #tpu.pipeline_mode<synchronous>, transform_indices = @transform_3, window_bounds = array<i64: 64, 64>}, {pipeline_mode = #tpu.pipeline_mode<synchronous>, transform_indices = @transform_4, window_bounds = array<i64: 1, 64>}, {pipeline_mode = #tpu.pipeline_mode<synchronous>, transform_indices = @transform_5, window_bounds = array<i64: 64, 64>}, {pipeline_mode = #tpu.pipeline_mode<synchronous>, transform_indices = @transform_6, window_bounds = array<i64: 8, 64>}, {transform_indices = @transform_7, window_bounds = array<i64: 1, 64, 64>}]} {
    %c0 = arith.constant 0 : index
    %c0_0 = arith.constant 0 : index
    %c0_1 = arith.constant 0 : index
    %0 = vector.load %arg1[%c0, %c0_0, %c0_1] : memref<1x64x64xf32, #tpu.memory_space<vmem>>, vector<1x64x64xf32>
    %1 = vector.shape_cast %0 : vector<1x64x64xf32> to vector<64x64xf32>
    %c0_2 = arith.constant 0 : index
    %c0_3 = arith.constant 0 : index
    %2 = vector.load %arg6[%c0_2, %c0_3] : memref<64x64xf32, #tpu.memory_space<vmem>>, vector<64x64xf32>
    %c0_4 = arith.constant 0 : index
    %c0_5 = arith.constant 0 : index
    %c0_6 = arith.constant 0 : index
    %3 = vector.load %arg2[%c0_4, %c0_5, %c0_6] : memref<3x64x64xf32, #tpu.memory_space<vmem>>, vector<1x64x64xf32>
    %4 = vector.shape_cast %3 : vector<1x64x64xf32> to vector<64x64xf32>
    %cst = arith.constant dense<0.000000e+00> : vector<64x64xf32>
    %5 = tpu.matmul %1, %4, %cst {dimension_numbers = #tpu.dot_dimension_numbers<[1], [0], [0], [1], [0, 0, 1, 1], [], []>} : vector<64x64xf32>, vector<64x64xf32>, vector<64x64xf32> -> vector<64x64xf32>
    %c0_7 = arith.constant 0 : index
    %c0_8 = arith.constant 0 : index
    %c0_9 = arith.constant 0 : index
    %6 = vector.load %arg3[%c0_7, %c0_8, %c0_9] : memref<3x1x64xf32, #tpu.memory_space<vmem>>, vector<1x1x64xf32>
    %7 = vector.shape_cast %6 : vector<1x1x64xf32> to vector<1x64xf32>
    %8 = vector.broadcast %7 : vector<1x64xf32> to vector<64x64xf32>
    %9 = arith.addf %5, %8 : vector<64x64xf32>
    %c1 = arith.constant 1 : index
    %c0_10 = arith.constant 0 : index
    %c0_11 = arith.constant 0 : index
    %10 = vector.load %arg2[%c1, %c0_10, %c0_11] : memref<3x64x64xf32, #tpu.memory_space<vmem>>, vector<1x64x64xf32>
    %11 = vector.shape_cast %10 : vector<1x64x64xf32> to vector<64x64xf32>
    %cst_12 = arith.constant dense<0.000000e+00> : vector<64x64xf32>
    %12 = tpu.matmul %1, %11, %cst_12 {dimension_numbers = #tpu.dot_dimension_numbers<[1], [0], [0], [1], [0, 0, 1, 1], [], []>} : vector<64x64xf32>, vector<64x64xf32>, vector<64x64xf32> -> vector<64x64xf32>
    %c1_13 = arith.constant 1 : index
    %c0_14 = arith.constant 0 : index
    %c0_15 = arith.constant 0 : index
    %13 = vector.load %arg3[%c1_13, %c0_14, %c0_15] : memref<3x1x64xf32, #tpu.memory_space<vmem>>, vector<1x1x64xf32>
    %14 = vector.shape_cast %13 : vector<1x1x64xf32> to vector<1x64xf32>
    %15 = vector.broadcast %14 : vector<1x64xf32> to vector<64x64xf32>
    %16 = arith.addf %12, %15 : vector<64x64xf32>
    %c2 = arith.constant 2 : index
    %c0_16 = arith.constant 0 : index
    %c0_17 = arith.constant 0 : index
    %17 = vector.load %arg2[%c2, %c0_16, %c0_17] : memref<3x64x64xf32, #tpu.memory_space<vmem>>, vector<1x64x64xf32>
    %18 = vector.shape_cast %17 : vector<1x64x64xf32> to vector<64x64xf32>
    %cst_18 = arith.constant dense<0.000000e+00> : vector<64x64xf32>
    %19 = tpu.matmul %1, %18, %cst_18 {dimension_numbers = #tpu.dot_dimension_numbers<[1], [0], [0], [1], [0, 0, 1, 1], [], []>} : vector<64x64xf32>, vector<64x64xf32>, vector<64x64xf32> -> vector<64x64xf32>
    %c2_19 = arith.constant 2 : index
    %c0_20 = arith.constant 0 : index
    %c0_21 = arith.constant 0 : index
    %20 = vector.load %arg3[%c2_19, %c0_20, %c0_21] : memref<3x1x64xf32, #tpu.memory_space<vmem>>, vector<1x1x64xf32>
    %21 = vector.shape_cast %20 : vector<1x1x64xf32> to vector<1x64xf32>
    %22 = vector.broadcast %21 : vector<1x64xf32> to vector<64x64xf32>
    %23 = arith.addf %19, %22 : vector<64x64xf32>
    %c0_22 = arith.constant 0 : index
    %c0_23 = arith.constant 0 : index
    %24 = vector.load %arg7[%c0_22, %c0_23] : memref<8x64xf32, #tpu.memory_space<vmem>>, vector<1x64xf32>
    %25 = vector.broadcast %24 : vector<1x64xf32> to vector<64x64xf32>
    %26 = arith.mulf %9, %25 : vector<64x64xf32>
    %c1_24 = arith.constant 1 : index
    %c0_25 = arith.constant 0 : index
    %27 = vector.load %arg7[%c1_24, %c0_25] : memref<8x64xf32, #tpu.memory_space<vmem>>, vector<1x64xf32>
    %28 = vector.broadcast %27 : vector<1x64xf32> to vector<64x64xf32>
    %29 = arith.addf %26, %28 : vector<64x64xf32>
    %cst_26 = arith.constant 0.000000e+00 : f32
    %cst_27 = arith.constant 1.000000e+00 : f32
    %30 = vector.broadcast %cst_26 : f32 to vector<64x64xf32>
    %31 = arith.maximumf %30, %29 : vector<64x64xf32>
    %32 = vector.broadcast %cst_27 : f32 to vector<64x64xf32>
    %33 = arith.minimumf %32, %31 : vector<64x64xf32>
    %cst_28 = arith.constant 1.500000e+01 : f32
    %34 = vector.broadcast %cst_28 : f32 to vector<64x64xf32>
    %35 = arith.mulf %33, %34 : vector<64x64xf32>
    %36 = math.roundeven %35 : vector<64x64xf32>
    %cst_29 = arith.constant 0.0666666701 : f32
    %37 = vector.broadcast %cst_29 : f32 to vector<64x64xf32>
    %38 = arith.mulf %37, %36 : vector<64x64xf32>
    %c2_30 = arith.constant 2 : index
    %c0_31 = arith.constant 0 : index
    %39 = vector.load %arg7[%c2_30, %c0_31] : memref<8x64xf32, #tpu.memory_space<vmem>>, vector<1x64xf32>
    %40 = vector.broadcast %39 : vector<1x64xf32> to vector<64x64xf32>
    %41 = arith.mulf %16, %40 : vector<64x64xf32>
    %c3 = arith.constant 3 : index
    %c0_32 = arith.constant 0 : index
    %42 = vector.load %arg7[%c3, %c0_32] : memref<8x64xf32, #tpu.memory_space<vmem>>, vector<1x64xf32>
    %43 = vector.broadcast %42 : vector<1x64xf32> to vector<64x64xf32>
    %44 = arith.addf %41, %43 : vector<64x64xf32>
    %cst_33 = arith.constant 0.000000e+00 : f32
    %cst_34 = arith.constant 0.899999976 : f32
    %45 = vector.broadcast %cst_33 : f32 to vector<64x64xf32>
    %46 = arith.maximumf %45, %44 : vector<64x64xf32>
    %47 = vector.broadcast %cst_34 : f32 to vector<64x64xf32>
    %48 = arith.minimumf %47, %46 : vector<64x64xf32>
    %cst_35 = arith.constant 16.666666 : f32
    %49 = vector.broadcast %cst_35 : f32 to vector<64x64xf32>
    %50 = arith.mulf %48, %49 : vector<64x64xf32>
    %51 = math.roundeven %50 : vector<64x64xf32>
    %cst_36 = arith.constant 6.000000e-02 : f32
    %52 = vector.broadcast %cst_36 : f32 to vector<64x64xf32>
    %53 = arith.mulf %52, %51 : vector<64x64xf32>
    %c4 = arith.constant 4 : index
    %c0_37 = arith.constant 0 : index
    %54 = vector.load %arg7[%c4, %c0_37] : memref<8x64xf32, #tpu.memory_space<vmem>>, vector<1x64xf32>
    %55 = vector.broadcast %54 : vector<1x64xf32> to vector<64x64xf32>
    %56 = arith.mulf %23, %55 : vector<64x64xf32>
    %c5 = arith.constant 5 : index
    %c0_38 = arith.constant 0 : index
    %57 = vector.load %arg7[%c5, %c0_38] : memref<8x64xf32, #tpu.memory_space<vmem>>, vector<1x64xf32>
    %58 = vector.broadcast %57 : vector<1x64xf32> to vector<64x64xf32>
    %59 = arith.addf %56, %58 : vector<64x64xf32>
    %cst_39 = arith.constant 0.000000e+00 : f32
    %cst_40 = arith.constant 0.899999976 : f32
    %60 = vector.broadcast %cst_39 : f32 to vector<64x64xf32>
    %61 = arith.maximumf %60, %59 : vector<64x64xf32>
    %62 = vector.broadcast %cst_40 : f32 to vector<64x64xf32>
    %63 = arith.minimumf %62, %61 : vector<64x64xf32>
    %cst_41 = arith.constant 16.666666 : f32
    %64 = vector.broadcast %cst_41 : f32 to vector<64x64xf32>
    %65 = arith.mulf %63, %64 : vector<64x64xf32>
    %66 = math.roundeven %65 : vector<64x64xf32>
    %cst_42 = arith.constant 6.000000e-02 : f32
    %67 = vector.broadcast %cst_42 : f32 to vector<64x64xf32>
    %68 = arith.mulf %67, %66 : vector<64x64xf32>
    %cst_43 = arith.constant 4.500000e-01 : f32
    %69 = vector.broadcast %cst_43 : f32 to vector<64x64xf32>
    %70 = arith.subf %53, %69 : vector<64x64xf32>
    %cst_44 = arith.constant 4.500000e-01 : f32
    %71 = vector.broadcast %cst_44 : f32 to vector<64x64xf32>
    %72 = arith.subf %68, %71 : vector<64x64xf32>
    %73 = vector.extract_strided_slice %38 {offsets = [0, 0], sizes = [64, 16], strides = [1, 1]} : vector<64x64xf32> to vector<64x16xf32>
    %74 = vector.extract_strided_slice %70 {offsets = [0, 0], sizes = [64, 16], strides = [1, 1]} : vector<64x64xf32> to vector<64x16xf32>
    %75 = vector.extract_strided_slice %72 {offsets = [0, 0], sizes = [64, 16], strides = [1, 1]} : vector<64x64xf32> to vector<64x16xf32>
    %cst_45 = arith.constant dense<0.000000e+00> : vector<64x64xf32>
    %76 = tpu.matmul %73, %74, %cst_45 {dimension_numbers = #tpu.dot_dimension_numbers<[1], [1], [0], [0], [0, 0, 1, 0], [], []>} : vector<64x16xf32>, vector<64x16xf32>, vector<64x64xf32> -> vector<64x64xf32>
    %cst_46 = arith.constant 1.930000e+01 : f32
    %77 = vector.broadcast %cst_46 : f32 to vector<64x64xf32>
    %78 = arith.mulf %77, %76 : vector<64x64xf32>
    %79 = arith.mulf %78, %2 : vector<64x64xf32>
    %cst_47 = arith.constant 1.250000e-02 : f32
    %80 = vector.broadcast %cst_47 : f32 to vector<64x64xf32>
    %81 = arith.mulf %80, %79 : vector<64x64xf32>
    %cst_48 = arith.constant 0.000000e+00 : f32
    %cst_49 = arith.constant 1.000000e+00 : f32
    %82 = vector.broadcast %cst_48 : f32 to vector<64x64xf32>
    %83 = arith.maximumf %82, %81 : vector<64x64xf32>
    %84 = vector.broadcast %cst_49 : f32 to vector<64x64xf32>
    %85 = arith.minimumf %84, %83 : vector<64x64xf32>
    %86 = arith.mulf %85, %2 : vector<64x64xf32>
    %cst_50 = arith.constant 0.000000e+00 : f32
    %87 = vector.broadcast %cst_50 : f32 to vector<64x16xf32>
    %88 = vector.extract_strided_slice %86 {offsets = [0, 0], sizes = [64, 32], strides = [1, 1]} : vector<64x64xf32> to vector<64x32xf32>
    %89 = vector.extract_strided_slice %75 {offsets = [0, 0], sizes = [32, 16], strides = [1, 1]} : vector<64x16xf32> to vector<32x16xf32>
    %cst_51 = arith.constant dense<0.000000e+00> : vector<64x16xf32>
    %90 = tpu.matmul %88, %89, %cst_51 {dimension_numbers = #tpu.dot_dimension_numbers<[1], [0], [0], [1], [0, 0, 1, 1], [], []>} : vector<64x32xf32>, vector<32x16xf32>, vector<64x16xf32> -> vector<64x16xf32>
    %cst_52 = arith.constant 1.930000e+01 : f32
    %91 = vector.broadcast %cst_52 : f32 to vector<64x16xf32>
    %92 = arith.mulf %91, %90 : vector<64x16xf32>
    %cst_53 = arith.constant 2.500000e-02 : f32
    %93 = vector.broadcast %cst_53 : f32 to vector<64x16xf32>
    %94 = arith.mulf %93, %92 : vector<64x16xf32>
    %cst_54 = arith.constant -1.000000e+00 : f32
    %cst_55 = arith.constant 1.000000e+00 : f32
    %95 = vector.broadcast %cst_54 : f32 to vector<64x16xf32>
    %96 = arith.maximumf %95, %94 : vector<64x16xf32>
    %97 = vector.broadcast %cst_55 : f32 to vector<64x16xf32>
    %98 = arith.minimumf %97, %96 : vector<64x16xf32>
    %99 = arith.addf %87, %98 : vector<64x16xf32>
    %100 = vector.extract_strided_slice %86 {offsets = [0, 32], sizes = [64, 32], strides = [1, 1]} : vector<64x64xf32> to vector<64x32xf32>
    %101 = vector.extract_strided_slice %75 {offsets = [32, 0], sizes = [32, 16], strides = [1, 1]} : vector<64x16xf32> to vector<32x16xf32>
    %cst_56 = arith.constant dense<0.000000e+00> : vector<64x16xf32>
    %102 = tpu.matmul %100, %101, %cst_56 {dimension_numbers = #tpu.dot_dimension_numbers<[1], [0], [0], [1], [0, 0, 1, 1], [], []>} : vector<64x32xf32>, vector<32x16xf32>, vector<64x16xf32> -> vector<64x16xf32>
    %cst_57 = arith.constant 1.930000e+01 : f32
    %103 = vector.broadcast %cst_57 : f32 to vector<64x16xf32>
    %104 = arith.mulf %103, %102 : vector<64x16xf32>
    %cst_58 = arith.constant 2.500000e-02 : f32
    %105 = vector.broadcast %cst_58 : f32 to vector<64x16xf32>
    %106 = arith.mulf %105, %104 : vector<64x16xf32>
    %cst_59 = arith.constant -1.000000e+00 : f32
    %cst_60 = arith.constant 1.000000e+00 : f32
    %107 = vector.broadcast %cst_59 : f32 to vector<64x16xf32>
    %108 = arith.maximumf %107, %106 : vector<64x16xf32>
    %109 = vector.broadcast %cst_60 : f32 to vector<64x16xf32>
    %110 = arith.minimumf %109, %108 : vector<64x16xf32>
    %111 = arith.addf %99, %110 : vector<64x16xf32>
    %112 = vector.extract_strided_slice %38 {offsets = [0, 16], sizes = [64, 16], strides = [1, 1]} : vector<64x64xf32> to vector<64x16xf32>
    %113 = vector.extract_strided_slice %70 {offsets = [0, 16], sizes = [64, 16], strides = [1, 1]} : vector<64x64xf32> to vector<64x16xf32>
    %114 = vector.extract_strided_slice %72 {offsets = [0, 16], sizes = [64, 16], strides = [1, 1]} : vector<64x64xf32> to vector<64x16xf32>
    %cst_61 = arith.constant dense<0.000000e+00> : vector<64x64xf32>
    %115 = tpu.matmul %112, %113, %cst_61 {dimension_numbers = #tpu.dot_dimension_numbers<[1], [1], [0], [0], [0, 0, 1, 0], [], []>} : vector<64x16xf32>, vector<64x16xf32>, vector<64x64xf32> -> vector<64x64xf32>
    %cst_62 = arith.constant 1.930000e+01 : f32
    %116 = vector.broadcast %cst_62 : f32 to vector<64x64xf32>
    %117 = arith.mulf %116, %115 : vector<64x64xf32>
    %118 = arith.mulf %117, %2 : vector<64x64xf32>
    %cst_63 = arith.constant 1.250000e-02 : f32
    %119 = vector.broadcast %cst_63 : f32 to vector<64x64xf32>
    %120 = arith.mulf %119, %118 : vector<64x64xf32>
    %cst_64 = arith.constant 0.000000e+00 : f32
    %cst_65 = arith.constant 1.000000e+00 : f32
    %121 = vector.broadcast %cst_64 : f32 to vector<64x64xf32>
    %122 = arith.maximumf %121, %120 : vector<64x64xf32>
    %123 = vector.broadcast %cst_65 : f32 to vector<64x64xf32>
    %124 = arith.minimumf %123, %122 : vector<64x64xf32>
    %125 = arith.mulf %124, %2 : vector<64x64xf32>
    %cst_66 = arith.constant 0.000000e+00 : f32
    %126 = vector.broadcast %cst_66 : f32 to vector<64x16xf32>
    %127 = vector.extract_strided_slice %125 {offsets = [0, 0], sizes = [64, 32], strides = [1, 1]} : vector<64x64xf32> to vector<64x32xf32>
    %128 = vector.extract_strided_slice %114 {offsets = [0, 0], sizes = [32, 16], strides = [1, 1]} : vector<64x16xf32> to vector<32x16xf32>
    %cst_67 = arith.constant dense<0.000000e+00> : vector<64x16xf32>
    %129 = tpu.matmul %127, %128, %cst_67 {dimension_numbers = #tpu.dot_dimension_numbers<[1], [0], [0], [1], [0, 0, 1, 1], [], []>} : vector<64x32xf32>, vector<32x16xf32>, vector<64x16xf32> -> vector<64x16xf32>
    %cst_68 = arith.constant 1.930000e+01 : f32
    %130 = vector.broadcast %cst_68 : f32 to vector<64x16xf32>
    %131 = arith.mulf %130, %129 : vector<64x16xf32>
    %cst_69 = arith.constant 2.500000e-02 : f32
    %132 = vector.broadcast %cst_69 : f32 to vector<64x16xf32>
    %133 = arith.mulf %132, %131 : vector<64x16xf32>
    %cst_70 = arith.constant -1.000000e+00 : f32
    %cst_71 = arith.constant 1.000000e+00 : f32
    %134 = vector.broadcast %cst_70 : f32 to vector<64x16xf32>
    %135 = arith.maximumf %134, %133 : vector<64x16xf32>
    %136 = vector.broadcast %cst_71 : f32 to vector<64x16xf32>
    %137 = arith.minimumf %136, %135 : vector<64x16xf32>
    %138 = arith.addf %126, %137 : vector<64x16xf32>
    %139 = vector.extract_strided_slice %125 {offsets = [0, 32], sizes = [64, 32], strides = [1, 1]} : vector<64x64xf32> to vector<64x32xf32>
    %140 = vector.extract_strided_slice %114 {offsets = [32, 0], sizes = [32, 16], strides = [1, 1]} : vector<64x16xf32> to vector<32x16xf32>
    %cst_72 = arith.constant dense<0.000000e+00> : vector<64x16xf32>
    %141 = tpu.matmul %139, %140, %cst_72 {dimension_numbers = #tpu.dot_dimension_numbers<[1], [0], [0], [1], [0, 0, 1, 1], [], []>} : vector<64x32xf32>, vector<32x16xf32>, vector<64x16xf32> -> vector<64x16xf32>
    %cst_73 = arith.constant 1.930000e+01 : f32
    %142 = vector.broadcast %cst_73 : f32 to vector<64x16xf32>
    %143 = arith.mulf %142, %141 : vector<64x16xf32>
    %cst_74 = arith.constant 2.500000e-02 : f32
    %144 = vector.broadcast %cst_74 : f32 to vector<64x16xf32>
    %145 = arith.mulf %144, %143 : vector<64x16xf32>
    %cst_75 = arith.constant -1.000000e+00 : f32
    %cst_76 = arith.constant 1.000000e+00 : f32
    %146 = vector.broadcast %cst_75 : f32 to vector<64x16xf32>
    %147 = arith.maximumf %146, %145 : vector<64x16xf32>
    %148 = vector.broadcast %cst_76 : f32 to vector<64x16xf32>
    %149 = arith.minimumf %148, %147 : vector<64x16xf32>
    %150 = arith.addf %138, %149 : vector<64x16xf32>
    %151 = vector.extract_strided_slice %38 {offsets = [0, 32], sizes = [64, 16], strides = [1, 1]} : vector<64x64xf32> to vector<64x16xf32>
    %152 = vector.extract_strided_slice %70 {offsets = [0, 32], sizes = [64, 16], strides = [1, 1]} : vector<64x64xf32> to vector<64x16xf32>
    %153 = vector.extract_strided_slice %72 {offsets = [0, 32], sizes = [64, 16], strides = [1, 1]} : vector<64x64xf32> to vector<64x16xf32>
    %cst_77 = arith.constant dense<0.000000e+00> : vector<64x64xf32>
    %154 = tpu.matmul %151, %152, %cst_77 {dimension_numbers = #tpu.dot_dimension_numbers<[1], [1], [0], [0], [0, 0, 1, 0], [], []>} : vector<64x16xf32>, vector<64x16xf32>, vector<64x64xf32> -> vector<64x64xf32>
    %cst_78 = arith.constant 1.930000e+01 : f32
    %155 = vector.broadcast %cst_78 : f32 to vector<64x64xf32>
    %156 = arith.mulf %155, %154 : vector<64x64xf32>
    %157 = arith.mulf %156, %2 : vector<64x64xf32>
    %cst_79 = arith.constant 1.250000e-02 : f32
    %158 = vector.broadcast %cst_79 : f32 to vector<64x64xf32>
    %159 = arith.mulf %158, %157 : vector<64x64xf32>
    %cst_80 = arith.constant 0.000000e+00 : f32
    %cst_81 = arith.constant 1.000000e+00 : f32
    %160 = vector.broadcast %cst_80 : f32 to vector<64x64xf32>
    %161 = arith.maximumf %160, %159 : vector<64x64xf32>
    %162 = vector.broadcast %cst_81 : f32 to vector<64x64xf32>
    %163 = arith.minimumf %162, %161 : vector<64x64xf32>
    %164 = arith.mulf %163, %2 : vector<64x64xf32>
    %cst_82 = arith.constant 0.000000e+00 : f32
    %165 = vector.broadcast %cst_82 : f32 to vector<64x16xf32>
    %166 = vector.extract_strided_slice %164 {offsets = [0, 0], sizes = [64, 32], strides = [1, 1]} : vector<64x64xf32> to vector<64x32xf32>
    %167 = vector.extract_strided_slice %153 {offsets = [0, 0], sizes = [32, 16], strides = [1, 1]} : vector<64x16xf32> to vector<32x16xf32>
    %cst_83 = arith.constant dense<0.000000e+00> : vector<64x16xf32>
    %168 = tpu.matmul %166, %167, %cst_83 {dimension_numbers = #tpu.dot_dimension_numbers<[1], [0], [0], [1], [0, 0, 1, 1], [], []>} : vector<64x32xf32>, vector<32x16xf32>, vector<64x16xf32> -> vector<64x16xf32>
    %cst_84 = arith.constant 1.930000e+01 : f32
    %169 = vector.broadcast %cst_84 : f32 to vector<64x16xf32>
    %170 = arith.mulf %169, %168 : vector<64x16xf32>
    %cst_85 = arith.constant 2.500000e-02 : f32
    %171 = vector.broadcast %cst_85 : f32 to vector<64x16xf32>
    %172 = arith.mulf %171, %170 : vector<64x16xf32>
    %cst_86 = arith.constant -1.000000e+00 : f32
    %cst_87 = arith.constant 1.000000e+00 : f32
    %173 = vector.broadcast %cst_86 : f32 to vector<64x16xf32>
    %174 = arith.maximumf %173, %172 : vector<64x16xf32>
    %175 = vector.broadcast %cst_87 : f32 to vector<64x16xf32>
    %176 = arith.minimumf %175, %174 : vector<64x16xf32>
    %177 = arith.addf %165, %176 : vector<64x16xf32>
    %178 = vector.extract_strided_slice %164 {offsets = [0, 32], sizes = [64, 32], strides = [1, 1]} : vector<64x64xf32> to vector<64x32xf32>
    %179 = vector.extract_strided_slice %153 {offsets = [32, 0], sizes = [32, 16], strides = [1, 1]} : vector<64x16xf32> to vector<32x16xf32>
    %cst_88 = arith.constant dense<0.000000e+00> : vector<64x16xf32>
    %180 = tpu.matmul %178, %179, %cst_88 {dimension_numbers = #tpu.dot_dimension_numbers<[1], [0], [0], [1], [0, 0, 1, 1], [], []>} : vector<64x32xf32>, vector<32x16xf32>, vector<64x16xf32> -> vector<64x16xf32>
    %cst_89 = arith.constant 1.930000e+01 : f32
    %181 = vector.broadcast %cst_89 : f32 to vector<64x16xf32>
    %182 = arith.mulf %181, %180 : vector<64x16xf32>
    %cst_90 = arith.constant 2.500000e-02 : f32
    %183 = vector.broadcast %cst_90 : f32 to vector<64x16xf32>
    %184 = arith.mulf %183, %182 : vector<64x16xf32>
    %cst_91 = arith.constant -1.000000e+00 : f32
    %cst_92 = arith.constant 1.000000e+00 : f32
    %185 = vector.broadcast %cst_91 : f32 to vector<64x16xf32>
    %186 = arith.maximumf %185, %184 : vector<64x16xf32>
    %187 = vector.broadcast %cst_92 : f32 to vector<64x16xf32>
    %188 = arith.minimumf %187, %186 : vector<64x16xf32>
    %189 = arith.addf %177, %188 : vector<64x16xf32>
    %190 = vector.extract_strided_slice %38 {offsets = [0, 48], sizes = [64, 16], strides = [1, 1]} : vector<64x64xf32> to vector<64x16xf32>
    %191 = vector.extract_strided_slice %70 {offsets = [0, 48], sizes = [64, 16], strides = [1, 1]} : vector<64x64xf32> to vector<64x16xf32>
    %192 = vector.extract_strided_slice %72 {offsets = [0, 48], sizes = [64, 16], strides = [1, 1]} : vector<64x64xf32> to vector<64x16xf32>
    %cst_93 = arith.constant dense<0.000000e+00> : vector<64x64xf32>
    %193 = tpu.matmul %190, %191, %cst_93 {dimension_numbers = #tpu.dot_dimension_numbers<[1], [1], [0], [0], [0, 0, 1, 0], [], []>} : vector<64x16xf32>, vector<64x16xf32>, vector<64x64xf32> -> vector<64x64xf32>
    %cst_94 = arith.constant 1.930000e+01 : f32
    %194 = vector.broadcast %cst_94 : f32 to vector<64x64xf32>
    %195 = arith.mulf %194, %193 : vector<64x64xf32>
    %196 = arith.mulf %195, %2 : vector<64x64xf32>
    %cst_95 = arith.constant 1.250000e-02 : f32
    %197 = vector.broadcast %cst_95 : f32 to vector<64x64xf32>
    %198 = arith.mulf %197, %196 : vector<64x64xf32>
    %cst_96 = arith.constant 0.000000e+00 : f32
    %cst_97 = arith.constant 1.000000e+00 : f32
    %199 = vector.broadcast %cst_96 : f32 to vector<64x64xf32>
    %200 = arith.maximumf %199, %198 : vector<64x64xf32>
    %201 = vector.broadcast %cst_97 : f32 to vector<64x64xf32>
    %202 = arith.minimumf %201, %200 : vector<64x64xf32>
    %203 = arith.mulf %202, %2 : vector<64x64xf32>
    %cst_98 = arith.constant 0.000000e+00 : f32
    %204 = vector.broadcast %cst_98 : f32 to vector<64x16xf32>
    %205 = vector.extract_strided_slice %203 {offsets = [0, 0], sizes = [64, 32], strides = [1, 1]} : vector<64x64xf32> to vector<64x32xf32>
    %206 = vector.extract_strided_slice %192 {offsets = [0, 0], sizes = [32, 16], strides = [1, 1]} : vector<64x16xf32> to vector<32x16xf32>
    %cst_99 = arith.constant dense<0.000000e+00> : vector<64x16xf32>
    %207 = tpu.matmul %205, %206, %cst_99 {dimension_numbers = #tpu.dot_dimension_numbers<[1], [0], [0], [1], [0, 0, 1, 1], [], []>} : vector<64x32xf32>, vector<32x16xf32>, vector<64x16xf32> -> vector<64x16xf32>
    %cst_100 = arith.constant 1.930000e+01 : f32
    %208 = vector.broadcast %cst_100 : f32 to vector<64x16xf32>
    %209 = arith.mulf %208, %207 : vector<64x16xf32>
    %cst_101 = arith.constant 2.500000e-02 : f32
    %210 = vector.broadcast %cst_101 : f32 to vector<64x16xf32>
    %211 = arith.mulf %210, %209 : vector<64x16xf32>
    %cst_102 = arith.constant -1.000000e+00 : f32
    %cst_103 = arith.constant 1.000000e+00 : f32
    %212 = vector.broadcast %cst_102 : f32 to vector<64x16xf32>
    %213 = arith.maximumf %212, %211 : vector<64x16xf32>
    %214 = vector.broadcast %cst_103 : f32 to vector<64x16xf32>
    %215 = arith.minimumf %214, %213 : vector<64x16xf32>
    %216 = arith.addf %204, %215 : vector<64x16xf32>
    %217 = vector.extract_strided_slice %203 {offsets = [0, 32], sizes = [64, 32], strides = [1, 1]} : vector<64x64xf32> to vector<64x32xf32>
    %218 = vector.extract_strided_slice %192 {offsets = [32, 0], sizes = [32, 16], strides = [1, 1]} : vector<64x16xf32> to vector<32x16xf32>
    %cst_104 = arith.constant dense<0.000000e+00> : vector<64x16xf32>
    %219 = tpu.matmul %217, %218, %cst_104 {dimension_numbers = #tpu.dot_dimension_numbers<[1], [0], [0], [1], [0, 0, 1, 1], [], []>} : vector<64x32xf32>, vector<32x16xf32>, vector<64x16xf32> -> vector<64x16xf32>
    %cst_105 = arith.constant 1.930000e+01 : f32
    %220 = vector.broadcast %cst_105 : f32 to vector<64x16xf32>
    %221 = arith.mulf %220, %219 : vector<64x16xf32>
    %cst_106 = arith.constant 2.500000e-02 : f32
    %222 = vector.broadcast %cst_106 : f32 to vector<64x16xf32>
    %223 = arith.mulf %222, %221 : vector<64x16xf32>
    %cst_107 = arith.constant -1.000000e+00 : f32
    %cst_108 = arith.constant 1.000000e+00 : f32
    %224 = vector.broadcast %cst_107 : f32 to vector<64x16xf32>
    %225 = arith.maximumf %224, %223 : vector<64x16xf32>
    %226 = vector.broadcast %cst_108 : f32 to vector<64x16xf32>
    %227 = arith.minimumf %226, %225 : vector<64x16xf32>
    %228 = arith.addf %216, %227 : vector<64x16xf32>
    %229 = tpu.concatenate %111, %150, %189, %228 in 1 : vector<64x16xf32>, vector<64x16xf32>, vector<64x16xf32>, vector<64x16xf32> -> vector<64x64xf32>
    %c6 = arith.constant 6 : index
    %c0_109 = arith.constant 0 : index
    %230 = vector.load %arg7[%c6, %c0_109] : memref<8x64xf32, #tpu.memory_space<vmem>>, vector<1x64xf32>
    %231 = vector.broadcast %230 : vector<1x64xf32> to vector<64x64xf32>
    %232 = arith.mulf %229, %231 : vector<64x64xf32>
    %c7 = arith.constant 7 : index
    %c0_110 = arith.constant 0 : index
    %233 = vector.load %arg7[%c7, %c0_110] : memref<8x64xf32, #tpu.memory_space<vmem>>, vector<1x64xf32>
    %234 = vector.broadcast %233 : vector<1x64xf32> to vector<64x64xf32>
    %235 = arith.addf %232, %234 : vector<64x64xf32>
    %c0_111 = arith.constant 0 : index
    %c0_112 = arith.constant 0 : index
    %236 = vector.load %arg4[%c0_111, %c0_112] : memref<64x64xf32, #tpu.memory_space<vmem>>, vector<64x64xf32>
    %cst_113 = arith.constant dense<0.000000e+00> : vector<64x64xf32>
    %237 = tpu.matmul %235, %236, %cst_113 {dimension_numbers = #tpu.dot_dimension_numbers<[1], [0], [0], [1], [0, 0, 1, 1], [], []>} : vector<64x64xf32>, vector<64x64xf32>, vector<64x64xf32> -> vector<64x64xf32>
    %c0_114 = arith.constant 0 : index
    %c0_115 = arith.constant 0 : index
    %238 = vector.load %arg5[%c0_114, %c0_115] : memref<1x64xf32, #tpu.memory_space<vmem>>, vector<1x64xf32>
    %239 = vector.broadcast %238 : vector<1x64xf32> to vector<64x64xf32>
    %240 = arith.addf %237, %239 : vector<64x64xf32>
    %c0_116 = arith.constant 0 : index
    %c0_117 = arith.constant 0 : index
    %c0_118 = arith.constant 0 : index
    %241 = vector.load %arg8[%c0_116, %c0_117, %c0_118] : memref<1x64x64xf32, #tpu.memory_space<vmem>>, vector<1x64x64xf32>
    %242 = vector.shape_cast %241 : vector<1x64x64xf32> to vector<64x64xf32>
    %243 = vector.shape_cast %240 : vector<64x64xf32> to vector<1x64x64xf32>
    tpu.vector_store %arg8[%c0_116, %c0_117, %c0_118], %243 {strides = array<i32>} : memref<1x64x64xf32, #tpu.memory_space<vmem>>, vector<1x64x64xf32>,
    return
  }
  func.func @transform_0(%arg0: i32) -> (i32, i32, i32) {
    %c0_i32 = arith.constant 0 : i32
    %c0_i32_0 = arith.constant 0 : i32
    %c0_i32_1 = arith.constant 0 : i32
    return %arg0, %c0_i32, %c0_i32_0 : i32, i32, i32
  }
  func.func @transform_1(%arg0: i32) -> (i32, i32, i32) {
    %c0_i32 = arith.constant 0 : i32
    %c0_i32_0 = arith.constant 0 : i32
    %c0_i32_1 = arith.constant 0 : i32
    %c0_i32_2 = arith.constant 0 : i32
    return %c0_i32, %c0_i32_0, %c0_i32_1 : i32, i32, i32
  }
  func.func @transform_2(%arg0: i32) -> (i32, i32, i32) {
    %c0_i32 = arith.constant 0 : i32
    %c0_i32_0 = arith.constant 0 : i32
    %c0_i32_1 = arith.constant 0 : i32
    %c0_i32_2 = arith.constant 0 : i32
    return %c0_i32, %c0_i32_0, %c0_i32_1 : i32, i32, i32
  }
  func.func @transform_3(%arg0: i32) -> (i32, i32) {
    %c0_i32 = arith.constant 0 : i32
    %c0_i32_0 = arith.constant 0 : i32
    %c0_i32_1 = arith.constant 0 : i32
    return %c0_i32, %c0_i32_0 : i32, i32
  }
  func.func @transform_4(%arg0: i32) -> (i32, i32) {
    %c0_i32 = arith.constant 0 : i32
    %c0_i32_0 = arith.constant 0 : i32
    %c0_i32_1 = arith.constant 0 : i32
    return %c0_i32, %c0_i32_0 : i32, i32
  }
  func.func @transform_5(%arg0: i32) -> (i32, i32) {
    %c0_i32 = arith.constant 0 : i32
    %c0_i32_0 = arith.constant 0 : i32
    %c0_i32_1 = arith.constant 0 : i32
    return %c0_i32, %c0_i32_0 : i32, i32
  }
  func.func @transform_6(%arg0: i32) -> (i32, i32) {
    %c0_i32 = arith.constant 0 : i32
    %c0_i32_0 = arith.constant 0 : i32
    %c0_i32_1 = arith.constant 0 : i32
    return %c0_i32, %c0_i32_0 : i32, i32
  }
  func.func @transform_7(%arg0: i32) -> (i32, i32, i32) {
    %c0_i32 = arith.constant 0 : i32
    %c0_i32_0 = arith.constant 0 : i32
    %c0_i32_1 = arith.constant 0 : i32
    return %arg0, %c0_i32, %c0_i32_0 : i32, i32, i32
  }
}

</mosaic_0001>

<bundles_post_ra>
// kernel: tpu_custom_call.1
= control target key start
LH: loop header
LB: loop body
LE: loop exit
PB: predicated region body
PF: predicated region fallthrough
CT: control target
= control target key end

     0   :  { %s4779_s0 = inlined_call_operand.hbm [shape: f32[2,64,64], index: 0, kind: input, shape index: {}]   ;;  %s4780_s1 = inlined_call_operand.hbm [shape: f32[3,64,64], index: 1, kind: input, shape index: {}]   ;;  %s4781_s2 = inlined_call_operand.hbm [shape: f32[3,1,64], index: 2, kind: input, shape index: {}]   ;;  %s4782_s3 = inlined_call_operand.hbm [shape: f32[64,64], index: 3, kind: input, shape index: {}]   ;;  %s4783_s4 = inlined_call_operand.vmem [shape: f32[1,64], index: 4, kind: input, shape index: {}]   ;;  %s4784_s5 = inlined_call_operand.hbm [shape: f32[64,64], index: 5, kind: input, shape index: {}]   ;;  %s4785_s6 = inlined_call_operand.hbm [shape: f32[8,64], index: 6, kind: input, shape index: {}]   ;;  %s4786_s7 = inlined_call_operand.hbm [shape: f32[2,64,64], index: 7, kind: output, shape index: {}]  }
   0x1   :  { %4789 = sst [smem:[#allocation19_spill]] %s4780_s1 }
   0x2   :  { %12 = vsyncpa [#allocation3], 0 }
   0x3   :  { %14 = vsyncpa [#allocation3 + $0x1], 0 }
   0x4   :  { %15 = vsyncpa [#allocation6], 0 }
   0x5   :  { %16 = vsyncpa [#allocation9], 0 }
   0x6   :  { %17 = vsyncpa [#allocation12], 0 }
   0x7   :  { %18 = vsyncpa [#allocation4], 0 }
   0x8   :  { %20 = vsyncpa [#allocation4 + $0x1], 0  ;;  %s3657_s24 = smov 0   ;;  %s3659_s25 = smov 0  }
   0x9   :  { %s3661_s26 = smov 0   ;;  %s3663_s27 = smov 0  }
   0xa LB: > { %s4790_s1 = sld [smem:[#allocation19_spill]]  ;;  %s3681_s8 = sadd.s32 4294967295, %s3598_s27   ;;  %s3598_s27 = sphi %s3663_s27, %s4817_s27   ;;  %s3594_s26 = sphi %s3661_s26, %s4816_s26   ;;  %s3590_s25 = sphi %s3659_s25, %s4815_s25   ;;  %s3586_s24 = sphi %s3657_s24, %s4814_s24  }
   0xb   : > { %p2694_p0 = scmp.ge.s32.totalorder %s3598_s27, 1  ;;  %p47_p1 = scmp.eq.s32.totalorder %s3681_s8, 0 }
   0xc   : > { %p209_p2 = scmp.lt.s32.totalorder %s3598_s27, 3  ;;  %s3600_s10 = smov [#allocation5]  }
   0xd   : > { %s222_s11 = sshll.u32 %s3600_s10, 4  ;;  %s248_s14 = sshll.u32 %s4782_s3, 4  ;;  %s223_s11 = int_to_ptr.vmem [resolvable:$true] %s222_s11  ;;  %s249_s14 = int_to_ptr.hbm [resolvable:$true] %s248_s14 }
   0xe   : > { %p3686_p3 = pnand %p2694_p0, %p209_p2  ;;  %s234_s18 = sshll.u32 %s4781_s2, 4  ;;  %s235_s18 = int_to_ptr.hbm [resolvable:$true] %s234_s18 }
   0xf   : > { %s3601_s19 = smov [#allocation8]   ;;  %s4787_s21 = smov 128  }
  0x10   : > { %s220_s30 = sshll.u32 %s4790_s1, 4  ;;  %p3183_p4 = pneg %p3686_p3  ;;  %s221_s30 = int_to_ptr.hbm [resolvable:$true] %s220_s30 }
  0x11   : > { %s250_s20 = sshll.u32 %s3601_s19, 4  ;;  %s4788_s22 = smov 8   ;;  %s251_s20 = int_to_ptr.vmem [resolvable:$true] %s250_s20 }
  0x12   : > { %p3698_p6 = pnand %p3183_p4, %p47_p1  ;;  %s3604_s23 = smov [#allocation7]  }
  0x13   : > { %s236_s28 = sshll.u32 %s3604_s23, 4  ;;  %s265_s12 = sshll.u32 %s4784_s5, 4  ;;  %s237_s28 = int_to_ptr.vmem [resolvable:$true] %s236_s28  ;;  %s266_s12 = int_to_ptr.hbm [resolvable:$true] %s265_s12 }
  0x14   : > { %3186 = dma.hbm_to_vmem [thread:$0]  (!%p3698_p6), %s221_s30, 3072, %s223_s11, [#allocation6], %s4787_s21, %s4787_s21, %s4788_s22  }
  0x15   : > { %3192 = dma.hbm_to_vmem [thread:$0]  (!%p3698_p6), %s249_s14, 1024, %s251_s20, [#allocation9], %s4787_s21, %s4787_s21, %s4788_s22  }
  0x16   : > { %s3605_s13 = smov 16   ;;  %s3606_s30 = smov 1  }
  0x17   : > { %3189 = dma.hbm_to_vmem [thread:$0]  (!%p3698_p6), %s235_s18, 48, %s237_s28, [#allocation6], %s3605_s13, %s3605_s13, %s3606_s30  }
  0x18   : > { %s3607_s11 = smov [#allocation10]   ;;  %s280_s19 = sshll.u32 %s4785_s6, 4  ;;  %s281_s19 = int_to_ptr.hbm [resolvable:$true] %s280_s19 }
  0x19   : > { %s267_s14 = sshll.u32 %s3607_s11, 4  ;;  %s3608_s18 = smov [#allocation11]   ;;  %s268_s14 = int_to_ptr.vmem [resolvable:$true] %s267_s14 }
  0x1a   : > { %3195 = dma.hbm_to_vmem [thread:$0]  (!%p3698_p6), %s266_s12, 1024, %s268_s14, [#allocation9], %s4787_s21, %s4787_s21, %s4788_s22  }
  0x1b   : > { %s282_s20 = sshll.u32 %s3608_s18, 4  ;;  %s2693_s23 = sadd.s32 4294967294, %s3598_s27   ;;  %s283_s20 = int_to_ptr.vmem [resolvable:$true] %s282_s20 }
  0x1c   : > { %3198 = dma.hbm_to_vmem [thread:$0]  (!%p3698_p6), %s281_s19, 128, %s283_s20, [#allocation12]  }
  0x1d   : > { %s3732_s28 = sadd.s32 1, %s3598_s27   ;;  %s33_s29 = sadd.s32 1, %s3594_s26 }
  0x1e   : > { %s30_s10 = ssub.s32 %s3598_s27, %s3732_s28  ;;  %p40_p7 = scmp.ne.s32.totalorder %s3594_s26, %s3590_s25 }
  0x1f   : > { %p31_p8 = scmp.eq.s32.totalorder %s30_s10, 0  ;;  %p41_p9 = scmp.eq.s32.totalorder %s3598_s27, 0 }
  0x20   : > { %p46_p10 = scmp.ne.s32.totalorder %s3590_s25, %s3586_s24  ;;  %p196_p11 = scmp.eq.s32.totalorder %s3681_s8, 1 }
  0x21   : > { %s3744_s12 = scalar_select %p31_p8, %s3594_s26, %s33_s29  }
  0x22   : > { %p3748_p12 = por %p47_p1, %p46_p10  ;;  %p3752_p13 = por %p196_p11, %p40_p7 }
  0x23   : > { %p202_p0 = scmp.eq.s32.totalorder %s2693_s23, 1  ;;  %p42_p2 = por %p41_p9, %p40_p7 }
  0x24   : > { %s293_s30 = sand.u32 1, %s3594_s26   ;;  %p3212_p6 = scmp.lt.s32.totalorder %s3598_s27, 2 }
  0x25   : > { %p3757_p4 = por %p202_p0, %p46_p10  ;;  %s2701_s14 = sshll.u32 %s293_s30, 6 }
  0x26   : > { %s2957_s16 = sshll.u32 %s3598_s27, 6  ;;  %s297_s29 = scalar_lea.vmem [#allocation2], %s2701_s14 }
  0x27   : > { %s302_s18 = scalar_lea.hbm %s4779_s0, %s2957_s16  ;;  %s305_s10 = sshll.u32 %s297_s29, 4  ;;  %s306_s10 = int_to_ptr.vmem [resolvable:$true] %s305_s10 }
  0x28   : > { %s303_s20 = sshll.u32 %s302_s18, 4  ;;  %p3766_p8 = pnand %p3212_p6, %p42_p2  ;;  %s304_s20 = int_to_ptr.hbm [resolvable:$true] %s303_s20 }
  0x29   : > { %s294_s21 = scalar_lea.sflag [#allocation3], %s293_s30  ;;  %s3490_s22 = sshra.s32 %s304_s20, 4  ;;  %s3491_s22 = int_to_ptr.hbm [resolvable:$true] %s3490_s22 }
  0x2a   : > { %s3492_s1 = scalar_lea.hbm %s3491_s22, 64  ;;  %p3494_p9 = pneg %p3766_p8 }
  0x2b   : > { %p3493_p7 = scmp.ne.s32.totalorder %s3491_s22, %s3492_s1  ;;  %s3497_s14 = scalar_lea.hbm %s4779_s0, 128 }
  0x2c   : > { %p3498_p0 = scmp.lt.s32.totalorder %s3491_s22, %s4779_s0  ;;  %p3499_p2 = scmp.lt.s32.totalorder %s3497_s14, %s3492_s1 }
  0x2d   : > { %p3495_p10 = pnand %p3494_p9, %p3493_p7 }
  0x2e   : > { %p3500_p6 = por %p3499_p2, %p3498_p0 }
  0x2f   : > { %p3496_p11 = pneg %p3495_p10 }
  0x31   : > { %p3501_p5 = pnand %p3500_p6, %p3496_p11 }
  0x33   : > { %3504 = shalt.err (!%p3501_p5)
}
  0x34   : > { %s4797_s30 = smov 8   ;;  %s4798_s29 = smov 128  }
  0x35   : > { %3202 = dma.hbm_to_vmem [thread:$0]  (!%p3766_p8), %s304_s20, 1024, %s306_s10, %s294_s21, %s4798_s29, %s4798_s29, %s4797_s30  }
  0x36   : > { %317 = sbr.rel (%p3686_p3) target bundleno = 1473 (0x5c1), region = 48  ;;  %s3786_s16 = sand.u32 (!%p3686_p3), 1, %s3590_s25  }
  0x37   : > { %s2705_s1 = sshll.u32 (!%p3686_p3), %s3786_s16, 6  ;;  %s320_s22 = scalar_lea.sflag (!%p3686_p3), [#allocation3], %s3786_s16 }
  0x38   : > { %s3792_s17 = scalar_lea.vmem (!%p3686_p3), [#allocation2], %s2705_s1 }
  0x3b   : > { %3565 = dma.done.wait (%p3748_p12), %s320_s22, 1024  }
  0x3c   : > { %3567 = vsyncadd (%p3748_p12), %s320_s22, 4294966272 }
  0x3d   : > { %3569 = dma.done.wait (%p47_p1), [#allocation6], 3120  }
  0x3e   : > { %3571 = vsyncadd (%p47_p1), [#allocation6], 4294964176 }
  0x3f   : > { %3573 = dma.done.wait (%p47_p1), [#allocation9], 2048  }
  0x40   : > { %3575 = vsyncadd (%p47_p1), [#allocation9], 4294965248 }
  0x41   : > { %3577 = dma.done.wait (%p47_p1), [#allocation12], 128  }
  0x42   : > { %3579 = vsyncadd (%p47_p1), [#allocation12], 4294967168  ;;  %v482_v0 = vld [vmem:[#allocation5 + $0x78] sm:$0xff]  ;;  %v481_v1 = vld [vmem:[#allocation5 + $0x70] sm:$0xff]  ;;  %vm408_vm0 = vcmask 523264   ;;  %s3609_s9 = smov 112  }
  0x43   : > { %496 = vmatpush.msra.mxu1 %v482_v0  ;;  %v403_v2 = vld [vmem:[#allocation5 + $0x38] sm:$0xff]  ;;  %v480_v3 = vld [vmem:[#allocation5 + $0x68] sm:$0xff]  ;;  %v402_v4 = vld [vmem:[#allocation5 + $0x30] sm:$0xff]  ;;  %vm780_vm13 = vcmask 130048   ;;  %s3610_s21 = smov 96   ;;  %s3611_s15 = smov 80  }
  0x44   : > { %441 = vmatpush.msra.mxu0 %v403_v2  ;;  %v401_v5 = vld [vmem:[#allocation5 + $0x28] sm:$0xff]  ;;  %v479_v6 = vld [vmem:[#allocation5 + $0x60] sm:$0xff]  ;;  %v537_v7 = vld [vmem:[#allocation5 + $0xb8] sm:$0xff]  ;;  %s3612_s20 = smov 16   ;;  %s3613_s10 = smov 32  }
  0x45   : > { %497 = vmatpush.msra.mxu1 %v481_v1  ;;  %v400_v8 = vld [vmem:[#allocation5 + $0x20] sm:$0xff]  ;;  %551 = vmatpush.msra.mxu2 %v537_v7  ;;  %v536_v9 = vld [vmem:[#allocation5 + $0xb0] sm:$0xff]  ;;  %v478_v10 = vld [vmem:[#allocation5 + $0x58] sm:$0xff]  ;;  %s3614_s23 = smov 48   ;;  %s379_s18 = scalar_lea.vmem [#allocation13], %s2705_s1 }
  0x46   : > { %442 = vmatpush.msra.mxu0 %v402_v4  ;;  %v535_v11 = vld [vmem:[#allocation5 + $0xa8] sm:$0xff]  ;;  %v477_v12 = vld [vmem:[#allocation5 + $0x50] sm:$0xff]  ;;  %v399_v13 = vld [vmem:[#allocation5 + $0x18] sm:$0xff]  ;;  %s2958_s30 = sshll.u32 %s3681_s8, 6 }
  0x47   : > { %498 = vmatpush.msra.mxu1 %v480_v3  ;;  %552 = vmatpush.msra.mxu2 %v536_v9  ;;  %v476_v14 = vld [vmem:[#allocation5 + $0x48] sm:$0xff]  ;;  %v398_v15 = vld [vmem:[#allocation5 + $0x10] sm:$0xff]  ;;  %v534_v16 = vld [vmem:[#allocation5 + $0xa0] sm:$0xff]  ;;  %s2568_s22 = scalar_lea.hbm %s4786_s7, %s2958_s30 }
  0x48   : > { %443 = vmatpush.msra.mxu0 %v401_v5  ;;  %v397_v17 = vld [vmem:[#allocation5 + $0x8] sm:$0xff]  ;;  %v533_v18 = vld [vmem:[#allocation5 + $0x98] sm:$0xff]  ;;  %v475_v19 = vld [vmem:[#allocation5 + $0x40] sm:$0xff] }
  0x49   : > { %499 = vmatpush.msra.mxu1 %v479_v6  ;;  %553 = vmatpush.msra.mxu2 %v535_v11  ;;  %v532_v20 = vld [vmem:[#allocation5 + $0x90] sm:$0xff]  ;;  %v380_v21 = vld [vmem:[%s3792_s17] sm:$0xff]  ;;  %v531_v23 = vld [vmem:[#allocation5 + $0x88] sm:$0xff] }
  0x4a   : > { %444 = vmatpush.msra.mxu0 %v400_v8  ;;  %v396_v22 = vld [vmem:[#allocation5] sm:$0xff]  ;;  %v381_v25 = vld [vmem:[%s3792_s17 + $0x8] sm:$0xff]  ;;  %v382_v26 = vld [vmem:[%s3792_s17 + $0x10] sm:$0xff] }
  0x4b   : > { %500 = vmatpush.msra.mxu1 %v478_v10  ;;  %554 = vmatpush.msra.mxu2 %v534_v16  ;;  %v530_v24 = vld [vmem:[#allocation5 + $0x80] sm:$0xff]  ;;  %v383_v27 = vld [vmem:[%s3792_s17 + $0x18] sm:$0xff]  ;;  %v385_v29 = vld [vmem:[%s3792_s17 + $0x28] sm:$0xff] }
  0x4c   : > { %445 = vmatpush.msra.mxu0 %v399_v13  ;;  %v384_v28 = vld [vmem:[%s3792_s17 + $0x20] sm:$0xff]  ;;  %v386_v30 = vld [vmem:[%s3792_s17 + $0x30] sm:$0xff]  ;;  %v387_v31 = vld [vmem:[%s3792_s17 + $0x38] sm:$0xff]  ;;  %s2569_s17 = sshll.u32 %s379_s18, 4  ;;  %s2570_s17 = int_to_ptr.vmem [resolvable:$true] %s2569_s17 }
  0x4d   : > { %501 = vmatpush.msra.mxu1 %v477_v12  ;;  %555 = vmatpush.msra.mxu2 %v533_v18  ;;  %v3842_v34 = vld [vmem:[#allocation7 + $0x1] ss:$0 sm:$0xff]  ;;  %v3844_v36 = vld [vmem:[#allocation7] ss:$0 sm:$0xff]  ;;  %v3847_v39 = vld [vmem:[#allocation11 + $0x2] ss:$0 sm:$0xff] }
  0x4e   : > { %446 = vmatpush.msra.mxu0 %v398_v15  ;;  %v3852_v42 = vld [vmem:[#allocation11] ss:$0 sm:$0xff]  ;;  %v3855_v44 = vld [vmem:[#allocation11 + $0x3] ss:$0 sm:$0xff]  ;;  %v3858_v46 = vld [vmem:[#allocation11 + $0x1] ss:$0 sm:$0xff] }
  0x4f   : > { %502 = vmatpush.msra.mxu1 %v476_v14  ;;  %556 = vmatpush.msra.mxu2 %v532_v20 }
  0x50   : > { %447 = vmatpush.msra.mxu0 %v397_v17 }
  0x51   : > { %503 = vmatpush.msra.mxu1 %v475_v19  ;;  %557 = vmatpush.msra.mxu2 %v531_v23 }
  0x52   : > { %2720 = vmatmul.msk.f32.vlgmr.msra.gmra.mxu1 %vm408_vm0, %v380_v21  ;;  %448 = vmatpush.msra.mxu0 %v396_v22 }
  0x53   : > { %2712 = vmatmul.msk.f32.vlgmr.msra.gmra.mxu0 %vm408_vm0, %v380_v21  ;;  %558 = vmatpush.msra.mxu2 %v530_v24 }
  0x54   : > { %2728 = vmatmul.msk.f32.vlgmr.msra.gmra.mxu2 %vm408_vm0, %v380_v21 }
  0x5a   : > { %2721 = vmatmul.msk.f32.gmra.mxu1 %vm408_vm0, %v381_v25 }
  0x5b   : > { %2713 = vmatmul.msk.f32.gmra.mxu0 %vm408_vm0, %v381_v25 }
  0x5c   : > { %2729 = vmatmul.msk.f32.gmra.mxu2 %vm408_vm0, %v381_v25 }
  0x62   : > { %2722 = vmatmul.msk.f32.gmra.mxu1 %vm408_vm0, %v382_v26 }
  0x63   : > { %2714 = vmatmul.msk.f32.gmra.mxu0 %vm408_vm0, %v382_v26 }
  0x64   : > { %2730 = vmatmul.msk.f32.gmra.mxu2 %vm408_vm0, %v382_v26 }
  0x6a   : > { %2723 = vmatmul.msk.f32.gmra.mxu1 %vm408_vm0, %v383_v27 }
  0x6b   : > { %2715 = vmatmul.msk.f32.gmra.mxu0 %vm408_vm0, %v383_v27 }
  0x6c   : > { %2731 = vmatmul.msk.f32.gmra.mxu2 %vm408_vm0, %v383_v27 }
  0x72   : > { %2724 = vmatmul.msk.f32.gmra.mxu1 %vm408_vm0, %v384_v28 }
  0x73   : > { %2716 = vmatmul.msk.f32.gmra.mxu0 %vm408_vm0, %v384_v28 }
  0x74   : > { %2732 = vmatmul.msk.f32.gmra.mxu2 %vm408_vm0, %v384_v28 }
  0x7a   : > { %2725 = vmatmul.msk.f32.gmra.mxu1 %vm408_vm0, %v385_v29 }
  0x7b   : > { %2717 = vmatmul.msk.f32.gmra.mxu0 %vm408_vm0, %v385_v29 }
  0x7c   : > { %2733 = vmatmul.msk.f32.gmra.mxu2 %vm408_vm0, %v385_v29 }
  0x82   : > { %2726 = vmatmul.msk.f32.gmra.mxu1 %vm408_vm0, %v386_v30 }
  0x83   : > { %2718 = vmatmul.msk.f32.gmra.mxu0 %vm408_vm0, %v386_v30 }
  0x84   : > { %2734 = vmatmul.msk.f32.gmra.mxu2 %vm408_vm0, %v386_v30 }
  0x8a   : > { %2727 = vmatmul.msk.f32.gmra.mxu1 %vm408_vm0, %v387_v31 }
  0x8b   : > { %2719 = vmatmul.msk.f32.gmra.mxu0 %vm408_vm0, %v387_v31 }
  0x8c   : > { %2735 = vmatmul.msk.f32.gmra.mxu2 %vm408_vm0, %v387_v31 }
  0xcf   : > { %v505_v32 = vpop.f32.mrf.mxu1 }
  0xd0   : > { %v450_v33 = vpop.f32.mrf.mxu0  ;;  %v506_v38 = vadd.f32 %v3842_v34, %v505_v32 }
  0xd1   : > { %v451_v41 = vadd.f32 %v3844_v36, %v450_v33 }
  0xd2   : > { %v646_v43 = vmul.f32 %v3847_v39, %v506_v38 }
  0xd3   : > { %v586_v45 = vmul.f32 %v3852_v42, %v451_v41 }
  0xd4   : > { %v656_v50 = vadd.f32 %v3855_v44, %v646_v43 }
  0xd5   : > { %v596_v53 = vadd.f32 %v3858_v46, %v586_v45  ;;  %v3903_v45 = vld [vmem:[#allocation11 + $0x4] ss:$0 sm:$0xff] }
  0xd6   : > { %v664_v55 = vmax.f32 %v656_v50, 0.0 }
  0xd7   : > { %v508_v35 = vpop.f32.mrf.mxu1  ;;  %v3849_v40 = vpop.f32.mrf.mxu2  ;;  %v604_v58 = vmax.f32 %v596_v53, 0.0 }
  0xd8   : > { %v453_v37 = vpop.f32.mrf.mxu0  ;;  %v509_v56 = vadd.f32 %v3842_v34, %v508_v35  ;;  %v672_v63 = vmin.f32 %v664_v55, 0.9 }
  0xd9   : > { %v454_v0 = vadd.f32 %v3844_v36, %v453_v37  ;;  %v612_v4 = vmin.f32 %v604_v58, 1.0  ;;  %v3901_v37 = vld [vmem:[#allocation7 + $0x2] ss:$0 sm:$0xff] }
  0xda   : > { %v647_v2 = vmul.f32 %v3847_v39, %v509_v56  ;;  %v3880_v8 = vmul.f32 16.666666, %v672_v63 }
  0xdb   : > { %v587_v9 = vmul.f32 %v3852_v42, %v454_v0  ;;  %v3884_v12 = vmul.f32 15.0, %v612_v4 }
  0xdc   : > { %v657_v10 = vadd.f32 %v3855_v44, %v647_v2  ;;  %v3033_v19 = vcvt.f32.s32 %v3880_v8  ;;  %v3031_v30 = vand.u32 2147483647, %v3880_v8  ;;  %v3036_v33 = vand.u32 2147483648, %v3880_v8 }
  0xdd   : > { %v597_v20 = vadd.f32 %v3858_v46, %v587_v9  ;;  %v2969_v27 = vcvt.f32.s32 %v3884_v12 }
  0xde   : > { %v665_v22 = vmax.f32 %v657_v10, 0.0  ;;  %v3034_v31 = vcvt.s32.f32 %v3033_v19  ;;  %v2967_v19 = vand.u32 2147483647, %v3884_v12  ;;  %vm3954_vm4 = vcmp.lt.f32.partialorder %v3031_v30, 8388608.0 }
  0xdf   : > { %v511_v47 = vpop.f32.mrf.mxu1  ;;  %v3864_v51 = vpop.f32.mrf.mxu2  ;;  %v605_v32 = vmax.f32 %v597_v20, 0.0 }
  0xe0   : > { %v512_v48 = vadd.f32 %v3842_v34, %v511_v47  ;;  %v3861_v49 = vpop.f32.mrf.mxu0  ;;  %v673_v35 = vmin.f32 %v665_v22, 0.9  ;;  %v3035_v58 = vand.u32 2147483647, %v3034_v31  ;;  %vm3944_vm3 = vcmp.lt.f32.partialorder %v2967_v19, 8388608.0 }
  0xe2   : > { %v648_v52 = vmul.f32 %v3847_v39, %v512_v48  ;;  %v3916_v4 = vmul.f32 16.666666, %v673_v35 }
  0xe4   : > { %v658_v54 = vadd.f32 %v3855_v44, %v648_v52  ;;  %v2970_v52 = vcvt.s32.f32 %v2969_v27 }
  0xe6   : > { %v666_v57 = vmax.f32 %v658_v54, 0.0 }
  0xe7   : > { %v514_v59 = vpop.f32.mrf.mxu1  ;;  %v3872_v1 = vpop.f32.mrf.mxu2 }
  0xe8   : > { %v674_v60 = vmin.f32 %v666_v57, 0.9  ;;  %v515_v61 = vadd.f32 %v3842_v34, %v514_v59  ;;  %v459_v62 = vpop.f32.mrf.mxu0 }
  0xe9   : > { %v460_v6 = vadd.f32 %v3844_v36, %v459_v62 }
  0xea   : > { %v649_v3 = vmul.f32 %v3847_v39, %v515_v61  ;;  %v3876_v5 = vmul.f32 16.666666, %v674_v60  ;;  %v3910_v61 = vmin.f32 %v605_v32, 1.0 }
  0xeb   : > { %v589_v15 = vmul.f32 %v3852_v42, %v460_v6  ;;  %v3918_v6 = vld [vmem:[#allocation11 + $0x5] ss:$0 sm:$0xff] }
  0xec   : > { %v659_v7 = vadd.f32 %v3855_v44, %v649_v3  ;;  %v3049_v13 = vcvt.f32.s32 %v3876_v5  ;;  %v3047_v59 = vand.u32 2147483647, %v3876_v5  ;;  %v3052_v60 = vand.u32 2147483648, %v3876_v5 }
  0xed   : > { %v599_v26 = vadd.f32 %v3858_v46, %v589_v15 }
  0xee   : > { %v667_v11 = vmax.f32 %v659_v7, 0.0  ;;  %v3050_v25 = vcvt.s32.f32 %v3049_v13  ;;  %v457_v7 = vadd.f32 %v3844_v36, %v3861_v49  ;;  %v2971_v13 = vand.u32 2147483647, %v2970_v52 }
  0xef   : > { %v517_v14 = vpop.f32.mrf.mxu1  ;;  %v3893_v21 = vpop.f32.mrf.mxu2  ;;  %v607_v48 = vmax.f32 %v599_v26, 0.0  ;;  %vm3927_vm2 = vcmp.lt.f32.partialorder %v3047_v59, 8388608.0  ;;  %v3931_v49 = vor.u32 %v3036_v33, %v3035_v58 }
  0xf0   : > { %v675_v16 = vmin.f32 %v667_v11, 0.9  ;;  %v518_v17 = vadd.f32 %v3842_v34, %v517_v14  ;;  %v3889_v18 = vpop.f32.mrf.mxu0  ;;  %v3051_v43 = vand.u32 2147483647, %v3050_v25  ;;  %v2972_v14 = vand.u32 2147483648, %v3884_v12 }
  0xf1   : > { %v615_v9 = vmin.f32 %v607_v48, 1.0  ;;  %v588_v25 = vmul.f32 %v3852_v42, %v457_v7 }
  0xf2   : > { %v683_v23 = vmul.f32 16.666666, %v675_v16  ;;  %v650_v24 = vmul.f32 %v3847_v39, %v518_v17  ;;  %v3053_v10 = vor.u32 %v3052_v60, %v3051_v43 }
  0xf3   : > { %v3934_v26 = vmul.f32 15.0, %v615_v9  ;;  %v3962_v60 = vadd.f32 %v3858_v46, %v588_v25 }
  0xf4   : > { %v3057_v28 = vcvt.f32.s32 %v683_v23  ;;  %v660_v29 = vadd.f32 %v3855_v44, %v650_v24  ;;  %v3055_v47 = vand.u32 2147483647, %v683_v23  ;;  %v3060_v54 = vand.u32 2147483648, %v683_v23 }
  0xf5   : > { %v2993_v59 = vcvt.f32.s32 %v3934_v26 }
  0xf6   : > { %v3058_v38 = vcvt.s32.f32 %v3057_v28  ;;  %v668_v41 = vmax.f32 %v660_v29, 0.0  ;;  %vm3056_vm1 = vcmp.lt.f32.partialorder %v3055_v47, 8388608.0 }
  0xf7   : > { %v520_v50 = vpop.f32.mrf.mxu1  ;;  %v572_v62 = vpop.f32.mrf.mxu2 }
  0xf8   : > { %v3059_v53 = vand.u32 2147483647, %v3058_v38  ;;  %v676_v55 = vmin.f32 %v668_v41, 0.9  ;;  %v521_v56 = vadd.f32 %v3842_v34, %v520_v50  ;;  %v3906_v57 = vpop.f32.mrf.mxu0  ;;  %v573_v3 = vadd.f32 %v3901_v37, %v572_v62 }
  0xf9   : > { %v2973_v38 = vor.u32 %v2972_v14, %v2971_v13 }
  0xfa   : > { %v3912_v63 = vmul.f32 16.666666, %v676_v55  ;;  %v651_v0 = vmul.f32 %v3847_v39, %v521_v56  ;;  %v3061_v2 = vor.u32 %v3060_v54, %v3059_v53  ;;  %v710_v17 = vmul.f32 %v3903_v45, %v573_v3 }
  0xfb   : > { %v3041_v55 = vcvt.f32.s32 %v3916_v4  ;;  %v2974_v30 = vsel %vm3944_vm3, %v2973_v38, %v3884_v12 }
  0xfc   : > { %v661_v11 = vadd.f32 %v3855_v44, %v651_v0  ;;  %v3065_v15 = vcvt.f32.s32 %v3912_v63  ;;  %v3062_v16 = vsel %vm3056_vm1, %v3061_v2, %v683_v23  ;;  %v720_v28 = vadd.f32 %v3918_v6, %v710_v17 }
  0xfd   : > { %v699_v22 = vmul.f32 0.06, %v3062_v16  ;;  %v3054_v23 = vsel %vm3927_vm2, %v3053_v10, %v3876_v5  ;;  %v3068_v10 = vand.u32 2147483648, %v3912_v63 }
  0xfe   : > { %v669_v20 = vmax.f32 %v661_v11, 0.0  ;;  %v3066_v33 = vcvt.s32.f32 %v3065_v15  ;;  %v728_v41 = vmax.f32 %v720_v28, 0.0  ;;  %v698_v5 = vmul.f32 0.06, %v3054_v23 }
  0xff   : > { %v523_v27 = vpop.f32.mrf.mxu1  ;;  %v3941_v32 = vadd.f32 -0.45, %v699_v22  ;;  %v575_v47 = vpop.f32.mrf.mxu2 }
 0x100   : > { %v677_v29 = vmin.f32 %v669_v20, 0.9  ;;  %v524_v31 = vadd.f32 %v3842_v34, %v523_v27  ;;  %v468_v35 = vpop.f32.mrf.mxu0  ;;  %v576_v53 = vadd.f32 %v3901_v37, %v575_v47  ;;  %v736_v56 = vmin.f32 %v728_v41, 0.9 }
 0x101   : > { %v469_v43 = vadd.f32 %v3844_v36, %v468_v35  ;;  %1159 = vrot.lane.b32.xlu2 %v3941_v32, %s3609_s9  ;;  %v3067_v2 = vand.u32 2147483647, %v3066_v33  ;;  %v3973_v14 = vadd.f32 -0.45, %v698_v5  ;;  %v2994_v20 = vcvt.s32.f32 %v2993_v59 }
 0x102   : > { %v685_v50 = vmul.f32 16.666666, %v677_v29  ;;  %v652_v52 = vmul.f32 %v3847_v39, %v524_v31  ;;  %v3968_v3 = vmul.f32 16.666666, %v736_v56  ;;  %v711_v9 = vmul.f32 %v3903_v45, %v576_v53 }
 0x103   : > { %v592_v58 = vmul.f32 %v3852_v42, %v469_v43  ;;  %v3063_v27 = vand.u32 2147483647, %v3912_v63  ;;  %v3069_v29 = vor.u32 %v3068_v10, %v3067_v2  ;;  %v2996_v43 = vand.u32 2147483648, %v3934_v26 }
 0x104   : > { %v3073_v62 = vcvt.f32.s32 %v685_v50  ;;  %v662_v0 = vadd.f32 %v3855_v44, %v652_v52  ;;  %v3071_v15 = vand.u32 2147483647, %v685_v50  ;;  %v3076_v16 = vand.u32 2147483648, %v685_v50 }
 0x105   : > { %v602_v7 = vadd.f32 %v3858_v46, %v592_v58  ;;  %v721_v25 = vadd.f32 %v3918_v6, %v711_v9  ;;  %v3129_v28 = vcvt.f32.s32 %v3968_v3  ;;  %v3038_v47 = vsel %vm3954_vm4, %v3931_v49, %v3880_v8 }
 0x106   : > { %v3074_v11 = vcvt.s32.f32 %v3073_v62  ;;  %v670_v13 = vmax.f32 %v662_v0, 0.0  ;;  %vm3072_vm5 = vcmp.lt.f32.partialorder %v3071_v15, 8388608.0  ;;  %v3994_v56 = vmul.f32 0.06666667, %v2974_v30 }
 0x107   : > { %v526_v17 = vpop.f32.mrf.mxu1  ;;  %v610_v19 = vmax.f32 %v602_v7, 0.0  ;;  %v729_v38 = vmax.f32 %v721_v25, 0.0  ;;  %vm3064_vm6 = vcmp.lt.f32.partialorder %v3063_v27, 8388608.0  ;;  %v3130_v58 = vcvt.s32.f32 %v3129_v28 }
 0x108   : > { %v3075_v22 = vand.u32 2147483647, %v3074_v11  ;;  %v678_v12 = vmin.f32 %v670_v13, 0.9  ;;  %v527_v24 = vadd.f32 %v3842_v34, %v526_v17  ;;  %v2995_v34 = vand.u32 2147483647, %v2994_v20 }
 0x109   : > { %v618_v23 = vmin.f32 %v610_v19, 1.0  ;;  %1157 = vrot.lane.b32.xlu2 %v3973_v14, %s3609_s9  ;;  %v737_v5 = vmin.f32 %v729_v38, 0.9  ;;  %v3070_v0 = vsel %vm3064_vm6, %v3069_v29, %v3912_v63  ;;  %v3127_v30 = vand.u32 2147483647, %v3968_v3 }
 0x10a   : > { %v3979_v31 = vmul.f32 16.666666, %v678_v12  ;;  %v653_v35 = vmul.f32 %v3847_v39, %v527_v24  ;;  %v3077_v33 = vor.u32 %v3076_v16, %v3075_v22  ;;  %v2991_v39 = vand.u32 2147483647, %v3934_v26 }
 0x10b   : > { %v3984_v41 = vmul.f32 15.0, %v618_v23  ;;  %v3997_v7 = vmul.f32 16.666666, %v737_v5  ;;  %v2997_v9 = vor.u32 %v2996_v43, %v2995_v34  ;;  %v700_v15 = vmul.f32 0.06, %v3070_v0 }
 0x10c   : > { %v3081_v48 = vcvt.f32.s32 %v3979_v31  ;;  %v663_v52 = vadd.f32 %v3855_v44, %v653_v35  ;;  %v3078_v53 = vsel %vm3072_vm5, %v3077_v33, %v685_v50  ;;  %v463_v44 = vadd.f32 %v3844_v36, %v3889_v18 }
 0x10d   : > { %v701_v62 = vmul.f32 0.06, %v3078_v53  ;;  %v3017_v10 = vcvt.f32.s32 %v3984_v41  ;;  %vm4004_vm7 = vcmp.lt.f32.partialorder %v2991_v39, 8388608.0  ;;  %v3137_v63 = vcvt.f32.s32 %v3997_v7 }
 0x10e   : > { %v671_v59 = vmax.f32 %v663_v52, 0.0  ;;  %v3082_v2 = vcvt.s32.f32 %v3081_v48  ;;  %v606_v17 = vmax.f32 %v3962_v60, 0.0  ;;  %v3131_v19 = vand.u32 2147483647, %v3130_v58  ;;  %v471_v58 = vpop.f32.mrf.mxu0 }
 0x10f   : > { %v4002_v13 = vadd.f32 -0.45, %v701_v62  ;;  %v3018_v16 = vcvt.s32.f32 %v3017_v10  ;;  %v3132_v20 = vand.u32 2147483648, %v3968_v3  ;;  %v3084_v12 = vand.u32 2147483648, %v3979_v31 }
 0x110   : > { %v679_v11 = vmin.f32 %v671_v59, 0.9  ;;  %v3083_v18 = vand.u32 2147483647, %v3082_v2  ;;  %v3138_v24 = vcvt.s32.f32 %v3137_v63  ;;  %v2998_v25 = vsel %vm4004_vm7, %v2997_v9, %v3934_v26 }
 0x111   : > { %1163 = vrot.lane.b32.xlu1 %v4002_v13, %s3609_s9  ;;  %1137 = vrot.lane.b32.xlu2 %v3994_v56, %s3609_s9  ;;  %v3140_v60 = vand.u32 2147483648, %v3997_v7  ;;  %v3019_v28 = vand.u32 2147483647, %v3018_v16  ;;  %v3020_v23 = vand.u32 2147483648, %v3984_v41  ;;  %v590_v29 = vmul.f32 %v3852_v42, %v463_v44 }
 0x112   : > { %v687_v22 = vmul.f32 16.666666, %v679_v11  ;;  %v3135_v35 = vand.u32 2147483647, %v3997_v7  ;;  %v3139_v38 = vand.u32 2147483647, %v3138_v24  ;;  %v3085_v39 = vor.u32 %v3084_v12, %v3083_v18 }
 0x113   : > { %v3015_v33 = vand.u32 2147483647, %v3984_v41  ;;  %v3079_v34 = vand.u32 2147483647, %v3979_v31  ;;  %v4026_v48 = vadd.f32 -0.45, %v700_v15  ;;  %v3133_v53 = vor.u32 %v3132_v20, %v3131_v19 }
 0x114   : > { %v3089_v27 = vcvt.f32.s32 %v687_v22  ;;  %v4028_v52 = vmul.f32 0.06666667, %v2998_v25  ;;  %v3087_v26 = vand.u32 2147483647, %v687_v22  ;;  %vm4030_vm8 = vcmp.lt.f32.partialorder %v3127_v30, 8388608.0 }
 0x115   : > { %v3092_v62 = vand.u32 2147483648, %v687_v22  ;;  %v3021_v0 = vor.u32 %v3020_v23, %v3019_v28  ;;  %v3141_v2 = vor.u32 %v3140_v60, %v3139_v38  ;;  %v614_v9 = vmin.f32 %v606_v17, 1.0 }
 0x116   : > { %v3090_v43 = vcvt.s32.f32 %v3089_v27  ;;  %v600_v10 = vadd.f32 %v3858_v46, %v590_v29  ;;  %vm4035_vm9 = vcmp.lt.f32.partialorder %v3015_v33, 8388608.0  ;;  %vm4039_vm10 = vcmp.lt.f32.partialorder %v3135_v35, 8388608.0 }
 0x117   : > { %vm3080_vm11 = vcmp.lt.f32.partialorder %v3079_v34, 8388608.0  ;;  %v472_v30 = vadd.f32 %v3844_v36, %v471_v58  ;;  %v3042_v63 = vcvt.s32.f32 %v3041_v55  ;;  %vm3088_vm12 = vcmp.lt.f32.partialorder %v3087_v26, 8388608.0 }
 0x118   : > { %v3091_v59 = vand.u32 2147483647, %v3090_v43  ;;  %v3086_v15 = vsel %vm3080_vm11, %v3085_v39, %v3979_v31  ;;  %v3134_v16 = vsel %vm4030_vm8, %v3133_v53, %v3968_v3  ;;  %v696_v19 = vmul.f32 0.06, %v3038_v47 }
 0x119   : > { %1161 = vrot.lane.b32.xlu1 %v4026_v48, %s3609_s9  ;;  %1143 = vrot.lane.b32.xlu2 %v4028_v52, %s3609_s9  ;;  %v3022_v20 = vsel %vm4035_vm9, %v3021_v0, %v3984_v41  ;;  %v3142_v55 = vsel %vm4039_vm10, %v3141_v2, %v3997_v7  ;;  %v4066_v31 = vmul.f32 15.0, %v3910_v61  ;;  %v622_v18 = vmul.f32 15.0, %v614_v9 }
 0x11a   : > { %v3093_v50 = vor.u32 %v3092_v62, %v3091_v59  ;;  %v608_v3 = vmax.f32 %v600_v10, 0.0  ;;  %v702_v54 = vmul.f32 0.06, %v3086_v15  ;;  %v760_v12 = vmul.f32 0.06, %v3134_v16 }
 0x11b   : > { %v593_v8 = vmul.f32 %v3852_v42, %v472_v30  ;;  %v4071_v47 = vmul.f32 0.06666667, %v3022_v20  ;;  %v761_v41 = vmul.f32 0.06, %v3142_v55  ;;  %v3043_v24 = vand.u32 2147483647, %v3042_v63 }
 0x11c   : > { %v3094_v17 = vsel %vm3088_vm12, %v3093_v50, %v687_v22  ;;  %v4073_v25 = vadd.f32 -0.45, %v696_v19  ;;  %v3039_v7 = vand.u32 2147483647, %v3916_v4  ;;  %v3044_v61 = vand.u32 2147483648, %v3916_v4 }
 0x11d   : > { %v703_v22 = vmul.f32 0.06, %v3094_v17  ;;  %v616_v27 = vmin.f32 %v608_v3, 1.0  ;;  %v4085_v60 = vadd.f32 -0.45, %v702_v54  ;;  %v603_v28 = vadd.f32 %v3858_v46, %v593_v8 }
 0x11e   : > { %v2977_v23 = vcvt.f32.s32 %v4066_v31  ;;  %v2985_v29 = vcvt.f32.s32 %v622_v18  ;;  %v4091_v35 = vadd.f32 -0.45, %v760_v12  ;;  %v4093_v38 = vadd.f32 -0.45, %v761_v41 }
 0x11f   : > { %v4069_v49 = vadd.f32 -0.45, %v703_v22  ;;  %v2983_v33 = vand.u32 2147483647, %v622_v18  ;;  %v466_v34 = vadd.f32 %v3844_v36, %v3906_v57  ;;  %v3045_v43 = vor.u32 %v3044_v61, %v3043_v24 }
 0x120   : > { %v2986_v26 = vcvt.s32.f32 %v2985_v29  ;;  %v2988_v39 = vand.u32 2147483648, %v622_v18  ;;  %v624_v5 = vmul.f32 15.0, %v616_v27  ;;  %v611_v53 = vmax.f32 %v603_v28, 0.0 }
 0x121   : > { %1167 = vrot.lane.b32.xlu0 %v4069_v49, %s3609_s9  ;;  %2752 = vmatpush.xpose.msk.msrb.mxu0 %vm780_vm13, %v4069_v49  ;;  %v2978_v58 = vcvt.s32.f32 %v2977_v23  ;;  %v4103_v62 = vpack.i.bf16 %v4091_v35, %v4093_v38  ;;  %vm3040_vm14 = vcmp.lt.f32.partialorder %v3039_v7, 8388608.0  ;;  %vm2984_vm15 = vcmp.lt.f32.partialorder %v2983_v33, 8388608.0 }
 0x122   : > { %2959 = vmatpush.xpose.msk.msra.mxu3 %vm780_vm13, %v4069_v49  ;;  %1153 = vrot.lane.b32.xlu1 %v4073_v25, %s3609_s9  ;;  %v2987_v59 = vand.u32 2147483647, %v2986_v26  ;;  %v591_v36 = vmul.f32 %v3852_v42, %v466_v34  ;;  %v3046_v57 = vsel %vm3040_vm14, %v3045_v43, %v3916_v4  ;;  %v2980_v2 = vand.u32 2147483648, %v4066_v31 }
 0x123   : > { %1149 = vrot.lane.b32.xlu2 %v4071_v47, %s3609_s9  ;;  %v619_v9 = vmin.f32 %v611_v53, 1.0  ;;  %v2979_v10 = vand.u32 2147483647, %v2978_v58  ;;  %v3001_v44 = vcvt.f32.s32 %v624_v5  ;;  %v697_v42 = vmul.f32 0.06, %v3046_v57 }
 0x124   : > { %v2989_v0 = vor.u32 %v2988_v39, %v2987_v59  ;;  %v2975_v4 = vand.u32 2147483647, %v4066_v31  ;;  %v601_v30 = vadd.f32 %v3858_v46, %v591_v36  ;;  %v3004_v55 = vand.u32 2147483648, %v624_v5  ;;  %v578_v59 = vpop.f32.mrf.mxu2 }
 0x125   : > { %2753 = vmatpush.xpose.msk.msrb.mxu0 %vm780_vm13, %v4085_v60  ;;  %v627_v63 = vmul.f32 15.0, %v619_v9  ;;  %v2981_v15 = vor.u32 %v2980_v2, %v2979_v10  ;;  %v3002_v16 = vcvt.s32.f32 %v3001_v44  ;;  %v4126_v17 = vadd.f32 -0.45, %v697_v42 }
 0x126   : > { %2960 = vmatpush.xpose.msk.msra.mxu3 %vm780_vm13, %v4085_v60  ;;  %v2990_v11 = vsel %vm2984_vm15, %v2989_v0, %v622_v18  ;;  %vm2976_vm1 = vcmp.lt.f32.partialorder %v2975_v4, 8388608.0  ;;  %v609_v19 = vmax.f32 %v601_v30, 0.0  ;;  %v2999_v3 = vand.u32 2147483647, %v624_v5 }
 0x127   : > { %v4117_v50 = vmul.f32 0.06666667, %v2990_v11  ;;  %v2982_v46 = vsel %vm2976_vm1, %v2981_v15, %v4066_v31  ;;  %v3003_v20 = vand.u32 2147483647, %v3002_v16  ;;  %v3025_v18 = vcvt.f32.s32 %v627_v63 }
 0x128   : > { %v617_v22 = vmin.f32 %v609_v19, 1.0  ;;  %v4139_v54 = vmul.f32 0.06666667, %v2982_v46  ;;  %vm3000_vm2 = vcmp.lt.f32.partialorder %v2999_v3, 8388608.0  ;;  %v3028_v7 = vand.u32 2147483648, %v627_v63 }
 0x129   : > { %1165 = vrot.lane.b32.xlu0 %v4085_v60, %s3609_s9  ;;  %2754 = vmatpush.xpose.msk.msrb.mxu0 %vm780_vm13, %v4002_v13  ;;  %v3005_v12 = vor.u32 %v3004_v55, %v3003_v20  ;;  %v3026_v8 = vcvt.s32.f32 %v3025_v18  ;;  %v3023_v61 = vand.u32 2147483647, %v627_v63  ;;  %v579_v36 = vadd.f32 %v3901_v37, %v578_v59 }
 0x12a   : > { %2961 = vmatpush.xpose.msk.msra.mxu3 %vm780_vm13, %v4002_v13  ;;  %1141 = vrot.lane.b32.xlu1 %v4117_v50, %s3609_s9  ;;  %v625_v31 = vmul.f32 15.0, %v617_v22  ;;  %v567_v4 = vadd.f32 %v3901_v37, %v3872_v1  ;;  %v570_v30 = vadd.f32 %v3901_v37, %v3893_v21  ;;  %v564_v16 = vadd.f32 %v3901_v37, %v3864_v51 }
 0x12b   : > { %3269 = vrot.lane.b32.xlu2 %v4103_v62, %s3609_s9  ;;  %v3006_v41 = vsel %vm3000_vm2, %v3005_v12, %v624_v5  ;;  %v3027_v24 = vand.u32 2147483647, %v3026_v8  ;;  %vm3024_vm3 = vcmp.lt.f32.partialorder %v3023_v61, 8388608.0  ;;  %v712_v0 = vmul.f32 %v3903_v45, %v579_v36 }
 0x12c   : > { %v3009_v27 = vcvt.f32.s32 %v625_v31  ;;  %v4151_v28 = vmul.f32 0.06666667, %v3006_v41  ;;  %v3007_v23 = vand.u32 2147483647, %v625_v31  ;;  %v3012_v34 = vand.u32 2147483648, %v625_v31  ;;  %v581_v57 = vpop.f32.mrf.mxu2 }
 0x12d   : > { %2755 = vmatpush.xpose.msk.msrb.mxu0 %vm780_vm13, %v4026_v48  ;;  %v3029_v29 = vor.u32 %v3028_v7, %v3027_v24  ;;  %v582_v2 = vadd.f32 %v3901_v37, %v581_v57  ;;  %v722_v10 = vadd.f32 %v3918_v6, %v712_v0  ;;  %v708_v46 = vmul.f32 %v3903_v45, %v567_v4 }
 0x12e   : > { %2962 = vmatpush.xpose.msk.msra.mxu3 %vm780_vm13, %v4026_v48  ;;  %v3010_v33 = vcvt.s32.f32 %v3009_v27  ;;  %vm3008_vm4 = vcmp.lt.f32.partialorder %v3007_v23, 8388608.0  ;;  %v709_v20 = vmul.f32 %v3903_v45, %v570_v30  ;;  %v707_v3 = vmul.f32 %v3903_v45, %v564_v16 }
 0x12f   : > { %v3030_v26 = vsel %vm3024_vm3, %v3029_v29, %v627_v63  ;;  %v713_v9 = vmul.f32 %v3903_v45, %v582_v2  ;;  %v730_v11 = vmax.f32 %v722_v10, 0.0  ;;  %v561_v1 = vadd.f32 %v3901_v37, %v3849_v40 }
 0x130   : > { %v3011_v43 = vand.u32 2147483647, %v3010_v33  ;;  %v4161_v53 = vmul.f32 0.06666667, %v3030_v26  ;;  %v718_v21 = vadd.f32 %v3918_v6, %v708_v46  ;;  %v719_v22 = vadd.f32 %v3918_v6, %v709_v20 }
 0x131   : > { %2756 = vmatpush.xpose.msk.msrb.mxu0 %vm780_vm13, %v3941_v32  ;;  %1155 = vrot.lane.b32.xlu0 %v4126_v17, %s3609_s9  ;;  %v723_v44 = vadd.f32 %v3918_v6, %v713_v9  ;;  %v738_v63 = vmin.f32 %v730_v11, 0.9  ;;  %v706_v24 = vmul.f32 %v3903_v45, %v561_v1  ;;  %vm918_vm11 = vcmask 261120  }
 0x132   : > { %2963 = vmatpush.xpose.msk.msra.mxu3 %vm780_vm13, %v3941_v32  ;;  %v3013_v39 = vor.u32 %v3012_v34, %v3011_v43  ;;  %v726_v7 = vmax.f32 %v718_v21, 0.0  ;;  %v727_v61 = vmax.f32 %v719_v22, 0.0  ;;  %vm2442_vm12 = vcmask 392192  }
 0x133   : > { %1568 = vrot.lane.b32.xlu2 %v4085_v60, %s3610_s21  ;;  %v731_v42 = vmax.f32 %v723_v44, 0.0  ;;  %v746_v55 = vmul.f32 16.666666, %v738_v63  ;;  %v716_v40 = vadd.f32 %v3918_v6, %v706_v24 }
 0x134   : > { %v3014_v5 = vsel %vm3008_vm4, %v3013_v39, %v625_v31  ;;  %v717_v31 = vadd.f32 %v3918_v6, %v707_v3  ;;  %v734_v37 = vmin.f32 %v726_v7, 0.9  ;;  %v735_v33 = vmin.f32 %v727_v61, 0.9 }
 0x135   : > { %2757 = vmatpush.xpose.msk.msrb.mxu0 %vm780_vm13, %v3973_v14  ;;  %v4163_v58 = vmul.f32 0.06666667, %v3014_v5  ;;  %v739_v15 = vmin.f32 %v731_v42, 0.9  ;;  %v3145_v51 = vcvt.f32.s32 %v746_v55  ;;  %v3143_v43 = vand.u32 2147483647, %v746_v55 }
 0x136   : > { %2964 = vmatpush.xpose.msk.msra.mxu3 %vm780_vm13, %v3973_v14  ;;  %v725_v29 = vmax.f32 %v717_v31, 0.0  ;;  %v3148_v39 = vand.u32 2147483648, %v746_v55  ;;  %v724_v0 = vmax.f32 %v716_v40, 0.0  ;;  %v742_v2 = vmul.f32 16.666666, %v734_v37 }
 0x137   : > { %1147 = vrot.lane.b32.xlu1 %v4163_v58, %s3609_s9  ;;  %v747_v18 = vmul.f32 16.666666, %v739_v15  ;;  %v3146_v27 = vcvt.s32.f32 %v3145_v51  ;;  %v743_v9 = vmul.f32 16.666666, %v735_v33  ;;  %vm3144_vm5 = vcmp.lt.f32.partialorder %v3143_v43, 8388608.0 }
 0x138   : > { %v733_v36 = vmin.f32 %v725_v29, 0.9  ;;  %v732_v11 = vmin.f32 %v724_v0, 0.9  ;;  %v3113_v16 = vcvt.f32.s32 %v742_v2 }
 0x139   : > { %2758 = vmatpush.xpose.msk.msrb.mxu0 %vm780_vm13, %v4126_v17  ;;  %1139 = vrot.lane.b32.xlu0 %v4139_v54, %s3609_s9  ;;  %v3153_v8 = vcvt.f32.s32 %v747_v18  ;;  %v3147_v26 = vand.u32 2147483647, %v3146_v27  ;;  %v3151_v5 = vand.u32 2147483647, %v747_v18  ;;  %v3156_v45 = vand.u32 2147483648, %v747_v18 }
 0x13a   : > { %2965 = vmatpush.xpose.msk.msra.mxu3 %vm780_vm13, %v4126_v17  ;;  %v741_v44 = vmul.f32 16.666666, %v733_v36  ;;  %v3121_v30 = vcvt.f32.s32 %v743_v9  ;;  %v740_v1 = vmul.f32 16.666666, %v732_v11  ;;  %v3119_v22 = vand.u32 2147483647, %v743_v9 }
 0x13b   : > { %v3154_v23 = vcvt.s32.f32 %v3153_v8  ;;  %v3149_v6 = vor.u32 %v3148_v39, %v3147_v26  ;;  %vm3152_vm6 = vcmp.lt.f32.partialorder %v3151_v5, 8388608.0  ;;  %v3124_v51 = vand.u32 2147483648, %v743_v9 }
 0x13c   : > { %v3111_v8 = vand.u32 2147483647, %v742_v2  ;;  %v3103_v31 = vand.u32 2147483647, %v741_v44  ;;  %v3108_v61 = vand.u32 2147483648, %v741_v44  ;;  %vm3120_vm7 = vcmp.lt.f32.partialorder %v3119_v22, 8388608.0 }
 0x13d   : > { %2759 = vmatpush.xpose.msk.msrb.mxu0 %vm780_vm13, %v4073_v25  ;;  %v3155_v59 = vand.u32 2147483647, %v3154_v23  ;;  %v3150_v42 = vsel %vm3144_vm5, %v3149_v6, %v746_v55  ;;  %v3114_v55 = vcvt.s32.f32 %v3113_v16  ;;  %v3097_v23 = vcvt.f32.s32 %v740_v1  ;;  %v4238_v22 = vld [vmem:[#allocation10 + $0x8] sm:$0xff] }
 0x13e   : > { %2966 = vmatpush.xpose.msk.msra.mxu3 %vm780_vm13, %v4073_v25  ;;  %v762_v63 = vmul.f32 0.06, %v3150_v42  ;;  %vm3112_vm8 = vcmp.lt.f32.partialorder %v3111_v8, 8388608.0  ;;  %vm3104_vm9 = vcmp.lt.f32.partialorder %v3103_v31, 8388608.0 }
 0x13f   : > { %v3157_v10 = vor.u32 %v3156_v45, %v3155_v59  ;;  %v3115_v27 = vand.u32 2147483647, %v3114_v55  ;;  %v3095_v45 = vand.u32 2147483647, %v740_v1  ;;  %v3098_v36 = vcvt.s32.f32 %v3097_v23 }
 0x140   : > { %2760 = vmatmul.msk.f32.vlgmr.msrb.gmra.mxu0 %vm780_vm13, %v3994_v56  ;;  %v2750_v20 = vadd.f32 -0.45, %v762_v63 }
 0x141   : > { %2761 = vmatmul.msk.f32.vlgmr.msra.gmra.mxu3 %vm780_vm13, %v4139_v54  ;;  %1145 = vrot.lane.b32.xlu0 %v4151_v28, %s3609_s9  ;;  %v3158_v4 = vsel %vm3152_vm6, %v3157_v10, %v747_v18  ;;  %v3116_v18 = vand.u32 2147483648, %v742_v2  ;;  %v3100_v10 = vand.u32 2147483648, %v740_v1  ;;  %vm3096_vm10 = vcmp.lt.f32.partialorder %v3095_v45, 8388608.0 }
 0x142   : > { %v763_v15 = vmul.f32 0.06, %v3158_v4 }
 0x143   : > { %v3117_v37 = vor.u32 %v3116_v18, %v3115_v27 }
 0x144   : > { %v2751_v3 = vadd.f32 -0.45, %v763_v15 }
 0x145   : > { %v3118_v39 = vsel %vm3112_vm8, %v3117_v37, %v742_v2 }
 0x146   : > { %v4213_v21 = vpack.i.bf16 %v2750_v20, %v2751_v3  ;;  %1068 = vmatpush.msrb.mxu1 %v2751_v3  ;;  %v758_v5 = vmul.f32 0.06, %v3118_v39 }
 0x148   : > { %3274 = vrot.lane.b32.xlu1 %v4213_v21, %s3609_s9  ;;  %1069 = vmatpush.msrb.mxu1 %v2750_v20  ;;  %v4224_v11 = vadd.f32 -0.45, %v758_v5 }
 0x149   : > { %2762 = vmatmul.msk.f32.gmra.mxu3 %vm780_vm13, %v4117_v50  ;;  %1151 = vrot.lane.b32.xlu0 %v4161_v53, %s3609_s9 }
 0x14a   : > { %1070 = vmatpush.msrb.mxu1 %v4093_v38 }
 0x14c   : > { %1071 = vmatpush.msrb.mxu1 %v4091_v35 }
 0x151   : > { %2763 = vmatmul.msk.f32.gmra.mxu3 %vm780_vm13, %v4028_v52  ;;  %1564 = vrot.lane.b32.xlu0 %v4026_v48, %s3610_s21 }
 0x159   : > { %2764 = vmatmul.msk.f32.gmra.mxu3 %vm780_vm13, %v4151_v28  ;;  %1562 = vrot.lane.b32.xlu0 %v3941_v32, %s3610_s21 }
 0x15b   : > { %v1160_v34 = vpop.permute.xlu2 %1159 }
 0x161   : > { %2765 = vmatmul.msk.f32.gmra.mxu3 %vm780_vm13, %v4163_v58 }
 0x163   : > { %v1158_v46 = vpop.permute.xlu2 %1157 }
 0x169   : > { %2766 = vmatmul.msk.f32.gmra.mxu3 %vm780_vm13, %v4071_v47 }
 0x171   : > { %2767 = vmatmul.msk.f32.gmra.mxu3 %vm780_vm13, %v4161_v53 }
 0x183   : > { %v1164_v12 = vpop.permute.xlu1 %1163 }
 0x18b   : > { %v1162_v57 = vpop.permute.xlu1 %1161 }
 0x193   : > { %v1168_v19 = vpop.permute.xlu0 %1167 }
 0x194   : > { %2800 = vmatpush.xpose.msk.msrb.mxu2 %vm780_vm13, %v1168_v19  ;;  %v3105_v19 = vcvt.f32.s32 %v741_v44  ;;  %v1154_v33 = vpop.permute.xlu1 %1153 }
 0x196   : > { %v3106_v7 = vcvt.s32.f32 %v3105_v19 }
 0x198   : > { %v3107_v40 = vand.u32 2147483647, %v3106_v7 }
 0x19a   : > { %v3109_v43 = vor.u32 %v3108_v61, %v3107_v40 }
 0x19b   : > { %v1166_v41 = vpop.permute.xlu0 %1165 }
 0x19c   : > { %2801 = vmatpush.xpose.msk.msrb.mxu2 %vm780_vm13, %v1166_v41  ;;  %v3110_v59 = vsel %vm3104_vm9, %v3109_v43, %v741_v44  ;;  %v1142_v8 = vpop.permute.xlu1 %1141 }
 0x19d   : > { %v757_v6 = vmul.f32 0.06, %v3110_v59 }
 0x19f   : > { %v4227_v42 = vadd.f32 -0.45, %v757_v6  ;;  %v4263_v6 = vld [vmem:[#allocation10 + $0x20] sm:$0xff] }
 0x1a0   : > { %2802 = vmatpush.xpose.msk.msrb.mxu2 %vm780_vm13, %v1164_v12  ;;  %v3122_v12 = vcvt.s32.f32 %v3121_v30  ;;  %v4231_v30 = vld [vmem:[#allocation10] sm:$0xff] }
 0x1a2   : > { %v3123_v24 = vand.u32 2147483647, %v3122_v12 }
 0x1a3   : > { %v1156_v41 = vpop.permute.xlu0 %1155 }
 0x1a4   : > { %2803 = vmatpush.xpose.msk.msrb.mxu2 %vm780_vm13, %v1162_v57  ;;  %v3125_v29 = vor.u32 %v3124_v51, %v3123_v24  ;;  %v1138_v57 = vpop.permute.xlu2 %1137  ;;  %v4245_v24 = vld [vmem:[#allocation10 + $0x10] sm:$0xff] }
 0x1a8   : > { %2804 = vmatpush.xpose.msk.msrb.mxu2 %vm780_vm13, %v1160_v34  ;;  %v3126_v34 = vsel %vm3120_vm7, %v3125_v29, %v743_v9  ;;  %v3099_v9 = vand.u32 2147483647, %v3098_v36 }
 0x1a9   : > { %v759_v26 = vmul.f32 0.06, %v3126_v34  ;;  %v4254_v34 = vld [vmem:[#allocation10 + $0x18] sm:$0xff] }
 0x1aa   : > { %v3101_v2 = vor.u32 %v3100_v10, %v3099_v9 }
 0x1ab   : > { %v4221_v0 = vadd.f32 -0.45, %v759_v26  ;;  %v1140_v15 = vpop.permute.xlu0 %1139 }
 0x1ac   : > { %2805 = vmatpush.xpose.msk.msrb.mxu2 %vm780_vm13, %v1158_v46  ;;  %v3102_v44 = vsel %vm3096_vm10, %v3101_v2, %v740_v1  ;;  %v1144_v23 = vpop.permute.xlu2 %1143 }
 0x1ad   : > { %955 = vmatpush.msra.mxu0 %v4221_v0  ;;  %v756_v4 = vmul.f32 0.06, %v3102_v44  ;;  %v1148_v44 = vpop.permute.xlu1 %1147 }
 0x1af   : > { %956 = vmatpush.msra.mxu0 %v4224_v11  ;;  %v4233_v19 = vadd.f32 -0.45, %v756_v4 }
 0x1b0   : > { %2806 = vmatpush.xpose.msk.msrb.mxu2 %vm780_vm13, %v1156_v41 }
 0x1b1   : > { %957 = vmatpush.msra.mxu0 %v4227_v42 }
 0x1b3   : > { %958 = vmatpush.msra.mxu0 %v4233_v19  ;;  %v1146_v5 = vpop.permute.xlu0 %1145 }
 0x1b4   : > { %2807 = vmatpush.xpose.msk.msrb.mxu2 %vm780_vm13, %v1154_v33 }
 0x1b7   : > { %2808 = vmatmul.msk.f32.vlgmr.msrb.gmra.mxu2 %vm780_vm13, %v1138_v57 }
 0x1bd   : > { %v846_v63 = vpop.f32.mrf.mxu0 }
 0x1be   : > { %v870_v16 = vmul.f32 19.3, %v846_v63 }
 0x1bf   : > { %2809 = vmatmul.msk.f32.gmra.mxu2 %vm780_vm13, %v1140_v15 }
 0x1c0   : > { %v878_v46 = vmul.f32 %v870_v16, %v4231_v30 }
 0x1c2   : > { %v886_v20 = vmul.f32 0.0125, %v878_v46  ;;  %v4270_v46 = vld [vmem:[#allocation10 + $0x28] sm:$0xff] }
 0x1c4   : > { %v894_v3 = vmax.f32 %v886_v20, 0.0  ;;  %v849_v1 = vpop.f32.mrf.mxu3 }
 0x1c5   : > { %v871_v12 = vmul.f32 19.3, %v849_v1 }
 0x1c6   : > { %v902_v51 = vmin.f32 %v894_v3, 1.0 }
 0x1c7   : > { %v879_v55 = vmul.f32 %v871_v12, %v4238_v22  ;;  %2810 = vmatmul.msk.f32.gmra.mxu2 %vm780_vm13, %v1142_v8  ;;  %v1150_v12 = vpop.permute.xlu2 %1149 }
 0x1c8   : > { %v910_v18 = vmul.f32 %v902_v51, %v4231_v30 }
 0x1c9   : > { %v887_v31 = vmul.f32 0.0125, %v879_v55 }
 0x1ca   : > { %1024 = vrot.lane.b32.xlu1 %v910_v18, %s3610_s21  ;;  %2768 = vmatmul.msk.f32.vlgmr.msra.gmra.mxu0 %vm918_vm11, %v910_v18 }
 0x1cb   : > { %v895_v41 = vmax.f32 %v887_v31, 0.0  ;;  %v4277_v31 = vld [vmem:[#allocation10 + $0x30] sm:$0xff] }
 0x1cc   : > { %v852_v7 = vpop.f32.mrf.mxu3 }
 0x1cd   : > { %v903_v61 = vmin.f32 %v895_v41, 1.0  ;;  %v872_v27 = vmul.f32 19.3, %v852_v7 }
 0x1cf   : > { %v880_v29 = vmul.f32 %v872_v27, %v4245_v24  ;;  %2811 = vmatmul.msk.f32.gmra.mxu2 %vm780_vm13, %v1144_v23  ;;  %v911_v40 = vmul.f32 %v903_v61, %v4238_v22  ;;  %v1152_v27 = vpop.permute.xlu0 %1151  ;;  %v4281_v23 = vpack.i.bf16 %v4233_v19, %v4227_v42 }
 0x1d1   : > { %v888_v37 = vmul.f32 0.0125, %v880_v29  ;;  %1026 = vrot.lane.b32.xlu2 %v911_v40, %s3610_s21 }
 0x1d2   : > { %1570 = vrot.lane.b32.xlu1 %v4069_v49, %s3610_s21  ;;  %2769 = vmatmul.msk.f32.gmra.mxu0 %vm918_vm11, %v911_v40 }
 0x1d3   : > { %v896_v33 = vmax.f32 %v888_v37, 0.0 }
 0x1d4   : > { %v855_v43 = vpop.f32.mrf.mxu3 }
 0x1d5   : > { %v904_v26 = vmin.f32 %v896_v33, 1.0  ;;  %v873_v39 = vmul.f32 19.3, %v855_v43  ;;  %v4288_v43 = vld [vmem:[#allocation10 + $0x38] sm:$0xff] }
 0x1d7   : > { %v881_v59 = vmul.f32 %v873_v39, %v4254_v34  ;;  %2812 = vmatmul.msk.f32.gmra.mxu2 %vm780_vm13, %v1146_v5  ;;  %v912_v45 = vmul.f32 %v904_v26, %v4245_v24 }
 0x1d9   : > { %v889_v36 = vmul.f32 0.0125, %v881_v59  ;;  %1566 = vrot.lane.b32.xlu2 %v4002_v13, %s3610_s21  ;;  %1028 = vrot.lane.b32.xlu0 %v912_v45, %s3610_s21 }
 0x1da   : > { %2770 = vmatmul.msk.f32.gmra.mxu0 %vm918_vm11, %v912_v45 }
 0x1db   : > { %v897_v57 = vmax.f32 %v889_v36, 0.0 }
 0x1dc   : > { %v858_v10 = vpop.f32.mrf.mxu3 }
 0x1dd   : > { %v905_v9 = vmin.f32 %v897_v57, 1.0  ;;  %v874_v2 = vmul.f32 19.3, %v858_v10  ;;  %v3275_v10 = vpop.permute.xlu1 %3274 }
 0x1df   : > { %v882_v4 = vmul.f32 %v874_v2, %v4263_v6  ;;  %2813 = vmatmul.msk.f32.gmra.mxu2 %vm780_vm13, %v1148_v44  ;;  %v913_v63 = vmul.f32 %v905_v9, %v4254_v34  ;;  %v3277_v9 = vunpack.i.h.bf16 %v3275_v10  ;;  %v3276_v2 = vunpack.i.l.bf16 %v3275_v10  ;;  %v3270_v44 = vpop.permute.xlu2 %3269 }
 0x1e1   : > { %v890_v15 = vmul.f32 0.0125, %v882_v4  ;;  %1030 = vrot.lane.b32.xlu0 %v913_v63, %s3610_s21  ;;  %v3271_v4 = vunpack.i.l.bf16 %v3270_v44  ;;  %1471 = vmatpush.msrb.mxu0 %v3276_v2 }
 0x1e2   : > { %2771 = vmatmul.msk.f32.gmra.mxu0 %vm918_vm11, %v913_v63  ;;  %v3272_v63 = vunpack.i.h.bf16 %v3270_v44 }
 0x1e3   : > { %v898_v16 = vmax.f32 %v890_v15, 0.0  ;;  %1472 = vmatpush.msrb.mxu0 %v3277_v9 }
 0x1e4   : > { %v861_v20 = vpop.f32.mrf.mxu3 }
 0x1e5   : > { %v906_v3 = vmin.f32 %v898_v16, 1.0  ;;  %v875_v1 = vmul.f32 19.3, %v861_v20  ;;  %1473 = vmatpush.msrb.mxu0 %v3271_v4  ;;  %v1565_v16 = vpop.permute.xlu0 %1564 }
 0x1e7   : > { %v883_v51 = vmul.f32 %v875_v1, %v4270_v46  ;;  %2814 = vmatmul.msk.f32.gmra.mxu2 %vm780_vm13, %v1150_v12  ;;  %v914_v8 = vmul.f32 %v906_v3, %v4263_v6  ;;  %1474 = vmatpush.msrb.mxu0 %v3272_v63  ;;  %v1569_v15 = vpop.permute.xlu2 %1568 }
 0x1e9   : > { %v891_v55 = vmul.f32 0.0125, %v883_v51  ;;  %1032 = vrot.lane.b32.xlu2 %v914_v8, %s3610_s21 }
 0x1ea   : > { %2772 = vmatmul.msk.f32.gmra.mxu0 %vm918_vm11, %v914_v8 }
 0x1eb   : > { %v899_v18 = vmax.f32 %v891_v55, 0.0 }
 0x1ec   : > { %v864_v41 = vpop.f32.mrf.mxu3 }
 0x1ed   : > { %v907_v7 = vmin.f32 %v899_v18, 1.0  ;;  %v876_v61 = vmul.f32 19.3, %v864_v41  ;;  %v1563_v18 = vpop.permute.xlu0 %1562 }
 0x1ef   : > { %v884_v29 = vmul.f32 %v876_v61, %v4277_v31  ;;  %2815 = vmatmul.msk.f32.gmra.mxu2 %vm780_vm13, %v1152_v27  ;;  %v915_v40 = vmul.f32 %v907_v7, %v4270_v46 }
 0x1f1   : > { %v892_v37 = vmul.f32 0.0125, %v884_v29  ;;  %1034 = vrot.lane.b32.xlu0 %v915_v40, %s3610_s21 }
 0x1f2   : > { %2773 = vmatmul.msk.f32.gmra.mxu0 %vm918_vm11, %v915_v40 }
 0x1f3   : > { %v900_v33 = vmax.f32 %v892_v37, 0.0 }
 0x1f4   : > { %v867_v26 = vpop.f32.mrf.mxu3 }
 0x1f5   : > { %v908_v39 = vmin.f32 %v900_v33, 1.0  ;;  %v877_v5 = vmul.f32 19.3, %v867_v26 }
 0x1f7   : > { %v885_v42 = vmul.f32 %v877_v5, %v4288_v43  ;;  %v916_v19 = vmul.f32 %v908_v39, %v4277_v31 }
 0x1f9   : > { %v893_v59 = vmul.f32 0.0125, %v885_v42  ;;  %1036 = vrot.lane.b32.xlu1 %v916_v19, %s3610_s21 }
 0x1fa   : > { %2774 = vmatmul.msk.f32.gmra.mxu0 %vm918_vm11, %v916_v19 }
 0x1fb   : > { %v901_v45 = vmax.f32 %v893_v59, 0.0 }
 0x1fd   : > { %v909_v36 = vmin.f32 %v901_v45, 1.0 }
 0x1ff   : > { %v917_v57 = vmul.f32 %v909_v36, %v4288_v43 }
 0x201   : > { %1038 = vrot.lane.b32.xlu2 %v917_v57, %s3610_s21 }
 0x202   : > { %2775 = vmatmul.msk.f32.gmra.mxu0 %vm918_vm11, %v917_v57 }
 0x209   : > { %1965 = vrot.lane.b32.xlu2 %v4069_v49, %s3611_s15 }
 0x22b   : > { %v1027_v51 = vpop.permute.xlu2 %1026 }
 0x233   : > { %v1567_v26 = vpop.permute.xlu2 %1566 }
 0x23a   : > { %v1218_v20 = vpop.f32.mrf.mxu2 }
 0x23b   : > { %v1242_v3 = vmul.f32 19.3, %v1218_v20 }
 0x23c   : > { %v1025_v1 = vpop.permute.xlu1 %1024 }
 0x23d   : > { %v1250_v12 = vmul.f32 %v1242_v3, %v4231_v30  ;;  %2784 = vmatmul.msk.f32.vlgmr.msrb.gmra.mxu1 %vm918_vm11, %v1025_v1 }
 0x23f   : > { %v1258_v49 = vmul.f32 0.0125, %v1250_v12 }
 0x241   : > { %v1266_v8 = vmax.f32 %v1258_v49, 0.0 }
 0x242   : > { %v1221_v55 = vpop.f32.mrf.mxu2 }
 0x243   : > { %v1274_v41 = vmin.f32 %v1266_v8, 1.0  ;;  %v1243_v7 = vmul.f32 19.3, %v1221_v55  ;;  %v1033_v2 = vpop.permute.xlu2 %1032 }
 0x244   : > { %v1571_v61 = vpop.permute.xlu1 %1570 }
 0x245   : > { %v1251_v27 = vmul.f32 %v1243_v7, %v4238_v22  ;;  %2785 = vmatmul.msk.f32.gmra.mxu1 %vm918_vm11, %v1027_v51  ;;  %v4304_v29 = vmul.f32 %v1274_v41, %v4231_v30 }
 0x246   : > { %2848 = vmatpush.xpose.msk.msra.mxu1 %vm780_vm13, %v1571_v61 }
 0x247   : > { %v1259_v40 = vmul.f32 0.0125, %v1251_v27  ;;  %1411 = vrot.lane.b32.xlu1 %v4304_v29, %s3610_s21 }
 0x249   : > { %v1267_v37 = vmax.f32 %v1259_v40, 0.0 }
 0x24a   : > { %2849 = vmatpush.xpose.msk.msra.mxu1 %vm780_vm13, %v1569_v15  ;;  %v1224_v33 = vpop.f32.mrf.mxu2 }
 0x24b   : > { %v1275_v39 = vmin.f32 %v1267_v37, 1.0  ;;  %v1244_v5 = vmul.f32 19.3, %v1224_v33  ;;  %v1029_v42 = vpop.permute.xlu0 %1028 }
 0x24d   : > { %v1252_v19 = vmul.f32 %v1244_v5, %v4245_v24  ;;  %2786 = vmatmul.msk.f32.gmra.mxu1 %vm918_vm11, %v1029_v42  ;;  %v4313_v59 = vmul.f32 %v1275_v39, %v4238_v22 }
 0x24e   : > { %2850 = vmatpush.xpose.msk.msra.mxu1 %vm780_vm13, %v1567_v26 }
 0x24f   : > { %v1260_v45 = vmul.f32 0.0125, %v1252_v19  ;;  %1413 = vrot.lane.b32.xlu0 %v4313_v59, %s3610_s21  ;;  %1560 = vrot.lane.b32.xlu1 %v3973_v14, %s3610_s21 }
 0x251   : > { %v1268_v36 = vmax.f32 %v1260_v45, 0.0 }
 0x252   : > { %2851 = vmatpush.xpose.msk.msra.mxu1 %vm780_vm13, %v1565_v16  ;;  %v1227_v57 = vpop.f32.mrf.mxu2 }
 0x253   : > { %v1276_v10 = vmin.f32 %v1268_v36, 1.0  ;;  %v1245_v9 = vmul.f32 19.3, %v1227_v57  ;;  %v1031_v44 = vpop.permute.xlu0 %1030 }
 0x255   : > { %v1253_v4 = vmul.f32 %v1245_v9, %v4254_v34  ;;  %2787 = vmatmul.msk.f32.gmra.mxu1 %vm918_vm11, %v1031_v44  ;;  %v4324_v63 = vmul.f32 %v1276_v10, %v4245_v24 }
 0x256   : > { %2852 = vmatpush.xpose.msk.msra.mxu1 %vm780_vm13, %v1563_v18 }
 0x257   : > { %v1261_v15 = vmul.f32 0.0125, %v1253_v4  ;;  %1556 = vrot.lane.b32.xlu0 %v4073_v25, %s3610_s21  ;;  %1415 = vrot.lane.b32.xlu1 %v4324_v63, %s3610_s21 }
 0x259   : > { %v1269_v16 = vmax.f32 %v1261_v15, 0.0 }
 0x25a   : > { %v1230_v20 = vpop.f32.mrf.mxu2 }
 0x25b   : > { %v1277_v3 = vmin.f32 %v1269_v16, 1.0  ;;  %v1246_v1 = vmul.f32 19.3, %v1230_v20  ;;  %v1039_v12 = vpop.permute.xlu2 %1038 }
 0x25d   : > { %v1254_v49 = vmul.f32 %v1246_v1, %v4263_v6  ;;  %2788 = vmatmul.msk.f32.gmra.mxu1 %vm918_vm11, %v1033_v2  ;;  %v4334_v51 = vmul.f32 %v1277_v3, %v4254_v34 }
 0x25f   : > { %v1262_v8 = vmul.f32 0.0125, %v1254_v49  ;;  %1542 = vrot.lane.b32.xlu0 %v4139_v54, %s3610_s21  ;;  %1417 = vrot.lane.b32.xlu2 %v4334_v51, %s3610_s21 }
 0x260   : > { %1558 = vrot.lane.b32.xlu1 %v4126_v17, %s3610_s21 }
 0x261   : > { %v1270_v55 = vmax.f32 %v1262_v8, 0.0 }
 0x262   : > { %v1233_v18 = vpop.f32.mrf.mxu2 }
 0x263   : > { %v1278_v41 = vmin.f32 %v1270_v55, 1.0  ;;  %v1247_v7 = vmul.f32 19.3, %v1233_v18  ;;  %v1966_v61 = vpop.permute.xlu2 %1965  ;;  %v1035_v27 = vpop.permute.xlu0 %1034 }
 0x264   : > { %2896 = vmatpush.xpose.msk.msra.mxu0 %vm780_vm13, %v1966_v61 }
 0x265   : > { %v1255_v40 = vmul.f32 %v1247_v7, %v4270_v46  ;;  %2789 = vmatmul.msk.f32.gmra.mxu1 %vm918_vm11, %v1035_v27  ;;  %v4346_v37 = vmul.f32 %v1278_v41, %v4263_v6 }
 0x267   : > { %v1263_v33 = vmul.f32 0.0125, %v1255_v40  ;;  %1540 = vrot.lane.b32.xlu2 %v3994_v56, %s3610_s21  ;;  %1419 = vrot.lane.b32.xlu0 %v4346_v37, %s3610_s21 }
 0x268   : > { %1963 = vrot.lane.b32.xlu1 %v4085_v60, %s3611_s15 }
 0x269   : > { %v1271_v26 = vmax.f32 %v1263_v33, 0.0 }
 0x26a   : > { %v1236_v39 = vpop.f32.mrf.mxu2 }
 0x26b   : > { %v1279_v5 = vmin.f32 %v1271_v26, 1.0  ;;  %v1248_v42 = vmul.f32 19.3, %v1236_v39  ;;  %v1037_v19 = vpop.permute.xlu1 %1036 }
 0x26d   : > { %v1256_v45 = vmul.f32 %v1248_v42, %v4277_v31  ;;  %2790 = vmatmul.msk.f32.gmra.mxu1 %vm918_vm11, %v1037_v19  ;;  %v4357_v36 = vmul.f32 %v1279_v5, %v4270_v46 }
 0x26f   : > { %v1264_v57 = vmul.f32 0.0125, %v1256_v45  ;;  %1959 = vrot.lane.b32.xlu2 %v4026_v48, %s3611_s15  ;;  %1421 = vrot.lane.b32.xlu0 %v4357_v36, %s3610_s21 }
 0x270   : > { %1961 = vrot.lane.b32.xlu1 %v4002_v13, %s3611_s15 }
 0x271   : > { %v1272_v60 = vmax.f32 %v1264_v57, 0.0 }
 0x272   : > { %v1239_v10 = vpop.f32.mrf.mxu2 }
 0x273   : > { %v1280_v9 = vmin.f32 %v1272_v60, 1.0  ;;  %v1249_v2 = vmul.f32 19.3, %v1239_v10 }
 0x275   : > { %v1257_v44 = vmul.f32 %v1249_v2, %v4288_v43  ;;  %2791 = vmatmul.msk.f32.gmra.mxu1 %vm918_vm11, %v1039_v12  ;;  %v4368_v4 = vmul.f32 %v1280_v9, %v4277_v31 }
 0x277   : > { %v1265_v15 = vmul.f32 0.0125, %v1257_v44  ;;  %1957 = vrot.lane.b32.xlu2 %v3941_v32, %s3611_s15  ;;  %1955 = vrot.lane.b32.xlu0 %v3973_v14, %s3611_s15  ;;  %v3278_v32 = vpack.i.bf16 %v4224_v11, %v4221_v0  ;;  %v960_v14 = vpop.f32.mrf.mxu0 }
 0x278   : > { %1423 = vrot.lane.b32.xlu1 %v4368_v4, %s3610_s21 }
 0x279   : > { %v1273_v13 = vmax.f32 %v1265_v15, 0.0 }
 0x27b   : > { %v1281_v48 = vmin.f32 %v1273_v13, 1.0 }
 0x27d   : > { %v4377_v16 = vmul.f32 %v1281_v48, %v4288_v43 }
 0x27f   : > { %1953 = vrot.lane.b32.xlu0 %v4126_v17, %s3611_s15  ;;  %1425 = vrot.lane.b32.xlu2 %v4377_v16, %s3610_s21 }
 0x280   : > { %1544 = vrot.lane.b32.xlu1 %v4117_v50, %s3610_s21 }
 0x287   : > { %1935 = vrot.lane.b32.xlu0 %v3994_v56, %s3611_s15  ;;  %1546 = vrot.lane.b32.xlu2 %v4028_v52, %s3610_s21  ;;  %v963_v56 = vpop.f32.mrf.mxu0 }
 0x288   : > { %1951 = vrot.lane.b32.xlu1 %v4073_v25, %s3611_s15  ;;  %v985_v3 = vmul.f32 19.3, %v963_v56 }
 0x28a   : > { %v993_v18 = vmul.f32 0.025, %v985_v3 }
 0x28f   : > { %1550 = vrot.lane.b32.xlu0 %v4163_v58, %s3610_s21  ;;  %1937 = vrot.lane.b32.xlu2 %v4139_v54, %s3611_s15 }
 0x290   : > { %1548 = vrot.lane.b32.xlu1 %v4151_v28, %s3610_s21 }
 0x297   : > { %1941 = vrot.lane.b32.xlu0 %v4028_v52, %s3611_s15  ;;  %1552 = vrot.lane.b32.xlu2 %v4071_v47, %s3610_s21  ;;  %v984_v52 = vmul.f32 19.3, %v960_v14 }
 0x298   : > { %1939 = vrot.lane.b32.xlu1 %v4117_v50, %s3611_s15 }
 0x299   : > { %v992_v17 = vmul.f32 0.025, %v984_v52 }
 0x29b   : > { %v2776_v20 = vclamps-f32 %v992_v17, 1.0 }
 0x29f   : > { %1945 = vrot.lane.b32.xlu0 %v4163_v58, %s3611_s15  ;;  %1943 = vrot.lane.b32.xlu2 %v4151_v28, %s3611_s15  ;;  %v966_v28 = vpop.f32.mrf.mxu0  ;;  %v3318_v58 = vpack.i.bf16 %v4224_v11, %v4091_v35 }
 0x2a0   : > { %1554 = vrot.lane.b32.xlu1 %v4161_v53, %s3610_s21  ;;  %v986_v11 = vmul.f32 19.3, %v966_v28 }
 0x2a2   : > { %v994_v26 = vmul.f32 0.025, %v986_v11 }
 0x2a4   : > { %v2778_v19 = vclamps-f32 %v994_v26, 1.0 }
 0x2a7   : > { %3279 = vrot.lane.b32.xlu0 %v3278_v32, %s3609_s9  ;;  %1949 = vrot.lane.b32.xlu2 %v4161_v53, %s3611_s15  ;;  %v969_v41 = vpop.f32.mrf.mxu0 }
 0x2a8   : > { %1947 = vrot.lane.b32.xlu1 %v4071_v47, %s3611_s15  ;;  %v987_v45 = vmul.f32 19.3, %v969_v41 }
 0x2aa   : > { %v995_v15 = vmul.f32 0.025, %v987_v45 }
 0x2ac   : > { %v2779_v14 = vclamps-f32 %v995_v15, 1.0 }
 0x2af   : > { %3294 = vrot.lane.b32.xlu0 %v4281_v23, %s3610_s21  ;;  %3289 = vrot.lane.b32.xlu2 %v4281_v23, %s3609_s9  ;;  %v972_v60 = vpop.f32.mrf.mxu0  ;;  %s2571_s9 = sshll.u32 %s2568_s22, 4  ;;  %s2572_s9 = int_to_ptr.hbm [resolvable:$true] %s2571_s9 }
 0x2b0   : > { %3284 = vrot.lane.b32.xlu1 %v3278_v32, %s3610_s21  ;;  %v988_v56 = vmul.f32 19.3, %v972_v60 }
 0x2b2   : > { %v996_v28 = vmul.f32 0.025, %v988_v56 }
 0x2b7   : > { %3309 = vrot.lane.b32.xlu0 %v4103_v62, %s3610_s21  ;;  %3304 = vrot.lane.b32.xlu2 %v4213_v21, %s3611_s15  ;;  %v3313_v62 = vpack.i.bf16 %v4221_v0, %v4093_v38  ;;  %v2777_v0 = vclamps-f32 %v993_v18, 1.0 }
 0x2b8   : > { %3299 = vrot.lane.b32.xlu1 %v4213_v21, %s3610_s21 }
 0x2b9   : > { %v1418_v47 = vpop.permute.xlu2 %1417  ;;  %v1412_v25 = vpop.permute.xlu1 %1411 }
 0x2ba   : > { %v1073_v50 = vpop.f32.mrf.mxu1  ;;  %2832 = vmatmul.msk.f32.vlgmr.msrb.gmra.mxu0 %vm918_vm11, %v1412_v25 }
 0x2bb   : > { %v1097_v54 = vmul.f32 19.3, %v1073_v50 }
 0x2bd   : > { %v1105_v53 = vmul.f32 0.025, %v1097_v54 }
 0x2bf   : > { %v2792_v1 = vclamps-f32 %v1105_v53, 1.0  ;;  %3319 = vrot.lane.b32.xlu0 %v3318_v58, %s3611_s15 }
 0x2c0   : > { %3314 = vrot.lane.b32.xlu1 %v3313_v62, %s3611_s15  ;;  %v2780_v62 = vclamps-f32 %v996_v28, 1.0 }
 0x2c1   : > { %v4434_v21 = vadd.f32 %v2792_v1, %v2776_v20  ;;  %v1414_v12 = vpop.permute.xlu0 %1413  ;;  %v1541_v49 = vpop.permute.xlu2 %1540 }
 0x2c2   : > { %v1561_v8 = vpop.permute.xlu1 %1560  ;;  %v1076_v55 = vpop.f32.mrf.mxu1  ;;  %2833 = vmatmul.msk.f32.gmra.mxu0 %vm918_vm11, %v1414_v12 }
 0x2c3   : > { %v1098_v35 = vmul.f32 19.3, %v1076_v55  ;;  %2853 = vmatpush.xpose.msk.msra.mxu1 %vm780_vm13, %v1561_v8 }
 0x2c5   : > { %v1106_v38 = vmul.f32 0.025, %v1098_v35 }
 0x2c7   : > { %v2793_v7 = vclamps-f32 %v1106_v38, 1.0 }
 0x2c9   : > { %v4438_v61 = vadd.f32 %v2793_v7, %v2777_v0  ;;  %v1557_v27 = vpop.permute.xlu0 %1556  ;;  %v1960_v39 = vpop.permute.xlu2 %1959 }
 0x2ca   : > { %v1416_v40 = vpop.permute.xlu1 %1415  ;;  %v1079_v33 = vpop.f32.mrf.mxu1 }
 0x2cb   : > { %v1099_v5 = vmul.f32 19.3, %v1079_v33  ;;  %2834 = vmatmul.msk.f32.gmra.mxu0 %vm918_vm11, %v1416_v40 }
 0x2cd   : > { %v1107_v42 = vmul.f32 0.025, %v1099_v5 }
 0x2cf   : > { %v2794_v57 = vclamps-f32 %v1107_v42, 1.0 }
 0x2d1   : > { %v4441_v10 = vadd.f32 %v2794_v57, %v2778_v19  ;;  %v1543_v9 = vpop.permute.xlu0 %1542  ;;  %v1958_v48 = vpop.permute.xlu2 %1957 }
 0x2d2   : > { %v1559_v2 = vpop.permute.xlu1 %1558  ;;  %v1082_v44 = vpop.f32.mrf.mxu1 }
 0x2d3   : > { %v1100_v13 = vmul.f32 19.3, %v1082_v44  ;;  %2835 = vmatmul.msk.f32.gmra.mxu0 %vm918_vm11, %v1418_v47  ;;  %2854 = vmatpush.xpose.msk.msra.mxu1 %vm780_vm13, %v1559_v2  ;;  %v975_v47 = vpop.f32.mrf.mxu0 }
 0x2d4   : > { %v989_v20 = vmul.f32 19.3, %v975_v47 }
 0x2d5   : > { %v1108_v32 = vmul.f32 0.025, %v1100_v13 }
 0x2d6   : > { %v997_v18 = vmul.f32 0.025, %v989_v20 }
 0x2d7   : > { %v2795_v52 = vclamps-f32 %v1108_v32, 1.0  ;;  %2855 = vmatpush.xpose.msk.msra.mxu1 %vm780_vm13, %v1557_v27 }
 0x2d8   : > { %v2781_v11 = vclamps-f32 %v997_v18, 1.0 }
 0x2d9   : > { %v4446_v25 = vadd.f32 %v2795_v52, %v2779_v14  ;;  %v1420_v50 = vpop.permute.xlu0 %1419  ;;  %v1426_v3 = vpop.permute.xlu2 %1425 }
 0x2da   : > { %2856 = vmatmul.msk.f32.vlgmr.msra.gmra.mxu1 %vm780_vm13, %v1541_v49  ;;  %v1964_v17 = vpop.permute.xlu1 %1963  ;;  %v1085_v54 = vpop.f32.mrf.mxu1 }
 0x2db   : > { %v1101_v53 = vmul.f32 19.3, %v1085_v54  ;;  %2897 = vmatpush.xpose.msk.msra.mxu0 %vm780_vm13, %v1964_v17  ;;  %v978_v38 = vpop.f32.mrf.mxu0 }
 0x2dc   : > { %2836 = vmatmul.msk.f32.gmra.mxu0 %vm918_vm11, %v1420_v50  ;;  %v990_v41 = vmul.f32 19.3, %v978_v38 }
 0x2dd   : > { %v1109_v58 = vmul.f32 0.025, %v1101_v53 }
 0x2de   : > { %v998_v42 = vmul.f32 0.025, %v990_v41 }
 0x2df   : > { %v2796_v1 = vclamps-f32 %v1109_v58, 1.0 }
 0x2e0   : > { %v2782_v57 = vclamps-f32 %v998_v42, 1.0 }
 0x2e1   : > { %v4451_v12 = vadd.f32 %v2796_v1, %v2780_v62  ;;  %v1422_v8 = vpop.permute.xlu0 %1421  ;;  %v1547_v27 = vpop.permute.xlu2 %1546 }
 0x2e2   : > { %2857 = vmatmul.msk.f32.gmra.mxu1 %vm780_vm13, %v1543_v9  ;;  %v1962_v49 = vpop.permute.xlu1 %1961  ;;  %v1088_v55 = vpop.f32.mrf.mxu1 }
 0x2e3   : > { %v1102_v35 = vmul.f32 19.3, %v1088_v55  ;;  %2898 = vmatpush.xpose.msk.msra.mxu0 %vm780_vm13, %v1962_v49 }
 0x2e4   : > { %2837 = vmatmul.msk.f32.gmra.mxu0 %vm918_vm11, %v1422_v8 }
 0x2e5   : > { %v1110_v0 = vmul.f32 0.025, %v1102_v35 }
 0x2e7   : > { %v2797_v7 = vclamps-f32 %v1110_v0, 1.0  ;;  %2899 = vmatpush.xpose.msk.msra.mxu0 %vm780_vm13, %v1960_v39 }
 0x2e9   : > { %v4457_v40 = vadd.f32 %v2797_v7, %v2781_v11  ;;  %v1956_v33 = vpop.permute.xlu0 %1955  ;;  %v1938_v44 = vpop.permute.xlu2 %1937 }
 0x2ea   : > { %v1424_v26 = vpop.permute.xlu1 %1423  ;;  %v1091_v5 = vpop.f32.mrf.mxu1 }
 0x2eb   : > { %v1103_v19 = vmul.f32 19.3, %v1091_v5  ;;  %2900 = vmatpush.xpose.msk.msra.mxu0 %vm780_vm13, %v1958_v48 }
 0x2ec   : > { %2838 = vmatmul.msk.f32.gmra.mxu0 %vm918_vm11, %v1424_v26  ;;  %v4484_v26 = vpop.f32.mrf.mxu0 }
 0x2ed   : > { %v1111_v45 = vmul.f32 0.025, %v1103_v19 }
 0x2ef   : > { %v2798_v60 = vclamps-f32 %v1111_v45, 1.0  ;;  %2901 = vmatpush.xpose.msk.msra.mxu0 %vm780_vm13, %v1956_v33 }
 0x2f1   : > { %v4462_v9 = vadd.f32 %v2798_v60, %v2782_v57  ;;  %v1954_v39 = vpop.permute.xlu0 %1953  ;;  %v1553_v48 = vpop.permute.xlu2 %1552 }
 0x2f2   : > { %v1545_v2 = vpop.permute.xlu1 %1544 }
 0x2f3   : > { %2858 = vmatmul.msk.f32.gmra.mxu1 %vm780_vm13, %v1545_v2  ;;  %2902 = vmatpush.xpose.msk.msra.mxu0 %vm780_vm13, %v1954_v39 }
 0x2f4   : > { %2839 = vmatmul.msk.f32.gmra.mxu0 %vm918_vm11, %v1426_v3 }
 0x2f9   : > { %v1936_v15 = vpop.permute.xlu0 %1935  ;;  %v1944_v56 = vpop.permute.xlu2 %1943 }
 0x2fa   : > { %v1952_v13 = vpop.permute.xlu1 %1951 }
 0x2fb   : > { %2859 = vmatmul.msk.f32.gmra.mxu1 %vm780_vm13, %v1547_v27  ;;  %2903 = vmatpush.xpose.msk.msra.mxu0 %vm780_vm13, %v1952_v13 }
 0x2fe   : > { %2904 = vmatmul.msk.f32.vlgmr.msra.gmra.mxu0 %vm780_vm13, %v1936_v15 }
 0x301   : > { %v1551_v32 = vpop.permute.xlu0 %1550  ;;  %v1950_v17 = vpop.permute.xlu2 %1949 }
 0x302   : > { %v1549_v14 = vpop.permute.xlu1 %1548 }
 0x303   : > { %2860 = vmatmul.msk.f32.gmra.mxu1 %vm780_vm13, %v1549_v14 }
 0x306   : > { %2905 = vmatmul.msk.f32.gmra.mxu0 %vm780_vm13, %v1938_v44 }
 0x309   : > { %v1942_v52 = vpop.permute.xlu0 %1941  ;;  %v3290_v62 = vpop.permute.xlu2 %3289 }
 0x30a   : > { %v1940_v50 = vpop.permute.xlu1 %1939  ;;  %v3291_v3 = vunpack.i.l.bf16 %v3290_v62  ;;  %v3292_v1 = vunpack.i.h.bf16 %v3290_v62 }
 0x30b   : > { %2861 = vmatmul.msk.f32.gmra.mxu1 %vm780_vm13, %v1551_v32 }
 0x30e   : > { %2906 = vmatmul.msk.f32.gmra.mxu0 %vm780_vm13, %v1940_v50 }
 0x311   : > { %v1946_v54 = vpop.permute.xlu0 %1945  ;;  %v3305_v35 = vpop.permute.xlu2 %3304 }
 0x312   : > { %v1555_v28 = vpop.permute.xlu1 %1554  ;;  %v3306_v41 = vunpack.i.l.bf16 %v3305_v35  ;;  %v3307_v33 = vunpack.i.h.bf16 %v3305_v35 }
 0x313   : > { %2862 = vmatmul.msk.f32.gmra.mxu1 %vm780_vm13, %v1553_v48 }
 0x316   : > { %2907 = vmatmul.msk.f32.gmra.mxu0 %vm780_vm13, %v1942_v52 }
 0x319   : > { %v3280_v53 = vpop.permute.xlu0 %3279 }
 0x31a   : > { %v1948_v47 = vpop.permute.xlu1 %1947  ;;  %v3281_v58 = vunpack.i.l.bf16 %v3280_v53  ;;  %v3282_v20 = vunpack.i.h.bf16 %v3280_v53 }
 0x31b   : > { %2863 = vmatmul.msk.f32.gmra.mxu1 %vm780_vm13, %v1555_v28 }
 0x31c   : > { %1342 = vmatpush.msrb.mxu3 %v3281_v58 }
 0x31e   : > { %2908 = vmatmul.msk.f32.gmra.mxu0 %vm780_vm13, %v1944_v56  ;;  %1343 = vmatpush.msrb.mxu3 %v3282_v20 }
 0x320   : > { %1344 = vmatpush.msrb.mxu3 %v3291_v3 }
 0x321   : > { %v3295_v8 = vpop.permute.xlu0 %3294 }
 0x322   : > { %v3285_v49 = vpop.permute.xlu1 %3284  ;;  %1345 = vmatpush.msrb.mxu3 %v3292_v1  ;;  %v3296_v38 = vunpack.i.l.bf16 %v3295_v8  ;;  %v3297_v0 = vunpack.i.h.bf16 %v3295_v8 }
 0x323   : > { %v3286_v55 = vunpack.i.l.bf16 %v3285_v49  ;;  %2816 = vmatmul.msk.f32.vlgmr.msrb.gmra.mxu3 %vm918_vm11, %v4304_v29  ;;  %v3287_v18 = vunpack.i.h.bf16 %v3285_v49 }
 0x325   : > { %1741 = vmatpush.msra.mxu2 %v3286_v55 }
 0x326   : > { %2909 = vmatmul.msk.f32.gmra.mxu0 %vm780_vm13, %v1946_v54 }
 0x327   : > { %1742 = vmatpush.msra.mxu2 %v3287_v18 }
 0x329   : > { %1743 = vmatpush.msra.mxu2 %v3296_v38  ;;  %v3310_v11 = vpop.permute.xlu0 %3309 }
 0x32a   : > { %v3300_v7 = vpop.permute.xlu1 %3299  ;;  %v3311_v5 = vunpack.i.l.bf16 %v3310_v11  ;;  %v3312_v42 = vunpack.i.h.bf16 %v3310_v11 }
 0x32b   : > { %v3301_v27 = vunpack.i.l.bf16 %v3300_v7  ;;  %1744 = vmatpush.msra.mxu2 %v3297_v0  ;;  %2817 = vmatmul.msk.f32.gmra.mxu3 %vm918_vm11, %v4313_v59  ;;  %v3302_v29 = vunpack.i.h.bf16 %v3300_v7 }
 0x32d   : > { %2261 = vmatpush.msrb.mxu2 %v3306_v41  ;;  %1866 = vmatpush.msra.mxu3 %v3301_v27 }
 0x32e   : > { %2910 = vmatmul.msk.f32.gmra.mxu0 %vm780_vm13, %v1948_v47 }
 0x32f   : > { %2262 = vmatpush.msrb.mxu2 %v3307_v33  ;;  %1867 = vmatpush.msra.mxu3 %v3302_v29 }
 0x331   : > { %1868 = vmatpush.msra.mxu3 %v3311_v5  ;;  %v3320_v19 = vpop.permute.xlu0 %3319 }
 0x332   : > { %v3315_v45 = vpop.permute.xlu1 %3314  ;;  %v3322_v59 = vunpack.i.h.bf16 %v3320_v19  ;;  %v3321_v39 = vunpack.i.l.bf16 %v3320_v19 }
 0x333   : > { %v3317_v57 = vunpack.i.h.bf16 %v3315_v45  ;;  %v3316_v60 = vunpack.i.l.bf16 %v3315_v45  ;;  %1869 = vmatpush.msra.mxu3 %v3312_v42 }
 0x334   : > { %2818 = vmatmul.msk.f32.gmra.mxu3 %vm918_vm11, %v4324_v63  ;;  %v4501_v63 = vpop.f32.mrf.mxu1 }
 0x335   : > { %2136 = vmatpush.msrb.mxu1 %v3317_v57  ;;  %2263 = vmatpush.msrb.mxu2 %v3316_v60 }
 0x336   : > { %2911 = vmatmul.msk.f32.gmra.mxu0 %vm780_vm13, %v1950_v17 }
 0x337   : > { %2137 = vmatpush.msrb.mxu1 %v3322_v59  ;;  %2264 = vmatpush.msrb.mxu2 %v3321_v39  ;;  %v4489_v2 = vpop.f32.mrf.mxu0 }
 0x33c   : > { %2819 = vmatmul.msk.f32.gmra.mxu3 %vm918_vm11, %v4334_v51 }
 0x33f   : > { %v4493_v44 = vpop.f32.mrf.mxu0 }
 0x344   : > { %2820 = vmatmul.msk.f32.gmra.mxu3 %vm918_vm11, %v4346_v37 }
 0x348   : > { %v4497_v15 = vpop.f32.mrf.mxu0 }
 0x34c   : > { %2821 = vmatmul.msk.f32.gmra.mxu3 %vm918_vm11, %v4357_v36 }
 0x350   : > { %v4503_v13 = vpop.f32.mrf.mxu0 }
 0x354   : > { %2822 = vmatmul.msk.f32.gmra.mxu3 %vm918_vm11, %v4368_v4 }
 0x357   : > { %v1621_v48 = vpop.f32.mrf.mxu1 }
 0x358   : > { %v1645_v32 = vmul.f32 19.3, %v1621_v48 }
 0x359   : > { %v4507_v51 = vpop.f32.mrf.mxu0 }
 0x35a   : > { %v1653_v14 = vmul.f32 %v1645_v32, %v4231_v30 }
 0x35c   : > { %v1661_v56 = vmul.f32 0.0125, %v1653_v14  ;;  %2823 = vmatmul.msk.f32.gmra.mxu3 %vm918_vm11, %v4377_v16 }
 0x35e   : > { %v1669_v37 = vmax.f32 %v1661_v56, 0.0 }
 0x35f   : > { %v1624_v52 = vpop.f32.mrf.mxu1 }
 0x360   : > { %v1677_v36 = vmin.f32 %v1669_v37, 1.0  ;;  %v1646_v50 = vmul.f32 19.3, %v1624_v52 }
 0x361   : > { %v4512_v17 = vpop.f32.mrf.mxu0 }
 0x362   : > { %v1654_v54 = vmul.f32 %v1646_v50, %v4238_v22  ;;  %v1685_v4 = vmul.f32 %v1677_v36, %v4231_v30 }
 0x364   : > { %v1662_v28 = vmul.f32 0.0125, %v1654_v54  ;;  %1810 = vrot.lane.b32.xlu2 %v1685_v4, %s3610_s21  ;;  %2864 = vmatmul.msk.f32.vlgmr.msra.gmra.mxu2 %vm918_vm11, %v1685_v4 }
 0x366   : > { %v1670_v53 = vmax.f32 %v1662_v28, 0.0 }
 0x368   : > { %v1678_v47 = vmin.f32 %v1670_v53, 1.0 }
 0x369   : > { %v4518_v58 = vpop.f32.mrf.mxu0 }
 0x36a   : > { %v1686_v16 = vmul.f32 %v1678_v47, %v4238_v22 }
 0x36c   : > { %3324 = vrot.lane.b32.xlu2 %v4281_v23, %s3611_s15  ;;  %1812 = vrot.lane.b32.xlu0 %v1686_v16, %s3610_s21  ;;  %s3534_s15 = sshra.s32 %s2572_s9, 4  ;;  %s3535_s15 = int_to_ptr.hbm [resolvable:$true] %s3534_s15 }
 0x36d   : > { %2865 = vmatmul.msk.f32.gmra.mxu2 %vm918_vm11, %v1686_v16  ;;  %s3536_s8 = scalar_lea.hbm %s3535_s15, 64  ;;  %p3541_p12 = scmp.lt.s32.totalorder %s3535_s15, %s4786_s7 }
 0x36e   : > { %p3537_p1 = scmp.ne.s32.totalorder %s3535_s15, %s3536_s8 }
 0x370   : > { %v1627_v62 = vpop.f32.mrf.mxu1  ;;  %p3538_p3 = pnand %p3537_p1, %p3752_p13 }
 0x371   : > { %v1647_v20 = vmul.f32 19.3, %v1627_v62  ;;  %v4526_v1 = vpop.f32.mrf.mxu0 }
 0x372   : > { %p3539_p5 = pneg %p3538_p3 }
 0x373   : > { %v1655_v3 = vmul.f32 %v1647_v20, %v4245_v24 }
 0x375   : > { %v1663_v8 = vmul.f32 0.0125, %v1655_v3 }
 0x377   : > { %v1671_v49 = vmax.f32 %v1663_v8, 0.0 }
 0x378   : > { %v1630_v55 = vpop.f32.mrf.mxu1 }
 0x379   : > { %v1679_v18 = vmin.f32 %v1671_v49, 1.0  ;;  %v1648_v35 = vmul.f32 19.3, %v1630_v55 }
 0x37b   : > { %v1656_v38 = vmul.f32 %v1648_v35, %v4254_v34  ;;  %v2016_v0 = vpop.f32.mrf.mxu0  ;;  %v1687_v23 = vmul.f32 %v1679_v18, %v4245_v24 }
 0x37c   : > { %v2040_v11 = vmul.f32 19.3, %v2016_v0 }
 0x37d   : > { %v1664_v41 = vmul.f32 0.0125, %v1656_v38  ;;  %1814 = vrot.lane.b32.xlu2 %v1687_v23, %s3610_s21  ;;  %2866 = vmatmul.msk.f32.gmra.mxu2 %vm918_vm11, %v1687_v23 }
 0x37e   : > { %v2048_v7 = vmul.f32 %v2040_v11, %v4231_v30 }
 0x37f   : > { %v1672_v27 = vmax.f32 %v1664_v41, 0.0 }
 0x380   : > { %v2056_v33 = vmul.f32 0.0125, %v2048_v7  ;;  %v1633_v29 = vpop.f32.mrf.mxu1 }
 0x381   : > { %v1680_v5 = vmin.f32 %v1672_v27, 1.0  ;;  %v1649_v42 = vmul.f32 19.3, %v1633_v29 }
 0x382   : > { %v2064_v19 = vmax.f32 %v2056_v33, 0.0 }
 0x383   : > { %v1657_v45 = vmul.f32 %v1649_v42, %v4263_v6  ;;  %v2019_v57 = vpop.f32.mrf.mxu0  ;;  %v1688_v60 = vmul.f32 %v1680_v5, %v4254_v34 }
 0x384   : > { %v2072_v59 = vmin.f32 %v2064_v19, 1.0  ;;  %v2041_v39 = vmul.f32 19.3, %v2019_v57 }
 0x385   : > { %v1665_v48 = vmul.f32 0.0125, %v1657_v45  ;;  %2867 = vmatmul.msk.f32.gmra.mxu2 %vm918_vm11, %v1688_v60 }
 0x386   : > { %v2049_v32 = vmul.f32 %v2041_v39, %v4238_v22  ;;  %v4538_v14 = vmul.f32 %v2072_v59, %v4231_v30 }
 0x387   : > { %v1673_v56 = vmax.f32 %v1665_v48, 0.0 }
 0x388   : > { %v2057_v37 = vmul.f32 0.0125, %v2049_v32  ;;  %v1636_v52 = vpop.f32.mrf.mxu1  ;;  %2205 = vrot.lane.b32.xlu1 %v4538_v14, %s3610_s21 }
 0x389   : > { %v1681_v36 = vmin.f32 %v1673_v56, 1.0  ;;  %v1650_v50 = vmul.f32 19.3, %v1636_v52 }
 0x38a   : > { %v2065_v54 = vmax.f32 %v2057_v37, 0.0 }
 0x38b   : > { %v1658_v4 = vmul.f32 %v1650_v50, %v4270_v46  ;;  %v2022_v28 = vpop.f32.mrf.mxu0  ;;  %v1689_v53 = vmul.f32 %v1681_v36, %v4263_v6 }
 0x38c   : > { %v2073_v47 = vmin.f32 %v2065_v54, 1.0  ;;  %v2042_v16 = vmul.f32 19.3, %v2022_v28 }
 0x38d   : > { %v1666_v62 = vmul.f32 0.0125, %v1658_v4  ;;  %2868 = vmatmul.msk.f32.gmra.mxu2 %vm918_vm11, %v1689_v53 }
 0x38e   : > { %v2050_v30 = vmul.f32 %v2042_v16, %v4245_v24  ;;  %v4547_v20 = vmul.f32 %v2073_v47, %v4238_v22 }
 0x38f   : > { %v1674_v3 = vmax.f32 %v1666_v62, 0.0 }
 0x390   : > { %v2058_v8 = vmul.f32 0.0125, %v2050_v30  ;;  %v1639_v49 = vpop.f32.mrf.mxu1  ;;  %2207 = vrot.lane.b32.xlu1 %v4547_v20, %s3610_s21 }
 0x391   : > { %v1682_v55 = vmin.f32 %v1674_v3, 1.0  ;;  %v1651_v18 = vmul.f32 19.3, %v1639_v49 }
 0x392   : > { %v2066_v35 = vmax.f32 %v2058_v8, 0.0 }
 0x393   : > { %v1659_v38 = vmul.f32 %v1651_v18, %v4277_v31  ;;  %v2025_v0 = vpop.f32.mrf.mxu0  ;;  %v1690_v23 = vmul.f32 %v1682_v55, %v4270_v46 }
 0x394   : > { %v2074_v11 = vmin.f32 %v2066_v35, 1.0  ;;  %v2043_v41 = vmul.f32 19.3, %v2025_v0 }
 0x395   : > { %v1667_v7 = vmul.f32 0.0125, %v1659_v38  ;;  %2869 = vmatmul.msk.f32.gmra.mxu2 %vm918_vm11, %v1690_v23 }
 0x396   : > { %v2051_v22 = vmul.f32 %v2043_v41, %v4254_v34  ;;  %v4556_v27 = vmul.f32 %v2074_v11, %v4245_v24  ;;  %v1500_v11 = vmul.f32 19.3, %v4489_v2 }
 0x397   : > { %v1675_v33 = vmax.f32 %v1667_v7, 0.0 }
 0x398   : > { %v2059_v29 = vmul.f32 0.0125, %v2051_v22  ;;  %v1642_v5 = vpop.f32.mrf.mxu1  ;;  %1816 = vrot.lane.b32.xlu1 %v1688_v60, %s3610_s21  ;;  %2209 = vrot.lane.b32.xlu0 %v4556_v27, %s3610_s21 }
 0x399   : > { %v1683_v42 = vmin.f32 %v1675_v33, 1.0  ;;  %v1652_v19 = vmul.f32 19.3, %v1642_v5  ;;  %v1508_v5 = vmul.f32 0.025, %v1500_v11 }
 0x39a   : > { %v2067_v45 = vmax.f32 %v2059_v29, 0.0 }
 0x39b   : > { %v1660_v57 = vmul.f32 %v1652_v19, %v4288_v43  ;;  %v2028_v59 = vpop.f32.mrf.mxu0  ;;  %v1691_v39 = vmul.f32 %v1683_v42, %v4277_v31  ;;  %v2840_v2 = vclamps-f32 %v1508_v5, 1.0 }
 0x39c   : > { %v2075_v48 = vmin.f32 %v2067_v45, 1.0  ;;  %v2044_v32 = vmul.f32 19.3, %v2028_v59  ;;  %v1501_v59 = vmul.f32 19.3, %v4493_v44 }
 0x39d   : > { %v1668_v24 = vmul.f32 0.0125, %v1660_v57  ;;  %2870 = vmatmul.msk.f32.gmra.mxu2 %vm918_vm11, %v1691_v39 }
 0x39e   : > { %v2052_v56 = vmul.f32 %v2044_v32, %v4263_v6  ;;  %v4566_v60 = vmul.f32 %v2075_v48, %v4254_v34 }
 0x39f   : > { %v1676_v37 = vmax.f32 %v1668_v24, 0.0 }
 0x3a0   : > { %v2060_v52 = vmul.f32 0.0125, %v2052_v56  ;;  %1818 = vrot.lane.b32.xlu0 %v1689_v53, %s3610_s21  ;;  %2211 = vrot.lane.b32.xlu2 %v4566_v60, %s3610_s21 }
 0x3a1   : > { %v1684_v36 = vmin.f32 %v1676_v37, 1.0  ;;  %v1509_v37 = vmul.f32 0.025, %v1501_v59 }
 0x3a2   : > { %v2068_v50 = vmax.f32 %v2060_v52, 0.0 }
 0x3a3   : > { %v2031_v54 = vpop.f32.mrf.mxu0  ;;  %v1692_v4 = vmul.f32 %v1684_v36, %v4288_v43  ;;  %v2841_v44 = vclamps-f32 %v1509_v37, 1.0  ;;  %v1507_v37 = vmul.f32 19.3, %v4526_v1 }
 0x3a4   : > { %v2076_v28 = vmin.f32 %v2068_v50, 1.0  ;;  %v2045_v47 = vmul.f32 19.3, %v2031_v54  ;;  %v1502_v50 = vmul.f32 19.3, %v4497_v15 }
 0x3a5   : > { %2871 = vmatmul.msk.f32.gmra.mxu2 %vm918_vm11, %v1692_v4 }
 0x3a6   : > { %v2053_v16 = vmul.f32 %v2045_v47, %v4270_v46  ;;  %v1347_v34 = vpop.f32.mrf.mxu3  ;;  %v4575_v62 = vmul.f32 %v2076_v28, %v4263_v6  ;;  %v1510_v47 = vmul.f32 0.025, %v1502_v50 }
 0x3a7   : > { %v1371_v6 = vmul.f32 19.3, %v1347_v34 }
 0x3a8   : > { %v2061_v30 = vmul.f32 0.0125, %v2053_v16  ;;  %1820 = vrot.lane.b32.xlu2 %v1690_v23, %s3610_s21  ;;  %2213 = vrot.lane.b32.xlu1 %v4575_v62, %s3610_s21 }
 0x3a9   : > { %v1379_v22 = vmul.f32 0.025, %v1371_v6 }
 0x3aa   : > { %v2069_v53 = vmax.f32 %v2061_v30, 0.0 }
 0x3ab   : > { %v2034_v3 = vpop.f32.mrf.mxu0  ;;  %v2824_v19 = vclamps-f32 %v1379_v22, 1.0 }
 0x3ac   : > { %v2077_v8 = vmin.f32 %v2069_v53, 1.0  ;;  %v2046_v49 = vmul.f32 19.3, %v2034_v3  ;;  %v2842_v3 = vclamps-f32 %v1510_v47, 1.0 }
 0x3ad   : > { %v1532_v48 = vadd.f32 %v2840_v2, %v2824_v19  ;;  %v1506_v2 = vmul.f32 19.3, %v4518_v58 }
 0x3ae   : > { %v2054_v55 = vmul.f32 %v2046_v49, %v4277_v31  ;;  %v1350_v18 = vpop.f32.mrf.mxu3  ;;  %v4582_v35 = vmul.f32 %v2077_v8, %v4270_v46  ;;  %v1503_v8 = vmul.f32 19.3, %v4503_v13 }
 0x3af   : > { %v1372_v45 = vmul.f32 19.3, %v1350_v18 }
 0x3b0   : > { %v2062_v38 = vmul.f32 0.0125, %v2054_v55  ;;  %1822 = vrot.lane.b32.xlu1 %v1691_v39, %s3610_s21  ;;  %2215 = vrot.lane.b32.xlu0 %v4582_v35, %s3610_s21  ;;  %v1511_v55 = vmul.f32 0.025, %v1503_v8 }
 0x3b1   : > { %v1380_v32 = vmul.f32 0.025, %v1372_v45 }
 0x3b2   : > { %v2070_v0 = vmax.f32 %v2062_v38, 0.0 }
 0x3b3   : > { %v2037_v23 = vpop.f32.mrf.mxu0  ;;  %v2825_v52 = vclamps-f32 %v1380_v32, 1.0 }
 0x3b4   : > { %v2078_v41 = vmin.f32 %v2070_v0, 1.0  ;;  %v2047_v7 = vmul.f32 19.3, %v2037_v23  ;;  %v2843_v0 = vclamps-f32 %v1511_v55, 1.0  ;;  %v1504_v23 = vmul.f32 19.3, %v4507_v51 }
 0x3b5   : > { %v1533_v54 = vadd.f32 %v2841_v44, %v2825_v52 }
 0x3b6   : > { %v2055_v33 = vmul.f32 %v2047_v7, %v4288_v43  ;;  %v4590_v29 = vmul.f32 %v2078_v41, %v4277_v31  ;;  %v1512_v13 = vmul.f32 0.025, %v1504_v23 }
 0x3b7   : > { %v1353_v46 = vpop.f32.mrf.mxu3 }
 0x3b8   : > { %v2063_v42 = vmul.f32 0.0125, %v2055_v33  ;;  %1824 = vrot.lane.b32.xlu0 %v1692_v4, %s3610_s21  ;;  %2217 = vrot.lane.b32.xlu2 %v4590_v29, %s3610_s21  ;;  %v1373_v36 = vmul.f32 19.3, %v1353_v46  ;;  %v2844_v22 = vclamps-f32 %v1512_v13, 1.0 }
 0x3b9   : > { %v1505_v33 = vmul.f32 19.3, %v4512_v17 }
 0x3ba   : > { %v2071_v57 = vmax.f32 %v2063_v42, 0.0  ;;  %v1381_v4 = vmul.f32 0.025, %v1373_v36 }
 0x3bc   : > { %v2079_v39 = vmin.f32 %v2071_v57, 1.0  ;;  %v2826_v30 = vclamps-f32 %v1381_v4, 1.0 }
 0x3be   : > { %v1811_v24 = vpop.permute.xlu2 %1810  ;;  %v4597_v31 = vmul.f32 %v2079_v39, %v4288_v43  ;;  %v1534_v15 = vadd.f32 %v2842_v3, %v2826_v30 }
 0x3bf   : > { %v1356_v56 = vpop.f32.mrf.mxu3  ;;  %2880 = vmatmul.msk.f32.vlgmr.msra.gmra.mxu3 %vm918_vm11, %v1811_v24 }
 0x3c0   : > { %2338 = vrot.lane.b32.xlu2 %v1532_v48, %s3612_s20  ;;  %2219 = vrot.lane.b32.xlu1 %v4597_v31, %s3610_s21  ;;  %v1374_v53 = vmul.f32 19.3, %v1356_v56  ;;  %v1514_v48 = vmul.f32 0.025, %v1506_v2  ;;  %s2557_s21 = scalar_lea.sflag [#allocation4], %s3786_s16 }
 0x3c2   : > { %v1382_v49 = vmul.f32 0.025, %v1374_v53  ;;  %v2846_v56 = vclamps-f32 %v1514_v48, 1.0 }
 0x3c4   : > { %v2827_v18 = vclamps-f32 %v1382_v49, 1.0 }
 0x3c6   : > { %v3325_v28 = vpop.permute.xlu2 %3324  ;;  %v1535_v11 = vadd.f32 %v2843_v0, %v2827_v18 }
 0x3c7   : > { %v3326_v43 = vunpack.i.l.bf16 %v3325_v28  ;;  %v3327_v16 = vunpack.i.h.bf16 %v3325_v28  ;;  %v1359_v34 = vpop.f32.mrf.mxu3 }
 0x3c8   : > { %2340 = vrot.lane.b32.xlu2 %v1533_v54, %s3612_s20  ;;  %v1375_v38 = vmul.f32 19.3, %v1359_v34 }
 0x3c9   : > { %2138 = vmatpush.msrb.mxu1 %v3326_v43 }
 0x3ca   : > { %v1383_v41 = vmul.f32 0.025, %v1375_v38 }
 0x3cb   : > { %2139 = vmatpush.msrb.mxu1 %v3327_v16 }
 0x3cc   : > { %2912 = vmatmul.msk.f32.vlgmr.msrb.gmra.mxu1 %vm918_vm11, %v4538_v14  ;;  %v2828_v14 = vclamps-f32 %v1383_v41, 1.0 }
 0x3ce   : > { %v1536_v5 = vadd.f32 %v2844_v22, %v2828_v14 }
 0x3cf   : > { %v1362_v6 = vpop.f32.mrf.mxu3 }
 0x3d0   : > { %2342 = vrot.lane.b32.xlu2 %v1534_v15, %s3612_s20  ;;  %v1376_v7 = vmul.f32 19.3, %v1362_v6 }
 0x3d2   : > { %v1384_v42 = vmul.f32 0.025, %v1376_v7 }
 0x3d4   : > { %2913 = vmatmul.msk.f32.gmra.mxu1 %vm918_vm11, %v4547_v20  ;;  %v1513_v20 = vmul.f32 0.025, %v1505_v33  ;;  %v2829_v19 = vclamps-f32 %v1384_v42, 1.0 }
 0x3d6   : > { %v2845_v57 = vclamps-f32 %v1513_v20, 1.0 }
 0x3d7   : > { %v1365_v46 = vpop.f32.mrf.mxu3 }
 0x3d8   : > { %2344 = vrot.lane.b32.xlu2 %v1535_v11, %s3612_s20  ;;  %v1377_v45 = vmul.f32 19.3, %v1365_v46  ;;  %v1537_v17 = vadd.f32 %v2845_v57, %v2829_v19 }
 0x3da   : > { %v1385_v59 = vmul.f32 0.025, %v1377_v45 }
 0x3dc   : > { %2914 = vmatmul.msk.f32.gmra.mxu1 %vm918_vm11, %v4556_v27  ;;  %v1815_v27 = vpop.permute.xlu2 %1814  ;;  %v2830_v32 = vclamps-f32 %v1385_v59, 1.0 }
 0x3de   : > { %v1813_v51 = vpop.permute.xlu0 %1812  ;;  %v1538_v58 = vadd.f32 %v2846_v56, %v2830_v32 }
 0x3df   : > { %2881 = vmatmul.msk.f32.gmra.mxu3 %vm918_vm11, %v1813_v51  ;;  %v1368_v39 = vpop.f32.mrf.mxu3 }
 0x3e0   : > { %2346 = vrot.lane.b32.xlu2 %v1536_v5, %s3612_s20  ;;  %v1378_v24 = vmul.f32 19.3, %v1368_v39 }
 0x3e2   : > { %v1386_v52 = vmul.f32 0.025, %v1378_v24 }
 0x3e4   : > { %2915 = vmatmul.msk.f32.gmra.mxu1 %vm918_vm11, %v4566_v60  ;;  %v1515_v60 = vmul.f32 0.025, %v1507_v37  ;;  %v2831_v36 = vclamps-f32 %v1386_v52, 1.0 }
 0x3e6   : > { %v2847_v44 = vclamps-f32 %v1515_v60, 1.0 }
 0x3e7   : > { %2882 = vmatmul.msk.f32.gmra.mxu3 %vm918_vm11, %v1815_v27  ;;  %v1746_v30 = vpop.f32.mrf.mxu2 }
 0x3e8   : > { %2348 = vrot.lane.b32.xlu2 %v1537_v17, %s3612_s20  ;;  %v1539_v50 = vadd.f32 %v2847_v44, %v2831_v36  ;;  %v1770_v8 = vmul.f32 19.3, %v1746_v30 }
 0x3ea   : > { %v1778_v49 = vmul.f32 0.025, %v1770_v8 }
 0x3ec   : > { %2916 = vmatmul.msk.f32.gmra.mxu1 %vm918_vm11, %v4575_v62  ;;  %v2872_v6 = vclamps-f32 %v1778_v49, 1.0 }
 0x3f0   : > { %2350 = vrot.lane.b32.xlu2 %v1538_v58, %s3612_s20  ;;  %v1749_v3 = vpop.f32.mrf.mxu2 }
 0x3f1   : > { %v1771_v13 = vmul.f32 19.3, %v1749_v3 }
 0x3f3   : > { %v1779_v22 = vmul.f32 0.025, %v1771_v13 }
 0x3f4   : > { %2917 = vmatmul.msk.f32.gmra.mxu1 %vm918_vm11, %v4582_v35 }
 0x3f5   : > { %v2873_v5 = vclamps-f32 %v1779_v22, 1.0 }
 0x3f8   : > { %2352 = vrot.lane.b32.xlu2 %v1539_v50, %s3612_s20 }
 0x3fa   : > { %v2206_v54 = vpop.permute.xlu1 %2205  ;;  %v2212_v35 = vpop.permute.xlu2 %2211 }
 0x3fb   : > { %2928 = vmatmul.msk.f32.vlgmr.msrb.gmra.mxu2 %vm918_vm11, %v2206_v54 }
 0x3fc   : > { %2918 = vmatmul.msk.f32.gmra.mxu1 %vm918_vm11, %v4590_v29 }
 0x400   : > { %v1752_v18 = vpop.f32.mrf.mxu2 }
 0x401   : > { %v1772_v42 = vmul.f32 19.3, %v1752_v18 }
 0x402   : > { %v2208_v1 = vpop.permute.xlu1 %2207  ;;  %v1821_v43 = vpop.permute.xlu2 %1820 }
 0x403   : > { %2929 = vmatmul.msk.f32.gmra.mxu2 %vm918_vm11, %v2208_v1  ;;  %v1780_v57 = vmul.f32 0.025, %v1772_v42 }
 0x404   : > { %2919 = vmatmul.msk.f32.gmra.mxu1 %vm918_vm11, %v4597_v31 }
 0x405   : > { %v2874_v27 = vclamps-f32 %v1780_v57, 1.0 }
 0x408   : > { %v1755_v11 = vpop.f32.mrf.mxu2 }
 0x40a   : > { %v1817_v62 = vpop.permute.xlu1 %1816  ;;  %v2210_v4 = vpop.permute.xlu0 %2209 }
 0x40b   : > { %2883 = vmatmul.msk.f32.gmra.mxu3 %vm918_vm11, %v1817_v62  ;;  %2930 = vmatmul.msk.f32.gmra.mxu2 %vm918_vm11, %v2210_v4 }
 0x410   : > { %v1758_v41 = vpop.f32.mrf.mxu2 }
 0x412   : > { %v1819_v28 = vpop.permute.xlu0 %1818  ;;  %v2218_v16 = vpop.permute.xlu2 %2217 }
 0x413   : > { %2884 = vmatmul.msk.f32.gmra.mxu3 %vm918_vm11, %v1819_v28  ;;  %2931 = vmatmul.msk.f32.gmra.mxu2 %vm918_vm11, %v2212_v35 }
 0x418   : > { %v4648_v14 = vpop.f32.mrf.mxu2 }
 0x41a   : > { %v2214_v29 = vpop.permute.xlu1 %2213 }
 0x41b   : > { %2885 = vmatmul.msk.f32.gmra.mxu3 %vm918_vm11, %v1821_v43  ;;  %2932 = vmatmul.msk.f32.gmra.mxu2 %vm918_vm11, %v2214_v29  ;;  %v1773_v29 = vmul.f32 19.3, %v1755_v11 }
 0x41d   : > { %v1781_v30 = vmul.f32 0.025, %v1773_v29 }
 0x420   : > { %v4651_v17 = vpop.f32.mrf.mxu2 }
 0x422   : > { %v1823_v47 = vpop.permute.xlu1 %1822  ;;  %v2216_v31 = vpop.permute.xlu0 %2215 }
 0x423   : > { %2886 = vmatmul.msk.f32.gmra.mxu3 %vm918_vm11, %v1823_v47  ;;  %2933 = vmatmul.msk.f32.gmra.mxu2 %vm918_vm11, %v2216_v31 }
 0x428   : > { %v4654_v24 = vpop.f32.mrf.mxu2 }
 0x42a   : > { %v1825_v34 = vpop.permute.xlu0 %1824 }
 0x42b   : > { %2887 = vmatmul.msk.f32.gmra.mxu3 %vm918_vm11, %v1825_v34  ;;  %2934 = vmatmul.msk.f32.gmra.mxu2 %vm918_vm11, %v2218_v16 }
 0x432   : > { %v2220_v53 = vpop.permute.xlu1 %2219 }
 0x433   : > { %2935 = vmatmul.msk.f32.gmra.mxu2 %vm918_vm11, %v2220_v53 }
 0x442   : > { %v1871_v15 = vpop.f32.mrf.mxu3 }
 0x443   : > { %v1895_v55 = vmul.f32 19.3, %v1871_v15 }
 0x445   : > { %v1903_v38 = vmul.f32 0.025, %v1895_v55 }
 0x447   : > { %v2888_v0 = vclamps-f32 %v1903_v38, 1.0 }
 0x449   : > { %v1927_v23 = vadd.f32 %v2888_v0, %v2872_v6  ;;  %v2141_v20 = vpop.f32.mrf.mxu1  ;;  %v2875_v6 = vclamps-f32 %v1781_v30, 1.0  ;;  %v1774_v0 = vmul.f32 19.3, %v1758_v41  ;;  %v1775_v41 = vmul.f32 19.3, %v4648_v14 }
 0x44a   : > { %v2165_v56 = vmul.f32 19.3, %v2141_v20 }
 0x44b   : > { %2370 = vrot.lane.b32.xlu0 %v1927_v23, %s3613_s10 }
 0x44c   : > { %v2173_v52 = vmul.f32 0.025, %v2165_v56 }
 0x44e   : > { %v2920_v44 = vclamps-f32 %v2173_v52, 1.0 }
 0x451   : > { %v2144_v32 = vpop.f32.mrf.mxu1 }
 0x452   : > { %v2166_v50 = vmul.f32 19.3, %v2144_v32 }
 0x454   : > { %v2174_v4 = vmul.f32 0.025, %v2166_v50 }
 0x456   : > { %v2921_v47 = vclamps-f32 %v2174_v4, 1.0  ;;  %v1776_v4 = vmul.f32 19.3, %v4651_v17 }
 0x459   : > { %v2147_v37 = vpop.f32.mrf.mxu1 }
 0x45a   : > { %v2167_v31 = vmul.f32 19.3, %v2147_v37 }
 0x45c   : > { %v2175_v8 = vmul.f32 0.025, %v2167_v31 }
 0x45e   : > { %v2922_v23 = vclamps-f32 %v2175_v8, 1.0 }
 0x461   : > { %v2150_v35 = vpop.f32.mrf.mxu1 }
 0x462   : > { %v1874_v7 = vpop.f32.mrf.mxu3  ;;  %v2168_v13 = vmul.f32 19.3, %v2150_v35 }
 0x463   : > { %v1896_v33 = vmul.f32 19.3, %v1874_v7 }
 0x465   : > { %v1904_v46 = vmul.f32 0.025, %v1896_v33 }
 0x467   : > { %v2889_v51 = vclamps-f32 %v1904_v46, 1.0  ;;  %v1782_v46 = vmul.f32 0.025, %v1774_v0 }
 0x469   : > { %v1928_v19 = vadd.f32 %v2889_v51, %v2873_v5  ;;  %v2153_v55 = vpop.f32.mrf.mxu1  ;;  %v2176_v51 = vmul.f32 0.025, %v2168_v13 }
 0x46a   : > { %v1877_v45 = vpop.f32.mrf.mxu3 }
 0x46b   : > { %v1897_v2 = vmul.f32 19.3, %v1877_v45  ;;  %2372 = vrot.lane.b32.xlu0 %v1928_v19, %s3613_s10 }
 0x46d   : > { %v1905_v59 = vmul.f32 0.025, %v1897_v2  ;;  %v2169_v2 = vmul.f32 19.3, %v2153_v55 }
 0x46f   : > { %v2890_v39 = vclamps-f32 %v1905_v59, 1.0  ;;  %v2876_v59 = vclamps-f32 %v1782_v46, 1.0  ;;  %v2177_v52 = vmul.f32 0.025, %v2169_v2 }
 0x471   : > { %v1929_v48 = vadd.f32 %v2890_v39, %v2874_v27  ;;  %v2923_v27 = vclamps-f32 %v2176_v51, 1.0  ;;  %v2156_v39 = vpop.f32.mrf.mxu1  ;;  %v2924_v35 = vclamps-f32 %v2177_v52, 1.0 }
 0x473   : > { %2374 = vrot.lane.b32.xlu0 %v1929_v48, %s3613_s10 }
 0x47e   : > { %v2266_v58 = vpop.f32.mrf.mxu2 }
 0x47f   : > { %v2290_v60 = vmul.f32 19.3, %v2266_v58  ;;  %v1783_v58 = vmul.f32 0.025, %v1775_v41 }
 0x481   : > { %v2298_v36 = vmul.f32 0.025, %v2290_v60 }
 0x483   : > { %v2936_v54 = vclamps-f32 %v2298_v36, 1.0 }
 0x485   : > { %v2322_v1 = vadd.f32 %v2936_v54, %v2920_v44  ;;  %v2478_v54 = vld [vmem:[#allocation8 + $0x38] sm:$0xff] }
 0x486   : > { %v2269_v62 = vpop.f32.mrf.mxu2  ;;  %2515 = vmatpush.msrb.mxu3 %v2478_v54  ;;  %v2473_v54 = vld [vmem:[#allocation8 + $0x10] sm:$0xff] }
 0x487   : > { %v2291_v28 = vmul.f32 19.3, %v2269_v62  ;;  %2402 = vrot.lane.b32.xlu1 %v2322_v1, %s3614_s23  ;;  %v2877_v62 = vclamps-f32 %v1783_v58, 1.0 }
 0x489   : > { %v2299_v43 = vmul.f32 0.025, %v2291_v28  ;;  %v2170_v28 = vmul.f32 19.3, %v2156_v39 }
 0x48b   : > { %v2937_v16 = vclamps-f32 %v2299_v43, 1.0 }
 0x48d   : > { %v2323_v34 = vadd.f32 %v2937_v16, %v2921_v47  ;;  %v2159_v47 = vpop.f32.mrf.mxu1 }
 0x48e   : > { %v1880_v53 = vpop.f32.mrf.mxu3  ;;  %v2272_v3 = vpop.f32.mrf.mxu2 }
 0x48f   : > { %v1898_v15 = vmul.f32 19.3, %v1880_v53  ;;  %v2292_v49 = vmul.f32 19.3, %v2272_v3  ;;  %2404 = vrot.lane.b32.xlu1 %v2323_v34, %s3614_s23  ;;  %v1784_v34 = vmul.f32 0.025, %v1776_v4 }
 0x490   : > { %v2178_v3 = vmul.f32 0.025, %v2170_v28 }
 0x491   : > { %v1906_v18 = vmul.f32 0.025, %v1898_v15  ;;  %v2300_v38 = vmul.f32 0.025, %v2292_v49  ;;  %v2878_v17 = vclamps-f32 %v1784_v34, 1.0 }
 0x493   : > { %v2891_v11 = vclamps-f32 %v1906_v18, 1.0  ;;  %v2938_v7 = vclamps-f32 %v2300_v38, 1.0  ;;  %v1777_v18 = vmul.f32 19.3, %v4654_v24  ;;  %v2925_v38 = vclamps-f32 %v2178_v3, 1.0 }
 0x495   : > { %v1930_v22 = vadd.f32 %v2891_v11, %v2875_v6  ;;  %v2324_v33 = vadd.f32 %v2938_v7, %v2922_v23  ;;  %v2171_v6 = vmul.f32 19.3, %v2159_v47  ;;  %v1785_v7 = vmul.f32 0.025, %v1777_v18  ;;  %v2162_v51 = vpop.f32.mrf.mxu1 }
 0x496   : > { %v1883_v5 = vpop.f32.mrf.mxu3  ;;  %v2275_v42 = vpop.f32.mrf.mxu2 }
 0x497   : > { %v1899_v20 = vmul.f32 19.3, %v1883_v5  ;;  %v2293_v19 = vmul.f32 19.3, %v2275_v42  ;;  %2376 = vrot.lane.b32.xlu0 %v1930_v22, %s3613_s10  ;;  %2406 = vrot.lane.b32.xlu1 %v2324_v33, %s3614_s23  ;;  %v2179_v46 = vmul.f32 0.025, %v2171_v6 }
 0x498   : > { %v2879_v24 = vclamps-f32 %v1785_v7, 1.0 }
 0x499   : > { %v1907_v45 = vmul.f32 0.025, %v1899_v20  ;;  %v2301_v57 = vmul.f32 0.025, %v2293_v19 }
 0x49b   : > { %v2892_v48 = vclamps-f32 %v1907_v45, 1.0  ;;  %v2939_v32 = vclamps-f32 %v2301_v57, 1.0  ;;  %v2926_v45 = vclamps-f32 %v2179_v46, 1.0  ;;  %v2172_v57 = vmul.f32 19.3, %v2162_v51 }
 0x49d   : > { %v1931_v56 = vadd.f32 %v2892_v48, %v2876_v59  ;;  %v2325_v37 = vadd.f32 %v2939_v32, %v2923_v27  ;;  %v2180_v48 = vmul.f32 0.025, %v2172_v57 }
 0x49e   : > { %v1886_v60 = vpop.f32.mrf.mxu3  ;;  %v2278_v36 = vpop.f32.mrf.mxu2 }
 0x49f   : > { %v1900_v44 = vmul.f32 19.3, %v1886_v60  ;;  %v2294_v50 = vmul.f32 19.3, %v2278_v36  ;;  %2378 = vrot.lane.b32.xlu0 %v1931_v56, %s3613_s10  ;;  %2408 = vrot.lane.b32.xlu1 %v2325_v37, %s3614_s23  ;;  %v2927_v37 = vclamps-f32 %v2180_v48, 1.0  ;;  %v2477_v60 = vld [vmem:[#allocation8 + $0x30] sm:$0xff] }
 0x4a0   : > { %2516 = vmatpush.msrb.mxu3 %v2477_v60  ;;  %v2476_v36 = vld [vmem:[#allocation8 + $0x28] sm:$0xff] }
 0x4a1   : > { %v1908_v14 = vmul.f32 0.025, %v1900_v44  ;;  %v2302_v1 = vmul.f32 0.025, %v2294_v50  ;;  %v2475_v44 = vld [vmem:[#allocation8 + $0x20] sm:$0xff]  ;;  %v2474_v50 = vld [vmem:[#allocation8 + $0x18] sm:$0xff] }
 0x4a2   : > { %2517 = vmatpush.msrb.mxu3 %v2476_v36 }
 0x4a3   : > { %v2893_v43 = vclamps-f32 %v1908_v14, 1.0  ;;  %v2940_v29 = vclamps-f32 %v2302_v1, 1.0  ;;  %v2472_v14 = vld [vmem:[#allocation8 + $0x8] sm:$0xff]  ;;  %v2471_v1 = vld [vmem:[#allocation8] sm:$0xff] }
 0x4a4   : > { %2518 = vmatpush.msrb.mxu3 %v2475_v44 }
 0x4a5   : > { %v1932_v31 = vadd.f32 %v2893_v43, %v2877_v62  ;;  %v2326_v16 = vadd.f32 %v2940_v29, %v2924_v35  ;;  %v2339_v62 = vpop.permute.xlu2 %2338  ;;  %v4672_v43 = vld [vmem:[#allocation11 + $0x6] ss:$0 sm:$0xff] }
 0x4a6   : > { %v1889_v30 = vpop.f32.mrf.mxu3  ;;  %v2281_v53 = vpop.f32.mrf.mxu2  ;;  %2519 = vmatpush.msrb.mxu3 %v2474_v50  ;;  %v2426_v29 = vsel %vm780_vm13, %v4434_v21, %v2339_v62 }
 0x4a7   : > { %v1901_v8 = vmul.f32 19.3, %v1889_v30  ;;  %v2295_v15 = vmul.f32 19.3, %v2281_v53  ;;  %2380 = vrot.lane.b32.xlu0 %v1932_v31, %s3613_s10  ;;  %2410 = vrot.lane.b32.xlu1 %v2326_v16, %s3614_s23  ;;  %v4677_v31 = vld [vmem:[#allocation11 + $0x7] ss:$0 sm:$0xff] }
 0x4a8   : > { %2520 = vmatpush.msrb.mxu3 %v2473_v54 }
 0x4a9   : > { %v1909_v49 = vmul.f32 0.025, %v1901_v8  ;;  %v2303_v55 = vmul.f32 0.025, %v2295_v15 }
 0x4aa   : > { %2521 = vmatpush.msrb.mxu3 %v2472_v14 }
 0x4ab   : > { %v2894_v0 = vclamps-f32 %v1909_v49, 1.0  ;;  %v2941_v23 = vclamps-f32 %v2303_v55, 1.0 }
 0x4ac   : > { %2522 = vmatpush.msrb.mxu3 %v2471_v1 }
 0x4ad   : > { %v1933_v13 = vadd.f32 %v2894_v0, %v2878_v17  ;;  %v2327_v11 = vadd.f32 %v2941_v23, %v2925_v38  ;;  %v2341_v35 = vpop.permute.xlu2 %2340 }
 0x4ae   : > { %v1892_v22 = vpop.f32.mrf.mxu3  ;;  %v2284_v33 = vpop.f32.mrf.mxu2  ;;  %v2427_v8 = vsel %vm780_vm13, %v4438_v61, %v2341_v35 }
 0x4af   : > { %v1902_v5 = vmul.f32 19.3, %v1892_v22  ;;  %v2296_v42 = vmul.f32 19.3, %v2284_v33  ;;  %2382 = vrot.lane.b32.xlu0 %v1933_v13, %s3613_s10  ;;  %2412 = vrot.lane.b32.xlu1 %v2327_v11, %s3614_s23 }
 0x4b1   : > { %v1910_v20 = vmul.f32 0.025, %v1902_v5  ;;  %v2304_v19 = vmul.f32 0.025, %v2296_v42 }
 0x4b3   : > { %v2895_v41 = vclamps-f32 %v1910_v20, 1.0  ;;  %v2942_v2 = vclamps-f32 %v2304_v19, 1.0 }
 0x4b5   : > { %v1934_v59 = vadd.f32 %v2895_v41, %v2879_v24  ;;  %v2328_v27 = vadd.f32 %v2942_v2, %v2926_v45  ;;  %v2343_v30 = vpop.permute.xlu2 %2342 }
 0x4b6   : > { %v2287_v39 = vpop.f32.mrf.mxu2  ;;  %v2428_v6 = vsel %vm780_vm13, %v4441_v10, %v2343_v30 }
 0x4b7   : > { %v2297_v32 = vmul.f32 19.3, %v2287_v39  ;;  %2384 = vrot.lane.b32.xlu0 %v1934_v59, %s3613_s10  ;;  %2414 = vrot.lane.b32.xlu1 %v2328_v27, %s3614_s23 }
 0x4b9   : > { %v2305_v56 = vmul.f32 0.025, %v2297_v32 }
 0x4bb   : > { %v2943_v58 = vclamps-f32 %v2305_v56, 1.0 }
 0x4bd   : > { %v2329_v52 = vadd.f32 %v2943_v58, %v2927_v37  ;;  %v2371_v4 = vpop.permute.xlu0 %2370  ;;  %v2345_v18 = vpop.permute.xlu2 %2344  ;;  %v991_v58 = vmul.f32 19.3, %v4484_v26 }
 0x4be   : > { %v2434_v47 = vsel %vm918_vm11, %v2426_v29, %v2371_v4  ;;  %v2429_v33 = vsel %vm780_vm13, %v4446_v25, %v2345_v18 }
 0x4bf   : > { %2416 = vrot.lane.b32.xlu1 %v2329_v52, %s3614_s23  ;;  %v999_v44 = vmul.f32 0.025, %v991_v58  ;;  %s3540_s23 = scalar_lea.hbm %s4786_s7, 128 }
 0x4c0   : > { %p3542_p8 = scmp.lt.s32.totalorder %s3540_s23, %s3536_s8 }
 0x4c1   : > { %v2783_v62 = vclamps-f32 %v999_v44, 1.0 }
 0x4c2   : > { %p3543_p7 = por %p3542_p8, %p3541_p12 }
 0x4c4   : > { %p3544_p9 = pnand %p3543_p7, %p3539_p5 }
 0x4c5   : > { %v2347_v22 = vpop.permute.xlu2 %2346 }
 0x4c6   : > { %v2430_v19 = vsel %vm780_vm13, %v4451_v12, %v2347_v22  ;;  %v1104_v12 = vmul.f32 19.3, %v4501_v63 }
 0x4c8   : > { %v1112_v36 = vmul.f32 0.025, %v1104_v12 }
 0x4ca   : > { %v2799_v54 = vclamps-f32 %v1112_v36, 1.0 }
 0x4cc   : > { %v1136_v35 = vadd.f32 %v2799_v54, %v2783_v62 }
 0x4cd   : > { %v2349_v24 = vpop.permute.xlu2 %2348 }
 0x4ce   : > { %v2431_v27 = vsel %vm780_vm13, %v4457_v40, %v2349_v24 }
 0x4d5   : > { %v2351_v56 = vpop.permute.xlu2 %2350 }
 0x4d6   : > { %v2432_v40 = vsel %vm780_vm13, %v4462_v9, %v2351_v56 }
 0x4dd   : > { %v2373_v28 = vpop.permute.xlu0 %2372  ;;  %v2353_v26 = vpop.permute.xlu2 %2352 }
 0x4de   : > { %v2435_v15 = vsel %vm918_vm11, %v2427_v8, %v2373_v28  ;;  %v2433_v29 = vsel %vm780_vm13, %v1136_v35, %v2353_v26 }
 0x4e5   : > { %v2375_v21 = vpop.permute.xlu0 %2374 }
 0x4e6   : > { %v2436_v0 = vsel %vm918_vm11, %v2428_v6, %v2375_v21 }
 0x4f9   : > { %v2403_v16 = vpop.permute.xlu1 %2402 }
 0x4fa   : > { %v2443_v34 = vsel %vm2442_vm12, %v2434_v47, %v2403_v16 }
 0x4fb   : > { %v2453_v53 = vmul.f32 %v4672_v43, %v2443_v34 }
 0x4fd   : > { %v2463_v3 = vadd.f32 %v4677_v31, %v2453_v53  ;;  %v3339_v53 = vld [vmem:[%s4783_s4] ss:$0 sm:$0xff] }
 0x4ff   : > { %2944 = vmatmul.msk.f32.vlgmr.msrb.gmra.mxu3 %vm408_vm0, %v2463_v3 }
 0x501   : > { %v2405_v49 = vpop.permute.xlu1 %2404 }
 0x502   : > { %v2444_v55 = vsel %vm2442_vm12, %v2435_v15, %v2405_v49 }
 0x503   : > { %v2454_v17 = vmul.f32 %v4672_v43, %v2444_v55 }
 0x505   : > { %v2464_v38 = vadd.f32 %v4677_v31, %v2454_v17 }
 0x507   : > { %2945 = vmatmul.msk.f32.gmra.mxu3 %vm408_vm0, %v2464_v38 }
 0x509   : > { %v2377_v23 = vpop.permute.xlu0 %2376  ;;  %v2407_v61 = vpop.permute.xlu1 %2406 }
 0x50a   : > { %v2445_v13 = vsel %vm2442_vm12, %v2436_v0, %v2407_v61  ;;  %v2437_v46 = vsel %vm918_vm11, %v2429_v33, %v2377_v23 }
 0x50b   : > { %v2455_v11 = vmul.f32 %v4672_v43, %v2445_v13 }
 0x50d   : > { %v2465_v7 = vadd.f32 %v4677_v31, %v2455_v11 }
 0x50f   : > { %2946 = vmatmul.msk.f32.gmra.mxu3 %vm408_vm0, %v2465_v7 }
 0x511   : > { %v2379_v5 = vpop.permute.xlu0 %2378  ;;  %v2409_v10 = vpop.permute.xlu1 %2408 }
 0x512   : > { %v2446_v42 = vsel %vm2442_vm12, %v2437_v46, %v2409_v10  ;;  %v2438_v45 = vsel %vm918_vm11, %v2430_v19, %v2379_v5 }
 0x513   : > { %v2456_v51 = vmul.f32 %v4672_v43, %v2446_v42 }
 0x515   : > { %v2466_v20 = vadd.f32 %v4677_v31, %v2456_v51 }
 0x517   : > { %2947 = vmatmul.msk.f32.gmra.mxu3 %vm408_vm0, %v2466_v20 }
 0x519   : > { %v2411_v57 = vpop.permute.xlu1 %2410  ;;  %v2381_v25 = vpop.permute.xlu0 %2380 }
 0x51a   : > { %v2447_v41 = vsel %vm2442_vm12, %v2438_v45, %v2411_v57  ;;  %v2439_v39 = vsel %vm918_vm11, %v2431_v27, %v2381_v25 }
 0x51b   : > { %v2457_v2 = vmul.f32 %v4672_v43, %v2447_v41 }
 0x51d   : > { %v2467_v59 = vadd.f32 %v4677_v31, %v2457_v2 }
 0x51f   : > { %2948 = vmatmul.msk.f32.gmra.mxu3 %vm408_vm0, %v2467_v59 }
 0x521   : > { %v2413_v48 = vpop.permute.xlu1 %2412  ;;  %v2383_v52 = vpop.permute.xlu0 %2382 }
 0x522   : > { %v2448_v32 = vsel %vm2442_vm12, %v2439_v39, %v2413_v48  ;;  %v2440_v50 = vsel %vm918_vm11, %v2432_v40, %v2383_v52 }
 0x523   : > { %v2458_v37 = vmul.f32 %v4672_v43, %v2448_v32 }
 0x525   : > { %v2468_v60 = vadd.f32 %v4677_v31, %v2458_v37 }
 0x527   : > { %2949 = vmatmul.msk.f32.gmra.mxu3 %vm408_vm0, %v2468_v60 }
 0x529   : > { %v2415_v63 = vpop.permute.xlu1 %2414  ;;  %v2385_v28 = vpop.permute.xlu0 %2384 }
 0x52a   : > { %v2449_v14 = vsel %vm2442_vm12, %v2440_v50, %v2415_v63  ;;  %v2441_v9 = vsel %vm918_vm11, %v2433_v29, %v2385_v28 }
 0x52b   : > { %v2459_v1 = vmul.f32 %v4672_v43, %v2449_v14 }
 0x52d   : > { %v2469_v4 = vadd.f32 %v4677_v31, %v2459_v1 }
 0x52f   : > { %2950 = vmatmul.msk.f32.gmra.mxu3 %vm408_vm0, %v2469_v4 }
 0x531   : > { %v2417_v47 = vpop.permute.xlu1 %2416 }
 0x532   : > { %v2450_v16 = vsel %vm2442_vm12, %v2441_v9, %v2417_v47 }
 0x533   : > { %v2460_v34 = vmul.f32 %v4672_v43, %v2450_v16 }
 0x535   : > { %v2470_v30 = vadd.f32 %v4677_v31, %v2460_v34 }
 0x537   : > { %2951 = vmatmul.msk.f32.gmra.mxu3 %vm408_vm0, %v2470_v30 }
 0x582   : > { %v2524_v3 = vpop.f32.mrf.mxu3 }
 0x583   : > { %v2525_v8 = vadd.f32 %v3339_v53, %v2524_v3 }
 0x585   : > { %2548 = vst.msk [vmem:[%s379_s18] sm:$0xff] %vm408_vm0, %v2525_v8 }
 0x58a   : > { %v2527_v15 = vpop.f32.mrf.mxu3 }
 0x58b   : > { %v2528_v21 = vadd.f32 %v3339_v53, %v2527_v15 }
 0x58d   : > { %2549 = vst.msk [vmem:[%s379_s18 + $0x8] sm:$0xff] %vm408_vm0, %v2528_v21 }
 0x592   : > { %v2530_v43 = vpop.f32.mrf.mxu3 }
 0x593   : > { %v2531_v49 = vadd.f32 %v3339_v53, %v2530_v43 }
 0x595   : > { %2550 = vst.msk [vmem:[%s379_s18 + $0x10] sm:$0xff] %vm408_vm0, %v2531_v49 }
 0x59a   : > { %v2533_v31 = vpop.f32.mrf.mxu3 }
 0x59b   : > { %v2534_v55 = vadd.f32 %v3339_v53, %v2533_v31 }
 0x59d   : > { %2551 = vst.msk [vmem:[%s379_s18 + $0x18] sm:$0xff] %vm408_vm0, %v2534_v55 }
 0x5a2   : > { %v2536_v17 = vpop.f32.mrf.mxu3 }
 0x5a3   : > { %v2537_v18 = vadd.f32 %v3339_v53, %v2536_v17 }
 0x5a5   : > { %2552 = vst.msk [vmem:[%s379_s18 + $0x20] sm:$0xff] %vm408_vm0, %v2537_v18 }
 0x5aa   : > { %v2539_v38 = vpop.f32.mrf.mxu3 }
 0x5ab   : > { %v2540_v6 = vadd.f32 %v3339_v53, %v2539_v38 }
 0x5ad   : > { %2553 = vst.msk [vmem:[%s379_s18 + $0x28] sm:$0xff] %vm408_vm0, %v2540_v6 }
 0x5b2   : > { %v2542_v0 = vpop.f32.mrf.mxu3 }
 0x5b3   : > { %v2543_v23 = vadd.f32 %v3339_v53, %v2542_v0 }
 0x5b5   : > { %2554 = vst.msk [vmem:[%s379_s18 + $0x30] sm:$0xff] %vm408_vm0, %v2543_v23 }
 0x5ba   : > { %v2545_v61 = vpop.f32.mrf.mxu3 }
 0x5bb   : > { %v2546_v13 = vadd.f32 %v3339_v53, %v2545_v61 }
 0x5bd   : > { %2555 = vst.msk [vmem:[%s379_s18 + $0x38] sm:$0xff] %vm408_vm0, %v2546_v13 }
 0x5be   : > { %3547 = shalt.err (!%p3544_p9)
}
 0x5bf   : > { %s3615_s16 = smov 128   ;;  %s3616_s18 = smov 8  }
 0x5c0   : > { %3181 = dma.vmem_to_hbm [thread:$0]  (%p3752_p13), %s2570_s17, 1024, %s2572_s9, %s2557_s21, %s3615_s16, %s3615_s16, %s3616_s18  }
 0x5c1 PF: > { %s2586_s30 = sand.u32 1, %s3586_s24   ;;  %p4813_p10 = scmp.ge.s32.totalorder %s3598_s27, 2 }
 0x5c2   : > { %s2587_s29 = scalar_lea.sflag [#allocation4], %s2586_s30 }
 0x5c3   : > { %p3204_p11 = pnand %p4813_p10, %p3757_p4 }
 0x5c5   : > { %p3205_p0 = pneg %p3204_p11 }
 0x5c7   : > { %3581 = dma.done.wait (%p3205_p0), %s2587_s29, 1024  }
 0x5c8   : > { %3583 = vsyncadd (%p3205_p0), %s2587_s29, 4294966272  ;;  %p23_p2 = scmp.ge.s32.totalorder %s3732_s28, 4   ;;  %s4814_s24 = smov %s3590_s25 }
 0x5c9   : > { %s4815_s25 = smov %s3594_s26  ;;  %s4816_s26 = smov %s3744_s12 }
 0x5ca   : > { %s4817_s27 = smov %s3732_s28  ;;  %25 = sbr.rel (!%p23_p2) target bundleno = 10 (0xa), region = 117 }
 0x5cf   :  { %2593 = vsyncpa [#allocation3], 1 }
 0x5d0   :  { %2595 = vsyncpa [#allocation3 + $0x1], 1 }
 0x5d1   :  { %2596 = vsyncpa [#allocation6], 1 }
 0x5d2   :  { %2597 = vsyncpa [#allocation9], 1 }
 0x5d3   :  { %2598 = vsyncpa [#allocation12], 1 }
 0x5d4   :  { %2599 = vsyncpa [#allocation4], 1 }
 0x5d5   :  { %2601 = vsyncpa [#allocation4 + $0x1], 1 }

</bundles_post_ra>
